<compile_context>
chip_gen: v7x
topology: tpu7x:2x2x1
jax: 0.10.0
libtpu: 0.0.40
codegen_flags: <defaults>
</compile_context>

<pallas_src>
import functools

import jax
import jax.numpy as jnp
from jax import lax
from jax.experimental import pallas as pl
from jax.experimental.pallas import tpu as pltpu


def _round_up(n, m):
    return ((n + m - 1) // m) * m


def _vmem_limit_bytes():
    """Per-generation scoped-VMEM budget (leave headroom for scratch)."""
    try:
        kind = jax.devices()[0].device_kind.lower()
    except Exception:  # pragma: no cover
        kind = ""
    if "v7" in kind or "7x" in kind:      # 64 MiB physical -> leave headroom
        return 56 * 1024 * 1024
    return 100 * 1024 * 1024              # v5e / v6e: 128 MiB physical


# ----------------------------------------------------------------------------
# In-kernel helpers
# ----------------------------------------------------------------------------
def _gru_update(gi, h, whh, bhn):
    """PyTorch GRU cell update, gate order (r, z, n).

    gi : (B, 3H) f32 input-side gates; b_ih and the r/z parts of b_hh folded in.
    h  : (B, H) f32 previous hidden.
    whh: (H, 3H) bf16 recurrent weights (pre-transposed).
    bhn: (1, H) f32 b_hh of the n gate (kept separate: r * (W_hn h + b_hn)).
    """
    H = h.shape[-1]
    gh = jnp.dot(h.astype(whh.dtype), whh, preferred_element_type=jnp.float32)
    r = jax.nn.sigmoid(gi[:, :H] + gh[:, :H])
    z = jax.nn.sigmoid(gi[:, H:2 * H] + gh[:, H:2 * H])
    n = jnp.tanh(gi[:, 2 * H:] + r * (gh[:, 2 * H:] + bhn))
    return (1.0 - z) * n + z * h


def _argmax_onehot(logits):
    """First-max one-hot per row (matches torch .max(1)[1] semantics)."""
    B, P = logits.shape
    m = jnp.max(logits, axis=-1, keepdims=True)
    pos = lax.broadcasted_iota(jnp.int32, (B, P), 1).astype(jnp.float32)
    idx = jnp.min(jnp.where(logits == m, pos, float(P)), axis=-1, keepdims=True)
    return (pos == idx).astype(jnp.float32)


def _log_softmax_lastdim(y):
    s = y - jnp.max(y, axis=-1, keepdims=True)
    return s - jnp.log(jnp.sum(jnp.exp(s), axis=-1, keepdims=True))


# ----------------------------------------------------------------------------
# Small dense kernel (single block; used for the hoisted GEMMs)
# ----------------------------------------------------------------------------
def _dense_kernel(x_ref, wt_ref, b_ref, o_ref, *, activation):
    x = x_ref[...].astype(wt_ref.dtype)
    y = jnp.dot(x, wt_ref[...], preferred_element_type=jnp.float32) + b_ref[...]
    if activation == "tanh":
        y = jnp.tanh(y)
    elif activation == "exp":
        y = jnp.exp(y)
    o_ref[...] = y


def dense(x, w_t, b, activation=None):
    M, N = x.shape[0], w_t.shape[1]
    return pl.pallas_call(
        functools.partial(_dense_kernel, activation=activation),
        out_shape=jax.ShapeDtypeStruct((M, N), jnp.float32),
        compiler_params=pltpu.CompilerParams(
            vmem_limit_bytes=_vmem_limit_bytes()),
    )(x, w_t, b)


# ----------------------------------------------------------------------------
# Fused recurrent kernels (grid-less; time loop via lax.fori_loop)
# ----------------------------------------------------------------------------
def _bigru_kernel(gi_ref, whhf_ref, whhb_ref, bhnf_ref, bhnb_ref,
                  hf_ref, hb_ref):
    """Encoder: forward + backward GRU recurrences in one invocation.

    gi_ref: (T, B, 6H) precomputed input-side gates, fwd||bwd along last dim.
    Weights loaded once into values (single VMEM residency, no double buffer).
    """
    T = gi_ref.shape[0]
    B, H = hf_ref.shape
    whhf = whhf_ref[...]
    whhb = whhb_ref[...]
    bhnf = bhnf_ref[...]
    bhnb = bhnb_ref[...]

    def body(t, carry):
        hf, hb = carry
        gf = gi_ref[t]                    # (B, 6H)
        gb = gi_ref[T - 1 - t]
        hf = _gru_update(gf[:, :3 * H], hf, whhf, bhnf)
        hb = _gru_update(gb[:, 3 * H:], hb, whhb, bhnb)
        return hf, hb

    hf, hb = lax.fori_loop(
        0, T, body,
        (jnp.zeros((B, H), jnp.float32), jnp.zeros((B, H), jnp.float32)))
    hf_ref[...] = hf
    hb_ref[...] = hb


def _rhythm_dec_kernel(giz_ref, whh_ref, bhn_ref, wfb_ref, wout_ref, bout_ref,
                       hinit_ref, out_ref, *, n_step, out_dim):
    B, P = out_ref.shape[1], out_ref.shape[2]
    giz = giz_ref[...]
    whh = whh_ref[...]
    bhn = bhn_ref[...]
    wfb = wfb_ref[...]
    wout = wout_ref[...]
    bout = bout_ref[...]

    iota = lax.broadcasted_iota(jnp.int32, (B, P), 1)
    oh0 = (iota == out_dim - 1).astype(jnp.float32)      # out[:, -1] = 1

    def body(t, carry):
        h, oh = carry
        fb = jnp.dot(oh.astype(wfb.dtype), wfb,
                     preferred_element_type=jnp.float32)
        h = _gru_update(giz + fb, h, whh, bhn)
        logits = jnp.dot(h.astype(wout.dtype), wout,
                         preferred_element_type=jnp.float32) + bout
        out_ref[t] = logits                               # raw logits for now
        return h, _argmax_onehot(logits)

    lax.fori_loop(0, n_step, body, (hinit_ref[...], oh0))

    # Deferred log_softmax on the whole (T, B, P) block (argmax-invariant).
    out_ref[...] = _log_softmax_lastdim(out_ref[...])


def _final_dec_kernel(girest_ref, whh1_ref, bhn1_ref, wfb_ref,
                      wih2_ref, gib2_ref, whh2_ref, bhn2_ref,
                      wout_ref, bout_ref, hinit_ref, out_ref, *, out_dim):
    T, B, P = out_ref.shape
    H = hinit_ref.shape[1]

    whh1 = whh1_ref[...]
    bhn1 = bhn1_ref[...]
    wfb = wfb_ref[...]
    wih2 = wih2_ref[...]
    gib2 = gib2_ref[...]
    whh2 = whh2_ref[...]
    bhn2 = bhn2_ref[...]
    wout = wout_ref[...]
    bout = bout_ref[...]

    iota = lax.broadcasted_iota(jnp.int32, (B, P), 1)
    oh0 = (iota == out_dim - 1).astype(jnp.float32)      # out[:, -1] = 1

    def body(t, carry):
        h0, h1, oh = carry
        fb = jnp.dot(oh.astype(wfb.dtype), wfb,
                     preferred_element_type=jnp.float32)
        h0 = _gru_update(girest_ref[t] + fb, h0, whh1, bhn1)
        h1 = jnp.where(t == 0, h0, h1)                    # hx[1] = hx[0] at i==0
        gi2 = jnp.dot(h0.astype(wih2.dtype), wih2,
                      preferred_element_type=jnp.float32) + gib2
        h1 = _gru_update(gi2, h1, whh2, bhn2)
        logits = jnp.dot(h1.astype(wout.dtype), wout,
                         preferred_element_type=jnp.float32) + bout
        out_ref[t] = logits
        return h0, h1, _argmax_onehot(logits)

    lax.fori_loop(0, T, body,
                  (hinit_ref[...], jnp.zeros((B, H), jnp.float32), oh0))

    out_ref[...] = _log_softmax_lastdim(out_ref[...])


# ----------------------------------------------------------------------------
# Parameter construction (deterministic, in-script; PyTorch layout folded)
# ----------------------------------------------------------------------------
def _raw_linear(key, in_dim, out_dim):
    k1, k2 = jax.random.split(key)
    w = jax.random.normal(k1, (out_dim, in_dim), jnp.float32) * 0.1
    b = jax.random.normal(k2, (out_dim,), jnp.float32) * 0.1
    return w, b


def _raw_gru(key, in_dim, hid):
    k1, k2, k3, k4 = jax.random.split(key, 4)
    w_ih = jax.random.normal(k1, (3 * hid, in_dim), jnp.float32) * 0.1
    w_hh = jax.random.normal(k2, (3 * hid, hid), jnp.float32) * 0.1
    b_ih = jax.random.normal(k3, (3 * hid,), jnp.float32) * 0.1
    b_hh = jax.random.normal(k4, (3 * hid,), jnp.float32) * 0.1
    return w_ih, w_hh, b_ih, b_hh


def _pack_gru(raw, hid):
    w_ih, w_hh, b_ih, b_hh = raw
    # Fold b_ih and the r/z halves of b_hh into one input-side bias; only the
    # n-gate b_hh stays separate (needed inside r * (W_hn h + b_hn)).
    gi_bias = b_ih + jnp.concatenate([b_hh[:2 * hid],
                                      jnp.zeros((hid,), jnp.float32)])
    return {
        "w_ih_t": w_ih.T,                                   # (Din, 3H) f32
        "w_hh_t": w_hh.T.astype(jnp.bfloat16),              # (H, 3H)
        "gi_bias": gi_bias.reshape(1, -1),                  # (1, 3H) f32
        "bhn": b_hh[2 * hid:].reshape(1, hid),               # (1, H)  f32
    }


def _pack_linear(key, in_dim, out_dim):
    w, b = _raw_linear(key, in_dim, out_dim)
    return {"w_t": w.T.astype(jnp.bfloat16), "b": b.reshape(1, out_dim)}


def _pack_linear_out(key, in_dim, out_dim):
    """Output head with the logit lane dim padded to a 128 multiple.

    Padded columns get zero weights and a -1e30 bias so they never win the
    argmax and contribute exactly 0 to the softmax normalisation.
    """
    w, b = _raw_linear(key, in_dim, out_dim)
    P = _round_up(out_dim, 128)
    w_t = jnp.zeros((in_dim, P), jnp.float32).at[:, :out_dim].set(w.T)
    b_p = jnp.full((1, P), -1e30, jnp.float32).at[0, :out_dim].set(b)
    return {"w_t": w_t.astype(jnp.bfloat16), "b": b_p}


def init_ec2vae_params(key, roll_dims, hidden_dims, rhythm_dims, condition_dims,
                       z1_dims, z2_dims):
    ks = jax.random.split(key, 11)
    H = hidden_dims
    P_rhy = _round_up(rhythm_dims, 128)
    P_roll = _round_up(roll_dims, 128)

    # --- encoder: bidirectional GRU, fwd/bwd input projections merged --------
    gf = _pack_gru(_raw_gru(ks[0], roll_dims + condition_dims, H), H)
    gb = _pack_gru(_raw_gru(ks[1], roll_dims + condition_dims, H), H)
    enc = {
        "w_ih_cat_t": jnp.concatenate([gf["w_ih_t"], gb["w_ih_t"]],
                                      axis=1).astype(jnp.bfloat16),   # (Din, 6H)
        "gi_bias_cat": jnp.concatenate([gf["gi_bias"], gb["gi_bias"]], axis=1),
        "w_hh_f_t": gf["w_hh_t"], "w_hh_b_t": gb["w_hh_t"],
        "bhn_f": gf["bhn"], "bhn_b": gb["bhn"],
    }

    # --- rhythm decoder (grucell_0): input layout [out(rhythm), z2] ----------
    g0 = _pack_gru(_raw_gru(ks[4], z2_dims + rhythm_dims, H), H)
    w_fb0 = jnp.zeros((P_rhy, 3 * H), jnp.float32).at[:rhythm_dims].set(
        g0["w_ih_t"][:rhythm_dims])
    out0 = _pack_linear_out(ks[8], H, rhythm_dims)
    dec_rhythm = {
        "w_fb_t": w_fb0.astype(jnp.bfloat16),                          # fed-back one-hot rows
        "w_ih_rest_t": g0["w_ih_t"][rhythm_dims:].astype(jnp.bfloat16),  # z2 segment
        "gi_bias": g0["gi_bias"],
        "w_hh_t": g0["w_hh_t"], "bhn": g0["bhn"],
        "w_out_t": out0["w_t"], "b_out": out0["b"],
    }

    # --- final decoder: grucell_1 [out(roll), rhythm, z1, cond] + grucell_2 --
    g1 = _pack_gru(
        _raw_gru(ks[5], z1_dims + roll_dims + rhythm_dims + condition_dims, H), H)
    g2 = _pack_gru(_raw_gru(ks[6], H, H), H)
    w_fb1 = jnp.zeros((P_roll, 3 * H), jnp.float32).at[:roll_dims].set(
        g1["w_ih_t"][:roll_dims])
    out1 = _pack_linear_out(ks[10], H, roll_dims)
    dec_final = {
        "w_fb_t": w_fb1.astype(jnp.bfloat16),
        "w_ih1_rest_t": g1["w_ih_t"][roll_dims:].astype(jnp.bfloat16),
        "gi_bias1": g1["gi_bias"],
        "w_hh1_t": g1["w_hh_t"], "bhn1": g1["bhn"],
        "w_ih2_t": g2["w_ih_t"].astype(jnp.bfloat16),
        "gi_bias2": g2["gi_bias"],
        "w_hh2_t": g2["w_hh_t"], "bhn2": g2["bhn"],
        "w_out_t": out1["w_t"], "b_out": out1["b"],
    }

    return {
        "enc": enc,
        "linear_mu": _pack_linear(ks[2], 2 * H, z1_dims + z2_dims),
        "linear_var": _pack_linear(ks[3], 2 * H, z1_dims + z2_dims),
        "linear_init_0": _pack_linear(ks[7], z2_dims, H),
        "linear_init_1": _pack_linear(ks[9], z1_dims, H),
        "dec_rhythm": dec_rhythm,
        "dec_final": dec_final,
    }


# ----------------------------------------------------------------------------
# Model pieces (wrappers)
# ----------------------------------------------------------------------------
def encoder(params, x, condition):
    p = params["enc"]
    B, T, _ = x.shape
    H = p["w_hh_f_t"].shape[0]
    Bp = _round_up(B, 8)                               # sublane-aligned batch

    # Hoisted input projection for BOTH directions in one GEMM, produced
    # directly in (T, Bp, 6H) order (transpose done on the small input side).
    xc = jnp.concatenate([x, condition], axis=-1)      # (B, T, Din)
    xc = jnp.pad(xc, ((0, Bp - B), (0, 0), (0, 0)))
    xc_t = jnp.swapaxes(xc, 0, 1)                      # (T, Bp, Din)
    Din = xc_t.shape[-1]
    gi = dense(xc_t.reshape(T * Bp, Din), p["w_ih_cat_t"], p["gi_bias_cat"])
    gi = gi.reshape(T, Bp, 6 * H)

    h_f, h_b = pl.pallas_call(
        _bigru_kernel,
        out_shape=[jax.ShapeDtypeStruct((Bp, H), jnp.float32)] * 2,
        compiler_params=pltpu.CompilerParams(
            vmem_limit_bytes=_vmem_limit_bytes()),
    )(gi, p["w_hh_f_t"], p["w_hh_b_t"], p["bhn_f"], p["bhn_b"])

    henc = jnp.concatenate([h_f, h_b], axis=-1)        # == h_n transposed + flattened
    mu = dense(henc, params["linear_mu"]["w_t"], params["linear_mu"]["b"])
    std = dense(henc, params["linear_var"]["w_t"], params["linear_var"]["b"],
                activation="exp")                      # Normal(mu, scale=exp(.))
    return mu[:B], std[:B]


def rhythm_decoder(params, z2, n_step, rhythm_dims):
    p = params["dec_rhythm"]
    B = z2.shape[0]
    H = p["w_hh_t"].shape[0]
    P = p["w_out_t"].shape[1]
    Bp = _round_up(B, 8)

    z2p = jnp.pad(z2, ((0, Bp - B), (0, 0)))
    gi_z = dense(z2p, p["w_ih_rest_t"], p["gi_bias"])          # constant over t
    hx0 = dense(z2p, params["linear_init_0"]["w_t"],
                params["linear_init_0"]["b"], activation="tanh")

    logp = pl.pallas_call(
        functools.partial(_rhythm_dec_kernel, n_step=n_step, out_dim=rhythm_dims),
        out_shape=jax.ShapeDtypeStruct((n_step, Bp, P), jnp.float32),
        compiler_params=pltpu.CompilerParams(
            vmem_limit_bytes=_vmem_limit_bytes()),
    )(gi_z, p["w_hh_t"], p["bhn"], p["w_fb_t"], p["w_out_t"], p["b_out"], hx0)

    return jnp.swapaxes(logp, 0, 1)[:B, :, :rhythm_dims]       # (B, T, rhythm_dims)


def final_decoder(params, z1, rhythm, condition, n_step, roll_dims):
    p = params["dec_final"]
    B, T, _ = condition.shape
    H = p["w_hh1_t"].shape[0]
    P = p["w_out_t"].shape[1]
    Bp = _round_up(B, 8)

    # Hoisted projection of the [rhythm_t, z1, cond_t] segments (+ biases) for
    # all T in one GEMM; only the fed-back one-hot segment stays in the loop.
    z_rep = jnp.broadcast_to(z1[:, None, :], (B, T, z1.shape[-1]))
    rest = jnp.concatenate([rhythm, z_rep, condition], axis=-1)  # (B, T, D)
    rest = jnp.pad(rest, ((0, Bp - B), (0, 0), (0, 0)))
    rest_t = jnp.swapaxes(rest, 0, 1)                            # (T, Bp, D)
    D = rest_t.shape[-1]
    gi_rest = dense(rest_t.reshape(T * Bp, D), p["w_ih1_rest_t"], p["gi_bias1"])
    gi_rest = gi_rest.reshape(T, Bp, 3 * H)

    z1p = jnp.pad(z1, ((0, Bp - B), (0, 0)))
    hx0 = dense(z1p, params["linear_init_1"]["w_t"],
                params["linear_init_1"]["b"], activation="tanh")

    logp = pl.pallas_call(
        functools.partial(_final_dec_kernel, out_dim=roll_dims),
        out_shape=jax.ShapeDtypeStruct((n_step, Bp, P), jnp.float32),
        compiler_params=pltpu.CompilerParams(
            vmem_limit_bytes=_vmem_limit_bytes()),
    )(gi_rest, p["w_hh1_t"], p["bhn1"], p["w_fb_t"],
      p["w_ih2_t"], p["gi_bias2"], p["w_hh2_t"], p["bhn2"],
      p["w_out_t"], p["b_out"], hx0)

    return jnp.swapaxes(logp, 0, 1)[:B, :, :roll_dims]          # (B, T, roll_dims)


def ec2vae_forward(params, x, condition, key, *, z1_dims, n_step,
                   rhythm_dims, roll_dims):
    mu, std = encoder(params, x, condition)
    mu1, mu2 = mu[:, :z1_dims], mu[:, z1_dims:]
    std1, std2 = std[:, :z1_dims], std[:, z1_dims:]
    k1, k2 = jax.random.split(key)
    # rsample (reparameterised); deterministic given `key`.
    z1 = mu1 + std1 * jax.random.normal(k1, mu1.shape, mu1.dtype)
    z2 = mu2 + std2 * jax.random.normal(k2, mu2.shape, mu2.dtype)
    recon_rhythm = rhythm_decoder(params, z2, n_step, rhythm_dims)
    recon = final_decoder(params, z1, recon_rhythm, condition, n_step, roll_dims)
    return recon, recon_rhythm, mu1, std1, mu2, std2


# ----------------------------------------------------------------------------
if __name__ == "__main__":
    # Small, forward-consistent dims (real model: 130, 2048, 3, 12, 128, 128, 32)
    ROLL, HID, RHY, COND, Z1, Z2, NSTEP = 16, 32, 4, 8, 16, 16, 8
    B = 2

    root = jax.random.PRNGKey(0)
    kp, kx, kc, kz = jax.random.split(root, 4)

    params = init_ec2vae_params(kp, ROLL, HID, RHY, COND, Z1, Z2)

    # x is a piano-roll-like one-hot sequence, condition is a chord vector.
    x_idx = jax.random.randint(kx, (B, NSTEP), 0, ROLL)
    x = jax.nn.one_hot(x_idx, ROLL, dtype=jnp.float32)                # (B, T, ROLL)
    condition = (jax.random.uniform(kc, (B, NSTEP, COND)) > 0.5).astype(jnp.float32)

    fwd = jax.jit(functools.partial(ec2vae_forward, z1_dims=Z1, n_step=NSTEP,
                                    rhythm_dims=RHY, roll_dims=ROLL))

    recon, recon_rhythm, mu1, std1, mu2, std2 = fwd(params, x, condition, kz)
    jax.block_until_ready((recon, recon_rhythm, mu1, std1, mu2, std2))

    assert recon.shape == (B, NSTEP, ROLL)
    assert recon_rhythm.shape == (B, NSTEP, RHY)
    assert mu1.shape == (B, Z1) and std1.shape == (B, Z1)
    assert mu2.shape == (B, Z2) and std2.shape == (B, Z2)
    assert bool(jnp.all(jnp.isfinite(recon))) and bool(jnp.all(jnp.isfinite(recon_rhythm)))
    print("KERNEL_OK")
</pallas_src>

<mosaic_0001>
module attributes {stable_mosaic.version = 11 : i64} {
  func.func @_dense_kernel(%arg0: memref<8x64xf32, #tpu.memory_space<vmem>>, %arg1: memref<64x32xbf16, #tpu.memory_space<vmem>>, %arg2: memref<1x32xf32, #tpu.memory_space<vmem>>, %arg3: memref<8x32xf32, #tpu.memory_space<vmem>>) attributes {dimension_semantics = [], scalar_prefetch = 0 : i64, scratch_operands = 0 : i64, tpu.core_type = #tpu.core_type<tc>} {
    %c0 = arith.constant 0 : index
    %c0_0 = arith.constant 0 : index
    %0 = vector.load %arg0[%c0, %c0_0] : memref<8x64xf32, #tpu.memory_space<vmem>>, vector<8x64xf32>
    %1 = arith.truncf %0 : vector<8x64xf32> to vector<8x64xbf16>
    %c0_1 = arith.constant 0 : index
    %c0_2 = arith.constant 0 : index
    %2 = vector.load %arg1[%c0_1, %c0_2] : memref<64x32xbf16, #tpu.memory_space<vmem>>, vector<64x32xbf16>
    %cst = arith.constant dense<0.000000e+00> : vector<8x32xf32>
    %3 = tpu.matmul %1, %2, %cst {dimension_numbers = #tpu.dot_dimension_numbers<[1], [0], [0], [1], [0, 0, 1, 1], [], []>} : vector<8x64xbf16>, vector<64x32xbf16>, vector<8x32xf32> -> vector<8x32xf32>
    %c0_3 = arith.constant 0 : index
    %c0_4 = arith.constant 0 : index
    %4 = vector.load %arg2[%c0_3, %c0_4] : memref<1x32xf32, #tpu.memory_space<vmem>>, vector<1x32xf32>
    %5 = vector.broadcast %4 : vector<1x32xf32> to vector<8x32xf32>
    %6 = arith.addf %3, %5 : vector<8x32xf32>
    %c0_5 = arith.constant 0 : index
    %c0_6 = arith.constant 0 : index
    %7 = vector.load %arg3[%c0_5, %c0_6] : memref<8x32xf32, #tpu.memory_space<vmem>>, vector<8x32xf32>
    tpu.vector_store %arg3[%c0_5, %c0_6], %6 {strides = array<i32>} : memref<8x32xf32, #tpu.memory_space<vmem>>, vector<8x32xf32>,
    return
  }
}

module attributes {stable_mosaic.version = 11 : i64} {
  func.func @_bigru_kernel(%arg0: memref<8x8x192xf32, #tpu.memory_space<vmem>>, %arg1: memref<32x96xbf16, #tpu.memory_space<vmem>>, %arg2: memref<32x96xbf16, #tpu.memory_space<vmem>>, %arg3: memref<1x32xf32, #tpu.memory_space<vmem>>, %arg4: memref<1x32xf32, #tpu.memory_space<vmem>>, %arg5: memref<8x32xf32, #tpu.memory_space<vmem>>, %arg6: memref<8x32xf32, #tpu.memory_space<vmem>>) attributes {dimension_semantics = [], scalar_prefetch = 0 : i64, scratch_operands = 0 : i64, tpu.core_type = #tpu.core_type<tc>} {
    %c0 = arith.constant 0 : index
    %c0_0 = arith.constant 0 : index
    %0 = vector.load %arg1[%c0, %c0_0] : memref<32x96xbf16, #tpu.memory_space<vmem>>, vector<32x96xbf16>
    %c0_1 = arith.constant 0 : index
    %c0_2 = arith.constant 0 : index
    %1 = vector.load %arg2[%c0_1, %c0_2] : memref<32x96xbf16, #tpu.memory_space<vmem>>, vector<32x96xbf16>
    %c0_3 = arith.constant 0 : index
    %c0_4 = arith.constant 0 : index
    %2 = vector.load %arg3[%c0_3, %c0_4] : memref<1x32xf32, #tpu.memory_space<vmem>>, vector<1x32xf32>
    %c0_5 = arith.constant 0 : index
    %c0_6 = arith.constant 0 : index
    %3 = vector.load %arg4[%c0_5, %c0_6] : memref<1x32xf32, #tpu.memory_space<vmem>>, vector<1x32xf32>
    %cst = arith.constant 0.000000e+00 : f32
    %4 = vector.broadcast %cst : f32 to vector<8x32xf32>
    %cst_7 = arith.constant 0.000000e+00 : f32
    %5 = vector.broadcast %cst_7 : f32 to vector<8x32xf32>
    %c0_i32 = arith.constant 0 : i32
    %c8_i32 = arith.constant 8 : i32
    %6 = arith.addi %c0_i32, %c8_i32 : i32
    %c1_i32 = arith.constant 1 : i32
    %7:2 = scf.for %arg7 = %c0_i32 to %6 step %c1_i32 iter_args(%arg8 = %4, %arg9 = %5) -> (vector<8x32xf32>, vector<8x32xf32>)  : i32 {
      %10 = arith.index_cast %arg7 : i32 to index
      %c0_13 = arith.constant 0 : index
      %c0_14 = arith.constant 0 : index
      %11 = vector.load %arg0[%10, %c0_13, %c0_14] : memref<8x8x192xf32, #tpu.memory_space<vmem>>, vector<1x8x192xf32>
      %12 = vector.shape_cast %11 : vector<1x8x192xf32> to vector<8x192xf32>
      %c7_i32 = arith.constant 7 : i32
      %13 = arith.subi %c7_i32, %arg7 : i32
      %14 = arith.index_cast %13 : i32 to index
      %c0_15 = arith.constant 0 : index
      %c0_16 = arith.constant 0 : index
      %15 = vector.load %arg0[%14, %c0_15, %c0_16] : memref<8x8x192xf32, #tpu.memory_space<vmem>>, vector<1x8x192xf32>
      %16 = vector.shape_cast %15 : vector<1x8x192xf32> to vector<8x192xf32>
      %17 = vector.extract_strided_slice %12 {offsets = [0, 0], sizes = [8, 96], strides = [1, 1]} : vector<8x192xf32> to vector<8x96xf32>
      %18 = arith.truncf %arg8 : vector<8x32xf32> to vector<8x32xbf16>
      %cst_17 = arith.constant dense<0.000000e+00> : vector<8x96xf32>
      %19 = tpu.matmul %18, %0, %cst_17 {dimension_numbers = #tpu.dot_dimension_numbers<[1], [0], [0], [1], [0, 0, 1, 1], [], []>} : vector<8x32xbf16>, vector<32x96xbf16>, vector<8x96xf32> -> vector<8x96xf32>
      %20 = vector.extract_strided_slice %17 {offsets = [0, 0], sizes = [8, 32], strides = [1, 1]} : vector<8x96xf32> to vector<8x32xf32>
      %21 = vector.extract_strided_slice %19 {offsets = [0, 0], sizes = [8, 32], strides = [1, 1]} : vector<8x96xf32> to vector<8x32xf32>
      %22 = arith.addf %20, %21 : vector<8x32xf32>
      %23 = arith.negf %22 : vector<8x32xf32>
      %24 = math.exp %23 : vector<8x32xf32>
      %cst_18 = arith.constant 1.000000e+00 : f32
      %25 = vector.broadcast %cst_18 : f32 to vector<8x32xf32>
      %26 = arith.addf %25, %24 : vector<8x32xf32>
      %27 = arith.divf %25, %26 : vector<8x32xf32>
      %28 = vector.extract_strided_slice %17 {offsets = [0, 32], sizes = [8, 32], strides = [1, 1]} : vector<8x96xf32> to vector<8x32xf32>
      %29 = vector.extract_strided_slice %19 {offsets = [0, 32], sizes = [8, 32], strides = [1, 1]} : vector<8x96xf32> to vector<8x32xf32>
      %30 = arith.addf %28, %29 : vector<8x32xf32>
      %31 = arith.negf %30 : vector<8x32xf32>
      %32 = math.exp %31 : vector<8x32xf32>
      %cst_19 = arith.constant 1.000000e+00 : f32
      %33 = vector.broadcast %cst_19 : f32 to vector<8x32xf32>
      %34 = arith.addf %33, %32 : vector<8x32xf32>
      %35 = arith.divf %33, %34 : vector<8x32xf32>
      %36 = vector.extract_strided_slice %17 {offsets = [0, 64], sizes = [8, 32], strides = [1, 1]} : vector<8x96xf32> to vector<8x32xf32>
      %37 = vector.extract_strided_slice %19 {offsets = [0, 64], sizes = [8, 32], strides = [1, 1]} : vector<8x96xf32> to vector<8x32xf32>
      %38 = vector.broadcast %2 : vector<1x32xf32> to vector<8x32xf32>
      %39 = arith.addf %37, %38 : vector<8x32xf32>
      %40 = arith.mulf %27, %39 : vector<8x32xf32>
      %41 = arith.addf %36, %40 : vector<8x32xf32>
      %42 = math.tanh %41 : vector<8x32xf32>
      %cst_20 = arith.constant 1.000000e+00 : f32
      %43 = vector.broadcast %cst_20 : f32 to vector<8x32xf32>
      %44 = arith.subf %43, %35 : vector<8x32xf32>
      %45 = arith.mulf %44, %42 : vector<8x32xf32>
      %46 = arith.mulf %35, %arg8 : vector<8x32xf32>
      %47 = arith.addf %45, %46 : vector<8x32xf32>
      %48 = vector.extract_strided_slice %16 {offsets = [0, 96], sizes = [8, 96], strides = [1, 1]} : vector<8x192xf32> to vector<8x96xf32>
      %49 = arith.truncf %arg9 : vector<8x32xf32> to vector<8x32xbf16>
      %cst_21 = arith.constant dense<0.000000e+00> : vector<8x96xf32>
      %50 = tpu.matmul %49, %1, %cst_21 {dimension_numbers = #tpu.dot_dimension_numbers<[1], [0], [0], [1], [0, 0, 1, 1], [], []>} : vector<8x32xbf16>, vector<32x96xbf16>, vector<8x96xf32> -> vector<8x96xf32>
      %51 = vector.extract_strided_slice %48 {offsets = [0, 0], sizes = [8, 32], strides = [1, 1]} : vector<8x96xf32> to vector<8x32xf32>
      %52 = vector.extract_strided_slice %50 {offsets = [0, 0], sizes = [8, 32], strides = [1, 1]} : vector<8x96xf32> to vector<8x32xf32>
      %53 = arith.addf %51, %52 : vector<8x32xf32>
      %54 = arith.negf %53 : vector<8x32xf32>
      %55 = math.exp %54 : vector<8x32xf32>
      %cst_22 = arith.constant 1.000000e+00 : f32
      %56 = vector.broadcast %cst_22 : f32 to vector<8x32xf32>
      %57 = arith.addf %56, %55 : vector<8x32xf32>
      %58 = arith.divf %56, %57 : vector<8x32xf32>
      %59 = vector.extract_strided_slice %48 {offsets = [0, 32], sizes = [8, 32], strides = [1, 1]} : vector<8x96xf32> to vector<8x32xf32>
      %60 = vector.extract_strided_slice %50 {offsets = [0, 32], sizes = [8, 32], strides = [1, 1]} : vector<8x96xf32> to vector<8x32xf32>
      %61 = arith.addf %59, %60 : vector<8x32xf32>
      %62 = arith.negf %61 : vector<8x32xf32>
      %63 = math.exp %62 : vector<8x32xf32>
      %cst_23 = arith.constant 1.000000e+00 : f32
      %64 = vector.broadcast %cst_23 : f32 to vector<8x32xf32>
      %65 = arith.addf %64, %63 : vector<8x32xf32>
      %66 = arith.divf %64, %65 : vector<8x32xf32>
      %67 = vector.extract_strided_slice %48 {offsets = [0, 64], sizes = [8, 32], strides = [1, 1]} : vector<8x96xf32> to vector<8x32xf32>
      %68 = vector.extract_strided_slice %50 {offsets = [0, 64], sizes = [8, 32], strides = [1, 1]} : vector<8x96xf32> to vector<8x32xf32>
      %69 = vector.broadcast %3 : vector<1x32xf32> to vector<8x32xf32>
      %70 = arith.addf %68, %69 : vector<8x32xf32>
      %71 = arith.mulf %58, %70 : vector<8x32xf32>
      %72 = arith.addf %67, %71 : vector<8x32xf32>
      %73 = math.tanh %72 : vector<8x32xf32>
      %cst_24 = arith.constant 1.000000e+00 : f32
      %74 = vector.broadcast %cst_24 : f32 to vector<8x32xf32>
      %75 = arith.subf %74, %66 : vector<8x32xf32>
      %76 = arith.mulf %75, %73 : vector<8x32xf32>
      %77 = arith.mulf %66, %arg9 : vector<8x32xf32>
      %78 = arith.addf %76, %77 : vector<8x32xf32>
      scf.yield %47, %78 : vector<8x32xf32>, vector<8x32xf32>
    }
    %c8_i32_8 = arith.constant 8 : i32
    %c0_9 = arith.constant 0 : index
    %c0_10 = arith.constant 0 : index
    %8 = vector.load %arg5[%c0_9, %c0_10] : memref<8x32xf32, #tpu.memory_space<vmem>>, vector<8x32xf32>
    tpu.vector_store %arg5[%c0_9, %c0_10], %7#0 {strides = array<i32>} : memref<8x32xf32, #tpu.memory_space<vmem>>, vector<8x32xf32>,
    %c0_11 = arith.constant 0 : index
    %c0_12 = arith.constant 0 : index
    %9 = vector.load %arg6[%c0_11, %c0_12] : memref<8x32xf32, #tpu.memory_space<vmem>>, vector<8x32xf32>
    tpu.vector_store %arg6[%c0_11, %c0_12], %7#1 {strides = array<i32>} : memref<8x32xf32, #tpu.memory_space<vmem>>, vector<8x32xf32>,
    return
  }
}

module attributes {stable_mosaic.version = 11 : i64} {
  func.func @_dense_kernel(%arg0: memref<8x64xf32, #tpu.memory_space<vmem>>, %arg1: memref<64x32xbf16, #tpu.memory_space<vmem>>, %arg2: memref<1x32xf32, #tpu.memory_space<vmem>>, %arg3: memref<8x32xf32, #tpu.memory_space<vmem>>) attributes {dimension_semantics = [], scalar_prefetch = 0 : i64, scratch_operands = 0 : i64, tpu.core_type = #tpu.core_type<tc>} {
    %c0 = arith.constant 0 : index
    %c0_0 = arith.constant 0 : index
    %0 = vector.load %arg0[%c0, %c0_0] : memref<8x64xf32, #tpu.memory_space<vmem>>, vector<8x64xf32>
    %1 = arith.truncf %0 : vector<8x64xf32> to vector<8x64xbf16>
    %c0_1 = arith.constant 0 : index
    %c0_2 = arith.constant 0 : index
    %2 = vector.load %arg1[%c0_1, %c0_2] : memref<64x32xbf16, #tpu.memory_space<vmem>>, vector<64x32xbf16>
    %cst = arith.constant dense<0.000000e+00> : vector<8x32xf32>
    %3 = tpu.matmul %1, %2, %cst {dimension_numbers = #tpu.dot_dimension_numbers<[1], [0], [0], [1], [0, 0, 1, 1], [], []>} : vector<8x64xbf16>, vector<64x32xbf16>, vector<8x32xf32> -> vector<8x32xf32>
    %c0_3 = arith.constant 0 : index
    %c0_4 = arith.constant 0 : index
    %4 = vector.load %arg2[%c0_3, %c0_4] : memref<1x32xf32, #tpu.memory_space<vmem>>, vector<1x32xf32>
    %5 = vector.broadcast %4 : vector<1x32xf32> to vector<8x32xf32>
    %6 = arith.addf %3, %5 : vector<8x32xf32>
    %7 = math.exp %6 : vector<8x32xf32>
    %c0_5 = arith.constant 0 : index
    %c0_6 = arith.constant 0 : index
    %8 = vector.load %arg3[%c0_5, %c0_6] : memref<8x32xf32, #tpu.memory_space<vmem>>, vector<8x32xf32>
    tpu.vector_store %arg3[%c0_5, %c0_6], %7 {strides = array<i32>} : memref<8x32xf32, #tpu.memory_space<vmem>>, vector<8x32xf32>,
    return
  }
}

module attributes {stable_mosaic.version = 11 : i64} {
  func.func @_dense_kernel(%arg0: memref<64x24xf32, #tpu.memory_space<vmem>>, %arg1: memref<24x192xbf16, #tpu.memory_space<vmem>>, %arg2: memref<1x192xf32, #tpu.memory_space<vmem>>, %arg3: memref<64x192xf32, #tpu.memory_space<vmem>>) attributes {dimension_semantics = [], scalar_prefetch = 0 : i64, scratch_operands = 0 : i64, tpu.core_type = #tpu.core_type<tc>} {
    %c0 = arith.constant 0 : index
    %c0_0 = arith.constant 0 : index
    %0 = vector.load %arg0[%c0, %c0_0] : memref<64x24xf32, #tpu.memory_space<vmem>>, vector<64x24xf32>
    %1 = arith.truncf %0 : vector<64x24xf32> to vector<64x24xbf16>
    %c0_1 = arith.constant 0 : index
    %c0_2 = arith.constant 0 : index
    %2 = vector.load %arg1[%c0_1, %c0_2] : memref<24x192xbf16, #tpu.memory_space<vmem>>, vector<24x192xbf16>
    %cst = arith.constant dense<0.000000e+00> : vector<64x192xf32>
    %3 = tpu.matmul %1, %2, %cst {dimension_numbers = #tpu.dot_dimension_numbers<[1], [0], [0], [1], [0, 0, 1, 1], [], []>} : vector<64x24xbf16>, vector<24x192xbf16>, vector<64x192xf32> -> vector<64x192xf32>
    %c0_3 = arith.constant 0 : index
    %c0_4 = arith.constant 0 : index
    %4 = vector.load %arg2[%c0_3, %c0_4] : memref<1x192xf32, #tpu.memory_space<vmem>>, vector<1x192xf32>
    %5 = vector.broadcast %4 : vector<1x192xf32> to vector<64x192xf32>
    %6 = arith.addf %3, %5 : vector<64x192xf32>
    %c0_5 = arith.constant 0 : index
    %c0_6 = arith.constant 0 : index
    %7 = vector.load %arg3[%c0_5, %c0_6] : memref<64x192xf32, #tpu.memory_space<vmem>>, vector<64x192xf32>
    tpu.vector_store %arg3[%c0_5, %c0_6], %6 {strides = array<i32>} : memref<64x192xf32, #tpu.memory_space<vmem>>, vector<64x192xf32>,
    return
  }
}

module attributes {stable_mosaic.version = 11 : i64} {
  func.func @_dense_kernel(%arg0: memref<8x16xf32, #tpu.memory_space<vmem>>, %arg1: memref<16x96xbf16, #tpu.memory_space<vmem>>, %arg2: memref<1x96xf32, #tpu.memory_space<vmem>>, %arg3: memref<8x96xf32, #tpu.memory_space<vmem>>) attributes {dimension_semantics = [], scalar_prefetch = 0 : i64, scratch_operands = 0 : i64, tpu.core_type = #tpu.core_type<tc>} {
    %c0 = arith.constant 0 : index
    %c0_0 = arith.constant 0 : index
    %0 = vector.load %arg0[%c0, %c0_0] : memref<8x16xf32, #tpu.memory_space<vmem>>, vector<8x16xf32>
    %1 = arith.truncf %0 : vector<8x16xf32> to vector<8x16xbf16>
    %c0_1 = arith.constant 0 : index
    %c0_2 = arith.constant 0 : index
    %2 = vector.load %arg1[%c0_1, %c0_2] : memref<16x96xbf16, #tpu.memory_space<vmem>>, vector<16x96xbf16>
    %cst = arith.constant dense<0.000000e+00> : vector<8x96xf32>
    %3 = tpu.matmul %1, %2, %cst {dimension_numbers = #tpu.dot_dimension_numbers<[1], [0], [0], [1], [0, 0, 1, 1], [], []>} : vector<8x16xbf16>, vector<16x96xbf16>, vector<8x96xf32> -> vector<8x96xf32>
    %c0_3 = arith.constant 0 : index
    %c0_4 = arith.constant 0 : index
    %4 = vector.load %arg2[%c0_3, %c0_4] : memref<1x96xf32, #tpu.memory_space<vmem>>, vector<1x96xf32>
    %5 = vector.broadcast %4 : vector<1x96xf32> to vector<8x96xf32>
    %6 = arith.addf %3, %5 : vector<8x96xf32>
    %c0_5 = arith.constant 0 : index
    %c0_6 = arith.constant 0 : index
    %7 = vector.load %arg3[%c0_5, %c0_6] : memref<8x96xf32, #tpu.memory_space<vmem>>, vector<8x96xf32>
    tpu.vector_store %arg3[%c0_5, %c0_6], %6 {strides = array<i32>} : memref<8x96xf32, #tpu.memory_space<vmem>>, vector<8x96xf32>,
    return
  }
}

module attributes {stable_mosaic.version = 11 : i64} {
  func.func @_dense_kernel(%arg0: memref<8x16xf32, #tpu.memory_space<vmem>>, %arg1: memref<16x32xbf16, #tpu.memory_space<vmem>>, %arg2: memref<1x32xf32, #tpu.memory_space<vmem>>, %arg3: memref<8x32xf32, #tpu.memory_space<vmem>>) attributes {dimension_semantics = [], scalar_prefetch = 0 : i64, scratch_operands = 0 : i64, tpu.core_type = #tpu.core_type<tc>} {
    %c0 = arith.constant 0 : index
    %c0_0 = arith.constant 0 : index
    %0 = vector.load %arg0[%c0, %c0_0] : memref<8x16xf32, #tpu.memory_space<vmem>>, vector<8x16xf32>
    %1 = arith.truncf %0 : vector<8x16xf32> to vector<8x16xbf16>
    %c0_1 = arith.constant 0 : index
    %c0_2 = arith.constant 0 : index
    %2 = vector.load %arg1[%c0_1, %c0_2] : memref<16x32xbf16, #tpu.memory_space<vmem>>, vector<16x32xbf16>
    %cst = arith.constant dense<0.000000e+00> : vector<8x32xf32>
    %3 = tpu.matmul %1, %2, %cst {dimension_numbers = #tpu.dot_dimension_numbers<[1], [0], [0], [1], [0, 0, 1, 1], [], []>} : vector<8x16xbf16>, vector<16x32xbf16>, vector<8x32xf32> -> vector<8x32xf32>
    %c0_3 = arith.constant 0 : index
    %c0_4 = arith.constant 0 : index
    %4 = vector.load %arg2[%c0_3, %c0_4] : memref<1x32xf32, #tpu.memory_space<vmem>>, vector<1x32xf32>
    %5 = vector.broadcast %4 : vector<1x32xf32> to vector<8x32xf32>
    %6 = arith.addf %3, %5 : vector<8x32xf32>
    %7 = math.tanh %6 : vector<8x32xf32>
    %c0_5 = arith.constant 0 : index
    %c0_6 = arith.constant 0 : index
    %8 = vector.load %arg3[%c0_5, %c0_6] : memref<8x32xf32, #tpu.memory_space<vmem>>, vector<8x32xf32>
    tpu.vector_store %arg3[%c0_5, %c0_6], %7 {strides = array<i32>} : memref<8x32xf32, #tpu.memory_space<vmem>>, vector<8x32xf32>,
    return
  }
}

module attributes {stable_mosaic.version = 11 : i64} {
  func.func @_rhythm_dec_kernel(%arg0: memref<8x96xf32, #tpu.memory_space<vmem>>, %arg1: memref<32x96xbf16, #tpu.memory_space<vmem>>, %arg2: memref<1x32xf32, #tpu.memory_space<vmem>>, %arg3: memref<128x96xbf16, #tpu.memory_space<vmem>>, %arg4: memref<32x128xbf16, #tpu.memory_space<vmem>>, %arg5: memref<1x128xf32, #tpu.memory_space<vmem>>, %arg6: memref<8x32xf32, #tpu.memory_space<vmem>>, %arg7: memref<8x8x128xf32, #tpu.memory_space<vmem>>) attributes {dimension_semantics = [], scalar_prefetch = 0 : i64, scratch_operands = 0 : i64, tpu.core_type = #tpu.core_type<tc>} {
    %c0 = arith.constant 0 : index
    %c0_0 = arith.constant 0 : index
    %0 = vector.load %arg0[%c0, %c0_0] : memref<8x96xf32, #tpu.memory_space<vmem>>, vector<8x96xf32>
    %c0_1 = arith.constant 0 : index
    %c0_2 = arith.constant 0 : index
    %1 = vector.load %arg1[%c0_1, %c0_2] : memref<32x96xbf16, #tpu.memory_space<vmem>>, vector<32x96xbf16>
    %c0_3 = arith.constant 0 : index
    %c0_4 = arith.constant 0 : index
    %2 = vector.load %arg2[%c0_3, %c0_4] : memref<1x32xf32, #tpu.memory_space<vmem>>, vector<1x32xf32>
    %c0_5 = arith.constant 0 : index
    %c0_6 = arith.constant 0 : index
    %3 = vector.load %arg3[%c0_5, %c0_6] : memref<128x96xbf16, #tpu.memory_space<vmem>>, vector<128x96xbf16>
    %c0_7 = arith.constant 0 : index
    %c0_8 = arith.constant 0 : index
    %4 = vector.load %arg4[%c0_7, %c0_8] : memref<32x128xbf16, #tpu.memory_space<vmem>>, vector<32x128xbf16>
    %c0_9 = arith.constant 0 : index
    %c0_10 = arith.constant 0 : index
    %5 = vector.load %arg5[%c0_9, %c0_10] : memref<1x128xf32, #tpu.memory_space<vmem>>, vector<1x128xf32>
    %6 = tpu.iota {dimensions = array<i32: 1>} : vector<8x128xi32>
    %c3_i32 = arith.constant 3 : i32
    %7 = vector.broadcast %c3_i32 : i32 to vector<8x128xi32>
    %8 = arith.cmpi eq, %6, %7 : vector<8x128xi32>
    %9 = arith.extui %8 : vector<8x128xi1> to vector<8x128xi32>
    %10 = arith.sitofp %9 : vector<8x128xi32> to vector<8x128xf32>
    %c0_11 = arith.constant 0 : index
    %c0_12 = arith.constant 0 : index
    %11 = vector.load %arg6[%c0_11, %c0_12] : memref<8x32xf32, #tpu.memory_space<vmem>>, vector<8x32xf32>
    %c0_i32 = arith.constant 0 : i32
    %c8_i32 = arith.constant 8 : i32
    %12 = arith.addi %c0_i32, %c8_i32 : i32
    %c1_i32 = arith.constant 1 : i32
    %13:2 = scf.for %arg8 = %c0_i32 to %12 step %c1_i32 iter_args(%arg9 = %11, %arg10 = %10) -> (vector<8x32xf32>, vector<8x128xf32>)  : i32 {
      %26 = arith.truncf %arg10 : vector<8x128xf32> to vector<8x128xbf16>
      %cst_21 = arith.constant dense<0.000000e+00> : vector<8x96xf32>
      %27 = tpu.matmul %26, %3, %cst_21 {dimension_numbers = #tpu.dot_dimension_numbers<[1], [0], [0], [1], [0, 0, 1, 1], [], []>} : vector<8x128xbf16>, vector<128x96xbf16>, vector<8x96xf32> -> vector<8x96xf32>
      %28 = arith.addf %0, %27 : vector<8x96xf32>
      %29 = arith.truncf %arg9 : vector<8x32xf32> to vector<8x32xbf16>
      %cst_22 = arith.constant dense<0.000000e+00> : vector<8x96xf32>
      %30 = tpu.matmul %29, %1, %cst_22 {dimension_numbers = #tpu.dot_dimension_numbers<[1], [0], [0], [1], [0, 0, 1, 1], [], []>} : vector<8x32xbf16>, vector<32x96xbf16>, vector<8x96xf32> -> vector<8x96xf32>
      %31 = vector.extract_strided_slice %28 {offsets = [0, 0], sizes = [8, 32], strides = [1, 1]} : vector<8x96xf32> to vector<8x32xf32>
      %32 = vector.extract_strided_slice %30 {offsets = [0, 0], sizes = [8, 32], strides = [1, 1]} : vector<8x96xf32> to vector<8x32xf32>
      %33 = arith.addf %31, %32 : vector<8x32xf32>
      %34 = arith.negf %33 : vector<8x32xf32>
      %35 = math.exp %34 : vector<8x32xf32>
      %cst_23 = arith.constant 1.000000e+00 : f32
      %36 = vector.broadcast %cst_23 : f32 to vector<8x32xf32>
      %37 = arith.addf %36, %35 : vector<8x32xf32>
      %38 = arith.divf %36, %37 : vector<8x32xf32>
      %39 = vector.extract_strided_slice %28 {offsets = [0, 32], sizes = [8, 32], strides = [1, 1]} : vector<8x96xf32> to vector<8x32xf32>
      %40 = vector.extract_strided_slice %30 {offsets = [0, 32], sizes = [8, 32], strides = [1, 1]} : vector<8x96xf32> to vector<8x32xf32>
      %41 = arith.addf %39, %40 : vector<8x32xf32>
      %42 = arith.negf %41 : vector<8x32xf32>
      %43 = math.exp %42 : vector<8x32xf32>
      %cst_24 = arith.constant 1.000000e+00 : f32
      %44 = vector.broadcast %cst_24 : f32 to vector<8x32xf32>
      %45 = arith.addf %44, %43 : vector<8x32xf32>
      %46 = arith.divf %44, %45 : vector<8x32xf32>
      %47 = vector.extract_strided_slice %28 {offsets = [0, 64], sizes = [8, 32], strides = [1, 1]} : vector<8x96xf32> to vector<8x32xf32>
      %48 = vector.extract_strided_slice %30 {offsets = [0, 64], sizes = [8, 32], strides = [1, 1]} : vector<8x96xf32> to vector<8x32xf32>
      %49 = vector.broadcast %2 : vector<1x32xf32> to vector<8x32xf32>
      %50 = arith.addf %48, %49 : vector<8x32xf32>
      %51 = arith.mulf %38, %50 : vector<8x32xf32>
      %52 = arith.addf %47, %51 : vector<8x32xf32>
      %53 = math.tanh %52 : vector<8x32xf32>
      %cst_25 = arith.constant 1.000000e+00 : f32
      %54 = vector.broadcast %cst_25 : f32 to vector<8x32xf32>
      %55 = arith.subf %54, %46 : vector<8x32xf32>
      %56 = arith.mulf %55, %53 : vector<8x32xf32>
      %57 = arith.mulf %46, %arg9 : vector<8x32xf32>
      %58 = arith.addf %56, %57 : vector<8x32xf32>
      %59 = arith.truncf %58 : vector<8x32xf32> to vector<8x32xbf16>
      %cst_26 = arith.constant dense<0.000000e+00> : vector<8x128xf32>
      %60 = tpu.matmul %59, %4, %cst_26 {dimension_numbers = #tpu.dot_dimension_numbers<[1], [0], [0], [1], [0, 0, 1, 1], [], []>} : vector<8x32xbf16>, vector<32x128xbf16>, vector<8x128xf32> -> vector<8x128xf32>
      %61 = vector.broadcast %5 : vector<1x128xf32> to vector<8x128xf32>
      %62 = arith.addf %60, %61 : vector<8x128xf32>
      %63 = arith.index_cast %arg8 : i32 to index
      %c0_27 = arith.constant 0 : index
      %c0_28 = arith.constant 0 : index
      %64 = vector.load %arg7[%63, %c0_27, %c0_28] : memref<8x8x128xf32, #tpu.memory_space<vmem>>, vector<1x8x128xf32>
      %65 = vector.shape_cast %64 : vector<1x8x128xf32> to vector<8x128xf32>
      %66 = vector.shape_cast %62 : vector<8x128xf32> to vector<1x8x128xf32>
      tpu.vector_store %arg7[%63, %c0_27, %c0_28], %66 {strides = array<i32>} : memref<8x8x128xf32, #tpu.memory_space<vmem>>, vector<1x8x128xf32>,
      %cst_29 = arith.constant dense<0xFF800000> : vector<8xf32>
      %67 = vector.multi_reduction <maximumf>, %62, %cst_29 [1] : vector<8x128xf32> to vector<8xf32>
      %68 = vector.shape_cast %67 : vector<8xf32> to vector<8x1xf32>
      %69 = tpu.iota {dimensions = array<i32: 1>} : vector<8x128xi32>
      %70 = arith.sitofp %69 : vector<8x128xi32> to vector<8x128xf32>
      %71 = vector.broadcast %68 : vector<8x1xf32> to vector<8x128xf32>
      %72 = arith.cmpf oeq, %62, %71 : vector<8x128xf32>
      %cst_30 = arith.constant 1.280000e+02 : f32
      %73 = vector.broadcast %cst_30 : f32 to vector<8x128xf32>
      %74 = arith.select %72, %70, %73 : vector<8x128xi1>, vector<8x128xf32>
      %cst_31 = arith.constant dense<0x7F800000> : vector<8xf32>
      %75 = vector.multi_reduction <minimumf>, %74, %cst_31 [1] : vector<8x128xf32> to vector<8xf32>
      %76 = vector.shape_cast %75 : vector<8xf32> to vector<8x1xf32>
      %77 = vector.broadcast %76 : vector<8x1xf32> to vector<8x128xf32>
      %78 = arith.cmpf oeq, %70, %77 : vector<8x128xf32>
      %79 = arith.extui %78 : vector<8x128xi1> to vector<8x128xi32>
      %80 = arith.sitofp %79 : vector<8x128xi32> to vector<8x128xf32>
      scf.yield %58, %80 : vector<8x32xf32>, vector<8x128xf32>
    }
    %c8_i32_13 = arith.constant 8 : i32
    %c0_14 = arith.constant 0 : index
    %c0_15 = arith.constant 0 : index
    %c0_16 = arith.constant 0 : index
    %14 = vector.load %arg7[%c0_14, %c0_15, %c0_16] : memref<8x8x128xf32, #tpu.memory_space<vmem>>, vector<8x8x128xf32>
    %cst = arith.constant dense<0xFF800000> : vector<8x8xf32>
    %15 = vector.multi_reduction <maximumf>, %14, %cst [2] : vector<8x8x128xf32> to vector<8x8xf32>
    %16 = vector.shape_cast %15 : vector<8x8xf32> to vector<8x8x1xf32>
    %17 = vector.broadcast %16 : vector<8x8x1xf32> to vector<8x8x128xf32>
    %18 = arith.subf %14, %17 : vector<8x8x128xf32>
    %19 = math.exp %18 : vector<8x8x128xf32>
    %cst_17 = arith.constant dense<0.000000e+00> : vector<8x8xf32>
    %20 = vector.multi_reduction <add>, %19, %cst_17 [2] : vector<8x8x128xf32> to vector<8x8xf32>
    %21 = vector.shape_cast %20 : vector<8x8xf32> to vector<8x8x1xf32>
    %22 = math.log %21 : vector<8x8x1xf32>
    %23 = vector.broadcast %22 : vector<8x8x1xf32> to vector<8x8x128xf32>
    %24 = arith.subf %18, %23 : vector<8x8x128xf32>
    %c0_18 = arith.constant 0 : index
    %c0_19 = arith.constant 0 : index
    %c0_20 = arith.constant 0 : index
    %25 = vector.load %arg7[%c0_18, %c0_19, %c0_20] : memref<8x8x128xf32, #tpu.memory_space<vmem>>, vector<8x8x128xf32>
    tpu.vector_store %arg7[%c0_18, %c0_19, %c0_20], %24 {strides = array<i32>} : memref<8x8x128xf32, #tpu.memory_space<vmem>>, vector<8x8x128xf32>,
    return
  }
}

module attributes {stable_mosaic.version = 11 : i64} {
  func.func @_dense_kernel(%arg0: memref<64x28xf32, #tpu.memory_space<vmem>>, %arg1: memref<28x96xbf16, #tpu.memory_space<vmem>>, %arg2: memref<1x96xf32, #tpu.memory_space<vmem>>, %arg3: memref<64x96xf32, #tpu.memory_space<vmem>>) attributes {dimension_semantics = [], scalar_prefetch = 0 : i64, scratch_operands = 0 : i64, tpu.core_type = #tpu.core_type<tc>} {
    %c0 = arith.constant 0 : index
    %c0_0 = arith.constant 0 : index
    %0 = vector.load %arg0[%c0, %c0_0] : memref<64x28xf32, #tpu.memory_space<vmem>>, vector<64x28xf32>
    %1 = arith.truncf %0 : vector<64x28xf32> to vector<64x28xbf16>
    %c0_1 = arith.constant 0 : index
    %c0_2 = arith.constant 0 : index
    %2 = vector.load %arg1[%c0_1, %c0_2] : memref<28x96xbf16, #tpu.memory_space<vmem>>, vector<28x96xbf16>
    %cst = arith.constant dense<0.000000e+00> : vector<64x96xf32>
    %3 = tpu.matmul %1, %2, %cst {dimension_numbers = #tpu.dot_dimension_numbers<[1], [0], [0], [1], [0, 0, 1, 1], [], []>} : vector<64x28xbf16>, vector<28x96xbf16>, vector<64x96xf32> -> vector<64x96xf32>
    %c0_3 = arith.constant 0 : index
    %c0_4 = arith.constant 0 : index
    %4 = vector.load %arg2[%c0_3, %c0_4] : memref<1x96xf32, #tpu.memory_space<vmem>>, vector<1x96xf32>
    %5 = vector.broadcast %4 : vector<1x96xf32> to vector<64x96xf32>
    %6 = arith.addf %3, %5 : vector<64x96xf32>
    %c0_5 = arith.constant 0 : index
    %c0_6 = arith.constant 0 : index
    %7 = vector.load %arg3[%c0_5, %c0_6] : memref<64x96xf32, #tpu.memory_space<vmem>>, vector<64x96xf32>
    tpu.vector_store %arg3[%c0_5, %c0_6], %6 {strides = array<i32>} : memref<64x96xf32, #tpu.memory_space<vmem>>, vector<64x96xf32>,
    return
  }
}

module attributes {stable_mosaic.version = 11 : i64} {
  func.func @_final_dec_kernel(%arg0: memref<8x8x96xf32, #tpu.memory_space<vmem>>, %arg1: memref<32x96xbf16, #tpu.memory_space<vmem>>, %arg2: memref<1x32xf32, #tpu.memory_space<vmem>>, %arg3: memref<128x96xbf16, #tpu.memory_space<vmem>>, %arg4: memref<32x96xbf16, #tpu.memory_space<vmem>>, %arg5: memref<1x96xf32, #tpu.memory_space<vmem>>, %arg6: memref<32x96xbf16, #tpu.memory_space<vmem>>, %arg7: memref<1x32xf32, #tpu.memory_space<vmem>>, %arg8: memref<32x128xbf16, #tpu.memory_space<vmem>>, %arg9: memref<1x128xf32, #tpu.memory_space<vmem>>, %arg10: memref<8x32xf32, #tpu.memory_space<vmem>>, %arg11: memref<8x8x128xf32, #tpu.memory_space<vmem>>) attributes {dimension_semantics = [], scalar_prefetch = 0 : i64, scratch_operands = 0 : i64, tpu.core_type = #tpu.core_type<tc>} {
    %c0 = arith.constant 0 : index
    %c0_0 = arith.constant 0 : index
    %0 = vector.load %arg1[%c0, %c0_0] : memref<32x96xbf16, #tpu.memory_space<vmem>>, vector<32x96xbf16>
    %c0_1 = arith.constant 0 : index
    %c0_2 = arith.constant 0 : index
    %1 = vector.load %arg2[%c0_1, %c0_2] : memref<1x32xf32, #tpu.memory_space<vmem>>, vector<1x32xf32>
    %c0_3 = arith.constant 0 : index
    %c0_4 = arith.constant 0 : index
    %2 = vector.load %arg3[%c0_3, %c0_4] : memref<128x96xbf16, #tpu.memory_space<vmem>>, vector<128x96xbf16>
    %c0_5 = arith.constant 0 : index
    %c0_6 = arith.constant 0 : index
    %3 = vector.load %arg4[%c0_5, %c0_6] : memref<32x96xbf16, #tpu.memory_space<vmem>>, vector<32x96xbf16>
    %c0_7 = arith.constant 0 : index
    %c0_8 = arith.constant 0 : index
    %4 = vector.load %arg5[%c0_7, %c0_8] : memref<1x96xf32, #tpu.memory_space<vmem>>, vector<1x96xf32>
    %c0_9 = arith.constant 0 : index
    %c0_10 = arith.constant 0 : index
    %5 = vector.load %arg6[%c0_9, %c0_10] : memref<32x96xbf16, #tpu.memory_space<vmem>>, vector<32x96xbf16>
    %c0_11 = arith.constant 0 : index
    %c0_12 = arith.constant 0 : index
    %6 = vector.load %arg7[%c0_11, %c0_12] : memref<1x32xf32, #tpu.memory_space<vmem>>, vector<1x32xf32>
    %c0_13 = arith.constant 0 : index
    %c0_14 = arith.constant 0 : index
    %7 = vector.load %arg8[%c0_13, %c0_14] : memref<32x128xbf16, #tpu.memory_space<vmem>>, vector<32x128xbf16>
    %c0_15 = arith.constant 0 : index
    %c0_16 = arith.constant 0 : index
    %8 = vector.load %arg9[%c0_15, %c0_16] : memref<1x128xf32, #tpu.memory_space<vmem>>, vector<1x128xf32>
    %9 = tpu.iota {dimensions = array<i32: 1>} : vector<8x128xi32>
    %c15_i32 = arith.constant 15 : i32
    %10 = vector.broadcast %c15_i32 : i32 to vector<8x128xi32>
    %11 = arith.cmpi eq, %9, %10 : vector<8x128xi32>
    %12 = arith.extui %11 : vector<8x128xi1> to vector<8x128xi32>
    %13 = arith.sitofp %12 : vector<8x128xi32> to vector<8x128xf32>
    %c0_17 = arith.constant 0 : index
    %c0_18 = arith.constant 0 : index
    %14 = vector.load %arg10[%c0_17, %c0_18] : memref<8x32xf32, #tpu.memory_space<vmem>>, vector<8x32xf32>
    %cst = arith.constant 0.000000e+00 : f32
    %15 = vector.broadcast %cst : f32 to vector<8x32xf32>
    %c0_i32 = arith.constant 0 : i32
    %c8_i32 = arith.constant 8 : i32
    %16 = arith.addi %c0_i32, %c8_i32 : i32
    %c1_i32 = arith.constant 1 : i32
    %17:3 = scf.for %arg12 = %c0_i32 to %16 step %c1_i32 iter_args(%arg13 = %14, %arg14 = %15, %arg15 = %13) -> (vector<8x32xf32>, vector<8x32xf32>, vector<8x128xf32>)  : i32 {
      %30 = arith.truncf %arg15 : vector<8x128xf32> to vector<8x128xbf16>
      %cst_28 = arith.constant dense<0.000000e+00> : vector<8x96xf32>
      %31 = tpu.matmul %30, %2, %cst_28 {dimension_numbers = #tpu.dot_dimension_numbers<[1], [0], [0], [1], [0, 0, 1, 1], [], []>} : vector<8x128xbf16>, vector<128x96xbf16>, vector<8x96xf32> -> vector<8x96xf32>
      %32 = arith.index_cast %arg12 : i32 to index
      %c0_29 = arith.constant 0 : index
      %c0_30 = arith.constant 0 : index
      %33 = vector.load %arg0[%32, %c0_29, %c0_30] : memref<8x8x96xf32, #tpu.memory_space<vmem>>, vector<1x8x96xf32>
      %34 = vector.shape_cast %33 : vector<1x8x96xf32> to vector<8x96xf32>
      %35 = arith.addf %34, %31 : vector<8x96xf32>
      %36 = arith.truncf %arg13 : vector<8x32xf32> to vector<8x32xbf16>
      %cst_31 = arith.constant dense<0.000000e+00> : vector<8x96xf32>
      %37 = tpu.matmul %36, %0, %cst_31 {dimension_numbers = #tpu.dot_dimension_numbers<[1], [0], [0], [1], [0, 0, 1, 1], [], []>} : vector<8x32xbf16>, vector<32x96xbf16>, vector<8x96xf32> -> vector<8x96xf32>
      %38 = vector.extract_strided_slice %35 {offsets = [0, 0], sizes = [8, 32], strides = [1, 1]} : vector<8x96xf32> to vector<8x32xf32>
      %39 = vector.extract_strided_slice %37 {offsets = [0, 0], sizes = [8, 32], strides = [1, 1]} : vector<8x96xf32> to vector<8x32xf32>
      %40 = arith.addf %38, %39 : vector<8x32xf32>
      %41 = arith.negf %40 : vector<8x32xf32>
      %42 = math.exp %41 : vector<8x32xf32>
      %cst_32 = arith.constant 1.000000e+00 : f32
      %43 = vector.broadcast %cst_32 : f32 to vector<8x32xf32>
      %44 = arith.addf %43, %42 : vector<8x32xf32>
      %45 = arith.divf %43, %44 : vector<8x32xf32>
      %46 = vector.extract_strided_slice %35 {offsets = [0, 32], sizes = [8, 32], strides = [1, 1]} : vector<8x96xf32> to vector<8x32xf32>
      %47 = vector.extract_strided_slice %37 {offsets = [0, 32], sizes = [8, 32], strides = [1, 1]} : vector<8x96xf32> to vector<8x32xf32>
      %48 = arith.addf %46, %47 : vector<8x32xf32>
      %49 = arith.negf %48 : vector<8x32xf32>
      %50 = math.exp %49 : vector<8x32xf32>
      %cst_33 = arith.constant 1.000000e+00 : f32
      %51 = vector.broadcast %cst_33 : f32 to vector<8x32xf32>
      %52 = arith.addf %51, %50 : vector<8x32xf32>
      %53 = arith.divf %51, %52 : vector<8x32xf32>
      %54 = vector.extract_strided_slice %35 {offsets = [0, 64], sizes = [8, 32], strides = [1, 1]} : vector<8x96xf32> to vector<8x32xf32>
      %55 = vector.extract_strided_slice %37 {offsets = [0, 64], sizes = [8, 32], strides = [1, 1]} : vector<8x96xf32> to vector<8x32xf32>
      %56 = vector.broadcast %1 : vector<1x32xf32> to vector<8x32xf32>
      %57 = arith.addf %55, %56 : vector<8x32xf32>
      %58 = arith.mulf %45, %57 : vector<8x32xf32>
      %59 = arith.addf %54, %58 : vector<8x32xf32>
      %60 = math.tanh %59 : vector<8x32xf32>
      %cst_34 = arith.constant 1.000000e+00 : f32
      %61 = vector.broadcast %cst_34 : f32 to vector<8x32xf32>
      %62 = arith.subf %61, %53 : vector<8x32xf32>
      %63 = arith.mulf %62, %60 : vector<8x32xf32>
      %64 = arith.mulf %53, %arg13 : vector<8x32xf32>
      %65 = arith.addf %63, %64 : vector<8x32xf32>
      %c0_i32_35 = arith.constant 0 : i32
      %66 = arith.cmpi eq, %arg12, %c0_i32_35 : i32
      %67 = arith.select %66, %65, %arg14 : vector<8x32xf32>
      %68 = arith.truncf %65 : vector<8x32xf32> to vector<8x32xbf16>
      %cst_36 = arith.constant dense<0.000000e+00> : vector<8x96xf32>
      %69 = tpu.matmul %68, %3, %cst_36 {dimension_numbers = #tpu.dot_dimension_numbers<[1], [0], [0], [1], [0, 0, 1, 1], [], []>} : vector<8x32xbf16>, vector<32x96xbf16>, vector<8x96xf32> -> vector<8x96xf32>
      %70 = vector.broadcast %4 : vector<1x96xf32> to vector<8x96xf32>
      %71 = arith.addf %69, %70 : vector<8x96xf32>
      %72 = arith.truncf %67 : vector<8x32xf32> to vector<8x32xbf16>
      %cst_37 = arith.constant dense<0.000000e+00> : vector<8x96xf32>
      %73 = tpu.matmul %72, %5, %cst_37 {dimension_numbers = #tpu.dot_dimension_numbers<[1], [0], [0], [1], [0, 0, 1, 1], [], []>} : vector<8x32xbf16>, vector<32x96xbf16>, vector<8x96xf32> -> vector<8x96xf32>
      %74 = vector.extract_strided_slice %71 {offsets = [0, 0], sizes = [8, 32], strides = [1, 1]} : vector<8x96xf32> to vector<8x32xf32>
      %75 = vector.extract_strided_slice %73 {offsets = [0, 0], sizes = [8, 32], strides = [1, 1]} : vector<8x96xf32> to vector<8x32xf32>
      %76 = arith.addf %74, %75 : vector<8x32xf32>
      %77 = arith.negf %76 : vector<8x32xf32>
      %78 = math.exp %77 : vector<8x32xf32>
      %cst_38 = arith.constant 1.000000e+00 : f32
      %79 = vector.broadcast %cst_38 : f32 to vector<8x32xf32>
      %80 = arith.addf %79, %78 : vector<8x32xf32>
      %81 = arith.divf %79, %80 : vector<8x32xf32>
      %82 = vector.extract_strided_slice %71 {offsets = [0, 32], sizes = [8, 32], strides = [1, 1]} : vector<8x96xf32> to vector<8x32xf32>
      %83 = vector.extract_strided_slice %73 {offsets = [0, 32], sizes = [8, 32], strides = [1, 1]} : vector<8x96xf32> to vector<8x32xf32>
      %84 = arith.addf %82, %83 : vector<8x32xf32>
      %85 = arith.negf %84 : vector<8x32xf32>
      %86 = math.exp %85 : vector<8x32xf32>
      %cst_39 = arith.constant 1.000000e+00 : f32
      %87 = vector.broadcast %cst_39 : f32 to vector<8x32xf32>
      %88 = arith.addf %87, %86 : vector<8x32xf32>
      %89 = arith.divf %87, %88 : vector<8x32xf32>
      %90 = vector.extract_strided_slice %71 {offsets = [0, 64], sizes = [8, 32], strides = [1, 1]} : vector<8x96xf32> to vector<8x32xf32>
      %91 = vector.extract_strided_slice %73 {offsets = [0, 64], sizes = [8, 32], strides = [1, 1]} : vector<8x96xf32> to vector<8x32xf32>
      %92 = vector.broadcast %6 : vector<1x32xf32> to vector<8x32xf32>
      %93 = arith.addf %91, %92 : vector<8x32xf32>
      %94 = arith.mulf %81, %93 : vector<8x32xf32>
      %95 = arith.addf %90, %94 : vector<8x32xf32>
      %96 = math.tanh %95 : vector<8x32xf32>
      %cst_40 = arith.constant 1.000000e+00 : f32
      %97 = vector.broadcast %cst_40 : f32 to vector<8x32xf32>
      %98 = arith.subf %97, %89 : vector<8x32xf32>
      %99 = arith.mulf %98, %96 : vector<8x32xf32>
      %100 = arith.mulf %89, %67 : vector<8x32xf32>
      %101 = arith.addf %99, %100 : vector<8x32xf32>
      %102 = arith.truncf %101 : vector<8x32xf32> to vector<8x32xbf16>
      %cst_41 = arith.constant dense<0.000000e+00> : vector<8x128xf32>
      %103 = tpu.matmul %102, %7, %cst_41 {dimension_numbers = #tpu.dot_dimension_numbers<[1], [0], [0], [1], [0, 0, 1, 1], [], []>} : vector<8x32xbf16>, vector<32x128xbf16>, vector<8x128xf32> -> vector<8x128xf32>
      %104 = vector.broadcast %8 : vector<1x128xf32> to vector<8x128xf32>
      %105 = arith.addf %103, %104 : vector<8x128xf32>
      %106 = arith.index_cast %arg12 : i32 to index
      %c0_42 = arith.constant 0 : index
      %c0_43 = arith.constant 0 : index
      %107 = vector.load %arg11[%106, %c0_42, %c0_43] : memref<8x8x128xf32, #tpu.memory_space<vmem>>, vector<1x8x128xf32>
      %108 = vector.shape_cast %107 : vector<1x8x128xf32> to vector<8x128xf32>
      %109 = vector.shape_cast %105 : vector<8x128xf32> to vector<1x8x128xf32>
      tpu.vector_store %arg11[%106, %c0_42, %c0_43], %109 {strides = array<i32>} : memref<8x8x128xf32, #tpu.memory_space<vmem>>, vector<1x8x128xf32>,
      %cst_44 = arith.constant dense<0xFF800000> : vector<8xf32>
      %110 = vector.multi_reduction <maximumf>, %105, %cst_44 [1] : vector<8x128xf32> to vector<8xf32>
      %111 = vector.shape_cast %110 : vector<8xf32> to vector<8x1xf32>
      %112 = tpu.iota {dimensions = array<i32: 1>} : vector<8x128xi32>
      %113 = arith.sitofp %112 : vector<8x128xi32> to vector<8x128xf32>
      %114 = vector.broadcast %111 : vector<8x1xf32> to vector<8x128xf32>
      %115 = arith.cmpf oeq, %105, %114 : vector<8x128xf32>
      %cst_45 = arith.constant 1.280000e+02 : f32
      %116 = vector.broadcast %cst_45 : f32 to vector<8x128xf32>
      %117 = arith.select %115, %113, %116 : vector<8x128xi1>, vector<8x128xf32>
      %cst_46 = arith.constant dense<0x7F800000> : vector<8xf32>
      %118 = vector.multi_reduction <minimumf>, %117, %cst_46 [1] : vector<8x128xf32> to vector<8xf32>
      %119 = vector.shape_cast %118 : vector<8xf32> to vector<8x1xf32>
      %120 = vector.broadcast %119 : vector<8x1xf32> to vector<8x128xf32>
      %121 = arith.cmpf oeq, %113, %120 : vector<8x128xf32>
      %122 = arith.extui %121 : vector<8x128xi1> to vector<8x128xi32>
      %123 = arith.sitofp %122 : vector<8x128xi32> to vector<8x128xf32>
      scf.yield %65, %101, %123 : vector<8x32xf32>, vector<8x32xf32>, vector<8x128xf32>
    }
    %c8_i32_19 = arith.constant 8 : i32
    %c0_20 = arith.constant 0 : index
    %c0_21 = arith.constant 0 : index
    %c0_22 = arith.constant 0 : index
    %18 = vector.load %arg11[%c0_20, %c0_21, %c0_22] : memref<8x8x128xf32, #tpu.memory_space<vmem>>, vector<8x8x128xf32>
    %cst_23 = arith.constant dense<0xFF800000> : vector<8x8xf32>
    %19 = vector.multi_reduction <maximumf>, %18, %cst_23 [2] : vector<8x8x128xf32> to vector<8x8xf32>
    %20 = vector.shape_cast %19 : vector<8x8xf32> to vector<8x8x1xf32>
    %21 = vector.broadcast %20 : vector<8x8x1xf32> to vector<8x8x128xf32>
    %22 = arith.subf %18, %21 : vector<8x8x128xf32>
    %23 = math.exp %22 : vector<8x8x128xf32>
    %cst_24 = arith.constant dense<0.000000e+00> : vector<8x8xf32>
    %24 = vector.multi_reduction <add>, %23, %cst_24 [2] : vector<8x8x128xf32> to vector<8x8xf32>
    %25 = vector.shape_cast %24 : vector<8x8xf32> to vector<8x8x1xf32>
    %26 = math.log %25 : vector<8x8x1xf32>
    %27 = vector.broadcast %26 : vector<8x8x1xf32> to vector<8x8x128xf32>
    %28 = arith.subf %22, %27 : vector<8x8x128xf32>
    %c0_25 = arith.constant 0 : index
    %c0_26 = arith.constant 0 : index
    %c0_27 = arith.constant 0 : index
    %29 = vector.load %arg11[%c0_25, %c0_26, %c0_27] : memref<8x8x128xf32, #tpu.memory_space<vmem>>, vector<8x8x128xf32>
    tpu.vector_store %arg11[%c0_25, %c0_26, %c0_27], %28 {strides = array<i32>} : memref<8x8x128xf32, #tpu.memory_space<vmem>>, vector<8x8x128xf32>,
    return
  }
}

</mosaic_0001>

<bundles_post_ra>
// kernel: ec2vae_forward.13
= control target key start
LH: loop header
LB: loop body
LE: loop exit
PB: predicated region body
PF: predicated region fallthrough
CT: control target
= control target key end

     0   :  { %8 = vsyncpa [#allocation3], 0  ;;  %s365_s0 = inlined_call_operand.hbm [shape: f32[8,64], index: 0, kind: input, shape index: {}]   ;;  %s366_s1 = inlined_call_operand.hbm [shape: bf16[64,32], index: 1, kind: input, shape index: {}]   ;;  %s367_s2 = inlined_call_operand.hbm [shape: f32[1,32], index: 2, kind: input, shape index: {}]   ;;  %s368_s3 = inlined_call_operand.hbm [shape: f32[8,32], index: 3, kind: output, shape index: {}]  }
   0x1   :  { %9 = vsyncpa [#allocation6], 0 }
   0x2   :  { %10 = vsyncpa [#allocation4], 0  ;;  %s289_s12 = smov [#allocation5]   ;;  %s195_s16 = scalar_lea.hbm %s366_s1, 512 }
   0x3   :  { %s26_s13 = sshll.u32 %s289_s12, 4  ;;  %p196_p0 = scmp.ne.s32.totalorder %s366_s1, %s195_s16  ;;  %s27_s13 = int_to_ptr.vmem [resolvable:$true] %s26_s13 }
   0x4   :  { %p199_p1 = scmp.lt.u32.totalorder %s195_s16, %s366_s1 }
   0x6   :  { %p201_p2 = pnand %p199_p1, %p196_p0 }
   0x8   :  { %204 = shalt.err (!%p201_p2)
}
   0x9   :  { %s205_s21 = scalar_lea.vmem %s27_s13, 512  ;;  %p210_p4 = scmp.lt.s32.totalorder %s27_s13, %s27_s13 }
   0xa   :  { %p206_p3 = scmp.ne.s32.totalorder %s27_s13, %s205_s21  ;;  %p211_p5 = scmp.lt.s32.totalorder %s205_s21, %s205_s21 }
   0xc   :  { %p212_p6 = por %p211_p5, %p210_p4 }
   0xe   :  { %p213_p7 = pnand %p212_p6, %p206_p3 }
  0x10   :  { %216 = shalt.err (!%p213_p7)
}
  0x11   :  { %s290_s22 = smov 64   ;;  %s291_s23 = smov 4  }
  0x12   :  { %32 = dma.hbm_to_vmem [thread:$0]  %s366_s1, 512, %s27_s13, [#allocation6], %s290_s22, %s290_s22, %s291_s23  }
  0x13   :  { %s292_s26 = smov [#allocation2]   ;;  %s293_s28 = smov [#allocation7]  }
  0x14   :  { %s17_s27 = sshll.u32 %s292_s26, 4  ;;  %s39_s29 = sshll.u32 %s293_s28, 4  ;;  %s18_s27 = int_to_ptr.vmem [resolvable:$true] %s17_s27  ;;  %s40_s29 = int_to_ptr.vmem [resolvable:$true] %s39_s29 }
  0x15   :  { %s217_s5 = scalar_lea.hbm %s365_s0, 128 }
  0x16   :  { %p218_p8 = scmp.ne.s32.totalorder %s365_s0, %s217_s5  ;;  %p221_p9 = scmp.lt.u32.totalorder %s217_s5, %s365_s0 }
  0x18   :  { %p223_p10 = pnand %p221_p9, %p218_p8 }
  0x1a   :  { %226 = shalt.err (!%p223_p10)
}
  0x1b   :  { %s227_s1 = scalar_lea.vmem %s18_s27, 128  ;;  %p232_p12 = scmp.lt.s32.totalorder %s18_s27, %s18_s27 }
  0x1c   :  { %p228_p11 = scmp.ne.s32.totalorder %s18_s27, %s227_s1  ;;  %p233_p13 = scmp.lt.s32.totalorder %s227_s1, %s227_s1 }
  0x1e   :  { %p234_p0 = por %p233_p13, %p232_p12 }
  0x20   :  { %p235_p1 = pnand %p234_p0, %p228_p11 }
  0x22   :  { %238 = shalt.err (!%p235_p1)
}
  0x23   :  { %20 = dma.hbm_to_vmem [thread:$0]  %s365_s0, 128, %s18_s27, [#allocation3]  }
  0x24   :  { %s239_s14 = scalar_lea.hbm %s367_s2, 16 }
  0x25   :  { %p240_p2 = scmp.ne.s32.totalorder %s367_s2, %s239_s14  ;;  %p243_p3 = scmp.lt.u32.totalorder %s239_s14, %s367_s2 }
  0x27   :  { %p245_p4 = pnand %p243_p3, %p240_p2 }
  0x29   :  { %248 = shalt.err (!%p245_p4)
}
  0x2a   :  { %s249_s19 = scalar_lea.vmem %s40_s29, 16  ;;  %s253_s20 = scalar_lea.vmem %s40_s29, 32 }
  0x2b   :  { %p250_p5 = scmp.ne.s32.totalorder %s40_s29, %s249_s19  ;;  %p254_p6 = scmp.lt.s32.totalorder %s40_s29, %s40_s29 }
  0x2c   :  { %p255_p7 = scmp.lt.s32.totalorder %s253_s20, %s249_s19 }
  0x2e   :  { %p256_p8 = por %p255_p7, %p254_p6 }
  0x30   :  { %p257_p9 = pnand %p256_p8, %p250_p5 }
  0x32   :  { %260 = shalt.err (!%p257_p9)
}
  0x33   :  { %42 = dma.hbm_to_vmem [thread:$0]  %s367_s2, 16, %s40_s29, [#allocation6]  }
  0x34   :  { %283 = dma.done.wait [#allocation3], 128  }
  0x35   :  { %284 = vsyncadd [#allocation3], 4294967168 }
  0x36   :  { %285 = dma.done.wait [#allocation6], 528  }
  0x37   :  { %286 = vsyncadd [#allocation6], 4294966768  ;;  %v294_v0 = vmov 0.0   ;;  %vm295_vm0 = vmmov 0   ;;  %v189_v1 = vld [vmem:[#allocation5] sm:$0xff]   ;;  %v190_v2 = vld [vmem:[#allocation5 + $0x8] sm:$0xff]  }
  0x38   :  { %169 = vmatprep.subr.bf16.mxu0 %v294_v0  ;;  %177 = vmatprep.mubr.msk.bf16.mxu0 %vm295_vm0, %v294_v0  ;;  %v191_v3 = vld [vmem:[#allocation5 + $0x10] sm:$0xff]   ;;  %v192_v4 = vld [vmem:[#allocation5 + $0x18] sm:$0xff]   ;;  %vm94_vm1 = vcmask 523264   ;;  %v158_v7 = vld [vmem:[#allocation7] ss:$0 sm:$0xff]  ;;  %s296_s2 = smov [#allocation8]  }
  0x39   :  { %170 = vmatpush3.bf16.msra.mxu0 %v189_v1  ;;  %v53_v5 = vld [vmem:[#allocation2] sm:$0xff]  ;;  %s148_s22 = sshll.u32 %s296_s2, 4  ;;  %vm140_vm2 = vcmask 261120   ;;  %s149_s22 = int_to_ptr.vmem [resolvable:$true] %s148_s22 }
  0x3a   :  { %171 = vmatprep.subr.bf16.mxu0 %v294_v0  ;;  %v54_v6 = vpack.c.bf16 %v53_v5, %v53_v5  ;;  %s261_s23 = scalar_lea.vmem %s149_s22, 128  ;;  %p266_p11 = scmp.lt.s32.totalorder %s149_s22, %s149_s22 }
  0x3b   :  { %p262_p10 = scmp.ne.s32.totalorder %s149_s22, %s261_s23  ;;  %p267_p12 = scmp.lt.s32.totalorder %s261_s23, %s261_s23 }
  0x3d   :  { %172 = vmatpush3.bf16.msra.mxu0 %v190_v2  ;;  %p268_p13 = por %p267_p12, %p266_p11 }
  0x3e   :  { %173 = vmatprep.subr.bf16.mxu0 %v294_v0 }
  0x3f   :  { %p269_p0 = pnand %p268_p13, %p262_p10 }
  0x41   :  { %174 = vmatpush3.bf16.msra.mxu0 %v191_v3 }
  0x42   :  { %175 = vmatprep.subr.bf16.mxu0 %v294_v0 }
  0x45   :  { %176 = vmatpush3.bf16.msra.mxu0 %v192_v4 }
  0x48   :  { %178 = vmatmul.mubr.msk.bf16.vlgmr.msra.gmra.mrb[0].mxu0 %vm94_vm1, %v54_v6 }
 0x11b   :  { %v132_v8 = vpop.f32.mrb[0].mxu0 }
 0x11c   :  { %v133_v9 = vadd.f32 %v158_v7, %v132_v8  ;;  %v179_v10 = vpop.f32.mrb[1].mxu0 }
 0x11d   :  { %v135_v11 = vpop.f32.mrb[2].mxu0 }
 0x11e   :  { %v138_v12 = vmul.f32 1.442695, %v133_v9  ;;  %v180_v13 = vpop.f32.mrb[3].mxu0 }
 0x120   :  { %193 = vpow2.f32 %v138_v12 }
 0x12a   :  { %v194_v14 = vpop.eup %193 }
 0x12b   :  { %141 = vst.msk [vmem:[#allocation8] sm:$0xff] %vm140_vm2, %v194_v14 }
 0x12c   :  { %272 = shalt.err (!%p269_p0)
}
 0x12d   :  { %s273_s26 = scalar_lea.hbm %s368_s3, 128 }
 0x12e   :  { %p274_p1 = scmp.ne.s32.totalorder %s368_s3, %s273_s26  ;;  %p277_p2 = scmp.lt.u32.totalorder %s273_s26, %s368_s3 }
 0x130   :  { %p279_p3 = pnand %p277_p2, %p274_p1 }
 0x132   :  { %282 = shalt.err (!%p279_p3)
}
 0x133   :  { %151 = dma.vmem_to_hbm [thread:$0]  %s149_s22, 128, %s368_s3, [#allocation4]  }
 0x134   :  { %287 = dma.done.wait [#allocation4], 128  }
 0x135   :  { %288 = vsyncadd [#allocation4], 4294967168 }
 0x136   :  { %155 = vsyncpa [#allocation3], 1 }
 0x137   :  { %156 = vsyncpa [#allocation6], 1 }
 0x138   :  { %157 = vsyncpa [#allocation4], 1 }

// kernel: ec2vae_forward.12
= control target key start
LH: loop header
LB: loop body
LE: loop exit
PB: predicated region body
PF: predicated region fallthrough
CT: control target
= control target key end

     0   :  { %8 = vsyncpa [#allocation3], 0  ;;  %s361_s0 = inlined_call_operand.hbm [shape: f32[8,64], index: 0, kind: input, shape index: {}]   ;;  %s362_s1 = inlined_call_operand.hbm [shape: bf16[64,32], index: 1, kind: input, shape index: {}]   ;;  %s363_s2 = inlined_call_operand.hbm [shape: f32[1,32], index: 2, kind: input, shape index: {}]   ;;  %s364_s3 = inlined_call_operand.hbm [shape: f32[8,32], index: 3, kind: output, shape index: {}]  }
   0x1   :  { %9 = vsyncpa [#allocation6], 0 }
   0x2   :  { %10 = vsyncpa [#allocation4], 0  ;;  %s285_s12 = smov [#allocation5]   ;;  %s191_s16 = scalar_lea.hbm %s362_s1, 512 }
   0x3   :  { %s26_s13 = sshll.u32 %s285_s12, 4  ;;  %p192_p0 = scmp.ne.s32.totalorder %s362_s1, %s191_s16  ;;  %s27_s13 = int_to_ptr.vmem [resolvable:$true] %s26_s13 }
   0x4   :  { %p195_p1 = scmp.lt.u32.totalorder %s191_s16, %s362_s1 }
   0x6   :  { %p197_p2 = pnand %p195_p1, %p192_p0 }
   0x8   :  { %200 = shalt.err (!%p197_p2)
}
   0x9   :  { %s201_s21 = scalar_lea.vmem %s27_s13, 512  ;;  %p206_p4 = scmp.lt.s32.totalorder %s27_s13, %s27_s13 }
   0xa   :  { %p202_p3 = scmp.ne.s32.totalorder %s27_s13, %s201_s21  ;;  %p207_p5 = scmp.lt.s32.totalorder %s201_s21, %s201_s21 }
   0xc   :  { %p208_p6 = por %p207_p5, %p206_p4 }
   0xe   :  { %p209_p7 = pnand %p208_p6, %p202_p3 }
  0x10   :  { %212 = shalt.err (!%p209_p7)
}
  0x11   :  { %s286_s22 = smov 64   ;;  %s287_s23 = smov 4  }
  0x12   :  { %32 = dma.hbm_to_vmem [thread:$0]  %s362_s1, 512, %s27_s13, [#allocation6], %s286_s22, %s286_s22, %s287_s23  }
  0x13   :  { %s288_s26 = smov [#allocation2]   ;;  %s289_s28 = smov [#allocation7]  }
  0x14   :  { %s17_s27 = sshll.u32 %s288_s26, 4  ;;  %s39_s29 = sshll.u32 %s289_s28, 4  ;;  %s18_s27 = int_to_ptr.vmem [resolvable:$true] %s17_s27  ;;  %s40_s29 = int_to_ptr.vmem [resolvable:$true] %s39_s29 }
  0x15   :  { %s213_s5 = scalar_lea.hbm %s361_s0, 128 }
  0x16   :  { %p214_p8 = scmp.ne.s32.totalorder %s361_s0, %s213_s5  ;;  %p217_p9 = scmp.lt.u32.totalorder %s213_s5, %s361_s0 }
  0x18   :  { %p219_p10 = pnand %p217_p9, %p214_p8 }
  0x1a   :  { %222 = shalt.err (!%p219_p10)
}
  0x1b   :  { %s223_s1 = scalar_lea.vmem %s18_s27, 128  ;;  %p228_p12 = scmp.lt.s32.totalorder %s18_s27, %s18_s27 }
  0x1c   :  { %p224_p11 = scmp.ne.s32.totalorder %s18_s27, %s223_s1  ;;  %p229_p13 = scmp.lt.s32.totalorder %s223_s1, %s223_s1 }
  0x1e   :  { %p230_p0 = por %p229_p13, %p228_p12 }
  0x20   :  { %p231_p1 = pnand %p230_p0, %p224_p11 }
  0x22   :  { %234 = shalt.err (!%p231_p1)
}
  0x23   :  { %20 = dma.hbm_to_vmem [thread:$0]  %s361_s0, 128, %s18_s27, [#allocation3]  }
  0x24   :  { %s235_s14 = scalar_lea.hbm %s363_s2, 16 }
  0x25   :  { %p236_p2 = scmp.ne.s32.totalorder %s363_s2, %s235_s14  ;;  %p239_p3 = scmp.lt.u32.totalorder %s235_s14, %s363_s2 }
  0x27   :  { %p241_p4 = pnand %p239_p3, %p236_p2 }
  0x29   :  { %244 = shalt.err (!%p241_p4)
}
  0x2a   :  { %s245_s19 = scalar_lea.vmem %s40_s29, 16  ;;  %s249_s20 = scalar_lea.vmem %s40_s29, 32 }
  0x2b   :  { %p246_p5 = scmp.ne.s32.totalorder %s40_s29, %s245_s19  ;;  %p250_p6 = scmp.lt.s32.totalorder %s40_s29, %s40_s29 }
  0x2c   :  { %p251_p7 = scmp.lt.s32.totalorder %s249_s20, %s245_s19 }
  0x2e   :  { %p252_p8 = por %p251_p7, %p250_p6 }
  0x30   :  { %p253_p9 = pnand %p252_p8, %p246_p5 }
  0x32   :  { %256 = shalt.err (!%p253_p9)
}
  0x33   :  { %42 = dma.hbm_to_vmem [thread:$0]  %s363_s2, 16, %s40_s29, [#allocation6]  }
  0x34   :  { %279 = dma.done.wait [#allocation3], 128  }
  0x35   :  { %280 = vsyncadd [#allocation3], 4294967168 }
  0x36   :  { %281 = dma.done.wait [#allocation6], 528  }
  0x37   :  { %282 = vsyncadd [#allocation6], 4294966768  ;;  %v290_v0 = vmov 0.0   ;;  %vm291_vm0 = vmmov 0   ;;  %v187_v1 = vld [vmem:[#allocation5] sm:$0xff]   ;;  %v188_v2 = vld [vmem:[#allocation5 + $0x8] sm:$0xff]  }
  0x38   :  { %167 = vmatprep.subr.bf16.mxu0 %v290_v0  ;;  %175 = vmatprep.mubr.msk.bf16.mxu0 %vm291_vm0, %v290_v0  ;;  %v189_v3 = vld [vmem:[#allocation5 + $0x10] sm:$0xff]   ;;  %v190_v4 = vld [vmem:[#allocation5 + $0x18] sm:$0xff]   ;;  %vm94_vm1 = vcmask 523264   ;;  %v156_v7 = vld [vmem:[#allocation7] ss:$0 sm:$0xff]  ;;  %s292_s2 = smov [#allocation8]  }
  0x39   :  { %168 = vmatpush3.bf16.msra.mxu0 %v187_v1  ;;  %v53_v5 = vld [vmem:[#allocation2] sm:$0xff]  ;;  %s146_s22 = sshll.u32 %s292_s2, 4  ;;  %vm138_vm2 = vcmask 261120   ;;  %s147_s22 = int_to_ptr.vmem [resolvable:$true] %s146_s22 }
  0x3a   :  { %169 = vmatprep.subr.bf16.mxu0 %v290_v0  ;;  %v54_v6 = vpack.c.bf16 %v53_v5, %v53_v5  ;;  %s257_s23 = scalar_lea.vmem %s147_s22, 128  ;;  %p262_p11 = scmp.lt.s32.totalorder %s147_s22, %s147_s22 }
  0x3b   :  { %p258_p10 = scmp.ne.s32.totalorder %s147_s22, %s257_s23  ;;  %p263_p12 = scmp.lt.s32.totalorder %s257_s23, %s257_s23 }
  0x3d   :  { %170 = vmatpush3.bf16.msra.mxu0 %v188_v2  ;;  %p264_p13 = por %p263_p12, %p262_p11 }
  0x3e   :  { %171 = vmatprep.subr.bf16.mxu0 %v290_v0 }
  0x3f   :  { %p265_p0 = pnand %p264_p13, %p258_p10 }
  0x41   :  { %172 = vmatpush3.bf16.msra.mxu0 %v189_v3 }
  0x42   :  { %173 = vmatprep.subr.bf16.mxu0 %v290_v0 }
  0x45   :  { %174 = vmatpush3.bf16.msra.mxu0 %v190_v4 }
  0x48   :  { %176 = vmatmul.mubr.msk.bf16.vlgmr.msra.gmra.mrb[0].mxu0 %vm94_vm1, %v54_v6 }
 0x11b   :  { %v132_v8 = vpop.f32.mrb[0].mxu0 }
 0x11c   :  { %v133_v9 = vadd.f32 %v156_v7, %v132_v8  ;;  %v177_v10 = vpop.f32.mrb[1].mxu0 }
 0x11d   :  { %v135_v11 = vpop.f32.mrb[2].mxu0 }
 0x11e   :  { %v178_v12 = vpop.f32.mrb[3].mxu0  ;;  %139 = vst.msk [vmem:[#allocation8] sm:$0xff] %vm138_vm2, %v133_v9 }
 0x11f   :  { %268 = shalt.err (!%p265_p0)
}
 0x120   :  { %s269_s26 = scalar_lea.hbm %s364_s3, 128 }
 0x121   :  { %p270_p1 = scmp.ne.s32.totalorder %s364_s3, %s269_s26  ;;  %p273_p2 = scmp.lt.u32.totalorder %s269_s26, %s364_s3 }
 0x123   :  { %p275_p3 = pnand %p273_p2, %p270_p1 }
 0x125   :  { %278 = shalt.err (!%p275_p3)
}
 0x126   :  { %149 = dma.vmem_to_hbm [thread:$0]  %s147_s22, 128, %s364_s3, [#allocation4]  }
 0x127   :  { %283 = dma.done.wait [#allocation4], 128  }
 0x128   :  { %284 = vsyncadd [#allocation4], 4294967168 }
 0x129   :  { %153 = vsyncpa [#allocation3], 1 }
 0x12a   :  { %154 = vsyncpa [#allocation6], 1 }
 0x12b   :  { %155 = vsyncpa [#allocation4], 1 }

// kernel: ec2vae_forward.11
= control target key start
LH: loop header
LB: loop body
LE: loop exit
PB: predicated region body
PF: predicated region fallthrough
CT: control target
= control target key end

     0   :  { %12 = vsyncpa [#allocation3], 0  ;;  %s869_s0 = inlined_call_operand.hbm [shape: f32[8,8,192], index: 0, kind: input, shape index: {}]   ;;  %s870_s1 = inlined_call_operand.hbm [shape: bf16[32,96], index: 1, kind: input, shape index: {}]   ;;  %s871_s2 = inlined_call_operand.hbm [shape: bf16[32,96], index: 2, kind: input, shape index: {}]   ;;  %s872_s3 = inlined_call_operand.hbm [shape: f32[1,32], index: 3, kind: input, shape index: {}]   ;;  %s873_s4 = inlined_call_operand.hbm [shape: f32[1,32], index: 4, kind: input, shape index: {}]   ;;  %s874_s5 = inlined_call_operand.hbm [shape: f32[8,32], index: 5, kind: output, shape index: {0}]   ;;  %s875_s6 = inlined_call_operand.hbm [shape: f32[8,32], index: 6, kind: output, shape index: {1}]  }
   0x1   :  { %13 = vsyncpa [#allocation6], 0 }
   0x2   :  { %14 = vsyncpa [#allocation9], 0 }
   0x3   :  { %15 = vsyncpa [#allocation4], 0 }
   0x4   :  { %16 = vsyncpa [#allocation13], 0  ;;  %s651_s21 = smov [#allocation5]   ;;  %s463_s25 = scalar_lea.hbm %s870_s1, 256 }
   0x5   :  { %s34_s22 = sshll.u32 %s651_s21, 4  ;;  %p464_p0 = scmp.ne.s32.totalorder %s870_s1, %s463_s25  ;;  %s35_s22 = int_to_ptr.vmem [resolvable:$true] %s34_s22 }
   0x6   :  { %p467_p1 = scmp.lt.u32.totalorder %s463_s25, %s870_s1 }
   0x8   :  { %p469_p2 = pnand %p467_p1, %p464_p0 }
   0xa   :  { %472 = shalt.err (!%p469_p2)
}
   0xb   :  { %s473_s30 = scalar_lea.vmem %s35_s22, 256  ;;  %p478_p4 = scmp.lt.s32.totalorder %s35_s22, %s35_s22 }
   0xc   :  { %p474_p3 = scmp.ne.s32.totalorder %s35_s22, %s473_s30  ;;  %p479_p5 = scmp.lt.s32.totalorder %s473_s30, %s473_s30 }
   0xe   :  { %p480_p6 = por %p479_p5, %p478_p4 }
  0x10   :  { %p481_p7 = pnand %p480_p6, %p474_p3 }
  0x12   :  { %484 = shalt.err (!%p481_p7)
}
  0x13   :  { %s652_s7 = smov 64   ;;  %s653_s8 = smov 4  }
  0x14   :  { %40 = dma.hbm_to_vmem [thread:$0]  %s870_s1, 256, %s35_s22, [#allocation6], %s652_s7, %s652_s7, %s653_s8  }
  0x15   :  { %s654_s11 = smov [#allocation8]   ;;  %s655_s13 = smov [#allocation2]  }
  0x16   :  { %s59_s12 = sshll.u32 %s654_s11, 4  ;;  %s22_s14 = sshll.u32 %s655_s13, 4  ;;  %s60_s12 = int_to_ptr.vmem [resolvable:$true] %s59_s12  ;;  %s23_s14 = int_to_ptr.vmem [resolvable:$true] %s22_s14 }
  0x17   :  { %s485_s17 = scalar_lea.hbm %s872_s3, 16 }
  0x18   :  { %p486_p8 = scmp.ne.s32.totalorder %s872_s3, %s485_s17  ;;  %p489_p9 = scmp.lt.u32.totalorder %s485_s17, %s872_s3 }
  0x1a   :  { %p491_p10 = pnand %p489_p9, %p486_p8 }
  0x1c   :  { %494 = shalt.err (!%p491_p10)
}
  0x1d   :  { %s495_s1 = scalar_lea.vmem %s60_s12, 16  ;;  %s499_s22 = scalar_lea.vmem %s60_s12, 32 }
  0x1e   :  { %p496_p11 = scmp.ne.s32.totalorder %s60_s12, %s495_s1  ;;  %p500_p12 = scmp.lt.s32.totalorder %s60_s12, %s60_s12 }
  0x1f   :  { %p501_p13 = scmp.lt.s32.totalorder %s499_s22, %s495_s1 }
  0x21   :  { %p502_p0 = por %p501_p13, %p500_p12 }
  0x23   :  { %p503_p1 = pnand %p502_p0, %p496_p11 }
  0x25   :  { %506 = shalt.err (!%p503_p1)
}
  0x26   :  { %62 = dma.hbm_to_vmem [thread:$0]  %s872_s3, 16, %s60_s12, [#allocation9]  }
  0x27   :  { %s507_s27 = scalar_lea.hbm %s869_s0, 2048 }
  0x28   :  { %p508_p2 = scmp.ne.s32.totalorder %s869_s0, %s507_s27  ;;  %p511_p3 = scmp.lt.u32.totalorder %s507_s27, %s869_s0 }
  0x2a   :  { %p513_p4 = pnand %p511_p3, %p508_p2 }
  0x2c   :  { %516 = shalt.err (!%p513_p4)
}
  0x2d   :  { %s517_s10 = scalar_lea.vmem %s23_s14, 2048  ;;  %p522_p6 = scmp.lt.s32.totalorder %s23_s14, %s23_s14 }
  0x2e   :  { %p518_p5 = scmp.ne.s32.totalorder %s23_s14, %s517_s10  ;;  %p523_p7 = scmp.lt.s32.totalorder %s517_s10, %s517_s10 }
  0x30   :  { %p524_p8 = por %p523_p7, %p522_p6 }
  0x32   :  { %p525_p9 = pnand %p524_p8, %p518_p5 }
  0x34   :  { %528 = shalt.err (!%p525_p9)
}
  0x35   :  { %s656_s3 = smov 256   ;;  %s657_s11 = smov 16  }
  0x36   :  { %28 = dma.hbm_to_vmem [thread:$0]  %s869_s0, 2048, %s23_s14, [#allocation3], %s656_s3, %s656_s3, %s657_s11  }
  0x37   :  { %s658_s15 = smov [#allocation7]   ;;  %s659_s17 = smov [#allocation10]  }
  0x38   :  { %s46_s16 = sshll.u32 %s658_s15, 4  ;;  %s69_s18 = sshll.u32 %s659_s17, 4  ;;  %s47_s16 = int_to_ptr.vmem [resolvable:$true] %s46_s16  ;;  %s70_s18 = int_to_ptr.vmem [resolvable:$true] %s69_s18 }
  0x39   :  { %s529_s21 = scalar_lea.hbm %s871_s2, 256 }
  0x3a   :  { %p530_p10 = scmp.ne.s32.totalorder %s871_s2, %s529_s21  ;;  %p533_p11 = scmp.lt.u32.totalorder %s529_s21, %s871_s2 }
  0x3c   :  { %p535_p12 = pnand %p533_p11, %p530_p10 }
  0x3e   :  { %538 = shalt.err (!%p535_p12)
}
  0x3f   :  { %s539_s0 = scalar_lea.vmem %s47_s16, 256  ;;  %p544_p0 = scmp.lt.s32.totalorder %s47_s16, %s47_s16 }
  0x40   :  { %p540_p13 = scmp.ne.s32.totalorder %s47_s16, %s539_s0  ;;  %p545_p1 = scmp.lt.s32.totalorder %s539_s0, %s539_s0 }
  0x42   :  { %p546_p2 = por %p545_p1, %p544_p0 }
  0x44   :  { %p547_p3 = pnand %p546_p2, %p540_p13 }
  0x46   :  { %550 = shalt.err (!%p547_p3)
}
  0x47   :  { %52 = dma.hbm_to_vmem [thread:$0]  %s871_s2, 256, %s47_s16, [#allocation6], %s652_s7, %s652_s7, %s653_s8  }
  0x48   :  { %s551_s28 = scalar_lea.hbm %s873_s4, 16 }
  0x49   :  { %p552_p4 = scmp.ne.s32.totalorder %s873_s4, %s551_s28  ;;  %p555_p5 = scmp.lt.u32.totalorder %s551_s28, %s873_s4 }
  0x4b   :  { %p557_p6 = pnand %p555_p5, %p552_p4 }
  0x4d   :  { %560 = shalt.err (!%p557_p6)
}
  0x4e   :  { %s561_s3 = scalar_lea.vmem %s70_s18, 16  ;;  %s565_s11 = scalar_lea.vmem %s70_s18, 32 }
  0x4f   :  { %p562_p7 = scmp.ne.s32.totalorder %s70_s18, %s561_s3  ;;  %p566_p8 = scmp.lt.s32.totalorder %s70_s18, %s70_s18 }
  0x50   :  { %p567_p9 = scmp.lt.s32.totalorder %s565_s11, %s561_s3 }
  0x52   :  { %p568_p10 = por %p567_p9, %p566_p8 }
  0x54   :  { %p569_p11 = pnand %p568_p10, %p562_p7 }
  0x56   :  { %572 = shalt.err (!%p569_p11)
}
  0x57   :  { %72 = dma.hbm_to_vmem [thread:$0]  %s873_s4, 16, %s70_s18, [#allocation9]  }
  0x58   :  { %629 = dma.done.wait [#allocation3], 2048  }
  0x59   :  { %630 = vsyncadd [#allocation3], 4294965248 }
  0x5a   :  { %631 = dma.done.wait [#allocation6], 512  }
  0x5b   :  { %632 = vsyncadd [#allocation6], 4294966784 }
  0x5c   :  { %633 = dma.done.wait [#allocation9], 32  }
  0x5d   :  { %634 = vsyncadd [#allocation9], 4294967264  ;;  %v769_v0 = vld [vmem:[#allocation5] sm:$0xf]  ;;  %v771_v1 = vld [vmem:[#allocation5 + $0x4] sm:$0xf] }
  0x5e   :  { %v773_v2 = vld [vmem:[#allocation5 + $0x8] sm:$0xf]  ;;  %v775_v3 = vld [vmem:[#allocation5 + $0xc] sm:$0xf]  ;;  %v777_v4 = vld [vmem:[#allocation7] sm:$0xf] }
  0x5f   :  { %v779_v5 = vld [vmem:[#allocation7 + $0x4] sm:$0xf]  ;;  %v781_v6 = vld [vmem:[#allocation7 + $0x8] sm:$0xf]  ;;  %v783_v7 = vld [vmem:[#allocation7 + $0xc] sm:$0xf] }
  0x60   :  { %v785_v8 = vld [vmem:[#allocation8] ss:$0 sm:$0xff]  ;;  %v787_v9 = vld [vmem:[#allocation10] ss:$0 sm:$0xff]  ;;  %v789_v10 = vmov 0.0   ;;  %v791_v11 = vmov 0.0  }
  0x61   :  { %s793_s4 = smov 0  }
  0x62 LB: > { %v376_v12 = vcombine.low %v777_v4, %v779_v5  ;;  %v660_v13 = vmov 0.0   ;;  %v117_v14 = vpack.c.bf16 %v645_v11, %v645_v11  ;;  %v377_v15 = vcombine.low %v781_v6, %v783_v7  ;;  %s662_s8 = smov 96   ;;  %s663_s12 = smov 64   ;;  %s649_s4 = sphi %s793_s4, %s104_s4   ;;  %v645_v11 = vphi %v791_v11, %v877_v11   ;;  %v641_v10 = vphi %v789_v10, %v876_v10  }
  0x63   : > { %398 = vmatprep.subr.bf16.mxu1 %v660_v13  ;;  %390 = vmatprep.subr.bf16.mxu0 %v660_v13  ;;  %vm661_vm0 = vmmov 0   ;;  %v371_v16 = vcombine.low %v769_v0, %v771_v1  ;;  %v372_v17 = vcombine.low %v773_v2, %v775_v3  ;;  %v212_v18 = vpack.c.bf16 %v641_v10, %v641_v10  ;;  %s664_s13 = smov 32   ;;  %s111_s15 = ssub.s32 7, %s649_s4 }
  0x64   : > { %399 = vmatpush3.bf16.msra.mxu1 %v376_v12  ;;  %402 = vmatprep.mubr.msk.bf16.mxu1 %vm661_vm0, %v660_v13  ;;  %vm133_vm1 = vcmask 261120   ;;  %s825_s16 = sshll.u32 %s111_s15, 4  ;;  %s382_s18 = sshll.u32 %s649_s4, 4 }
  0x65   : > { %400 = vmatprep.subr.bf16.mxu1 %v660_v13  ;;  %394 = vmatprep.mubr.msk.bf16.mxu0 %vm661_vm0, %v660_v13  ;;  %s114_s17 = scalar_lea.vmem [#allocation2], %s825_s16  ;;  %s109_s19 = scalar_lea.vmem [#allocation2], %s382_s18 }
  0x66   : > { %119 = vrot.lane.b32.xlu0 %v117_v14, %s662_s8  ;;  %391 = vmatpush3.bf16.msra.mxu0 %v371_v16  ;;  %v115_v32 = vld [vmem:[%s114_s17] sm:$0xff]  ;;  %v116_v49 = vld [vmem:[%s114_s17 + $0x8] sm:$0xff]  ;;  %s104_s4 = sadd.s32 1, %s649_s4  }
  0x67   : > { %392 = vmatprep.subr.bf16.mxu0 %v660_v13  ;;  %291 = vrot.lane.b32.xlu1 %v787_v9, %s663_s12  ;;  %v110_v41 = vld [vmem:[%s109_s19] sm:$0xff]  ;;  %p101_p12 = scmp.ge.s32.totalorder %s104_s4, 8  }
  0x68   : > { %401 = vmatpush3.bf16.msra.mxu1 %v377_v15  ;;  %s665_s20 = smov (%p101_p12), 96   ;;  %s666_s21 = smov (%p101_p12), [#allocation12]  }
  0x69   :  { %s337_s1 = sshll.u32 (%p101_p12), %s666_s21, 4  ;;  %s338_s1 = int_to_ptr.vmem [resolvable:$true] %s337_s1 }
  0x6a   : > { %393 = vmatpush3.bf16.msra.mxu0 %v372_v17  ;;  %189 = vrot.lane.b32.xlu0 %v785_v8, %s663_s12  ;;  %s573_s22 = scalar_lea.vmem (%p101_p12), %s338_s1, 128  ;;  %p578_p0 = scmp.lt.s32.totalorder (%p101_p12), %s338_s1, %s338_s1 }
  0x6b   : > { %403 = vmatmul.mubr.msk.bf16.vlgmr.msra.gmra.mrb[0].mxu1 %vm133_vm1, %v212_v18  ;;  %p574_p13 = scmp.ne.s32.totalorder (%p101_p12), %s338_s1, %s573_s22  ;;  %p579_p1 = scmp.lt.s32.totalorder (%p101_p12), %s573_s22, %s573_s22 }
  0x6d   :  { %p580_p2 = por (%p101_p12), %p579_p1, %p578_p0 }
  0x6f   :  { %p581_p3 = pnand (%p101_p12), %p580_p2, %p574_p13 }
  0xd8   : > { %v120_v19 = vpop.permute.xlu0 %119 }
  0xd9   : > { %395 = vmatmul.mubr.msk.bf16.vlgmr.msra.gmra.mrb[0].mxu0 %vm133_vm1, %v120_v19  ;;  %v292_v20 = vpop.permute.xlu1 %291 }
  0xdc   : > { %v190_v26 = vpop.permute.xlu0 %189 }
 0x13e   : > { %v262_v21 = vpop.f32.mrb[0].mxu1 }
 0x13f   : > { %269 = vrot.lane.b32.xlu1 %v262_v21, %s662_s8  ;;  %v294_v22 = vadd.f32 %v292_v20, %v262_v21  ;;  %v404_v23 = vpop.f32.mrb[1].mxu1 }
 0x140   : > { %v265_v24 = vpop.f32.mrb[2].mxu1 }
 0x141   : > { %v405_v25 = vpop.f32.mrb[3].mxu1 }
 0x143   : > { %296 = vrot.lane.b32.xlu1 %v294_v22, %s664_s13 }
 0x1ac   : > { %v171_v27 = vpop.f32.mrb[0].mxu0 }
 0x1ad   : > { %v192_v28 = vadd.f32 %v190_v26, %v171_v27  ;;  %v396_v29 = vpop.f32.mrb[1].mxu0  ;;  %v177_v42 = vadd.f32 %v171_v27, %v110_v41 }
 0x1ae   : > { %v174_v30 = vpop.f32.mrb[2].mxu0 }
 0x1af   : > { %v397_v31 = vpop.f32.mrb[3].mxu0  ;;  %194 = vrot.lane.b32.xlu0 %v192_v28, %s663_s12  ;;  %v374_v43 = vmul.f32 -1.442695, %v177_v42 }
 0x1b1   : > { %v270_v33 = vpop.permute.xlu1 %269 }
 0x1b2   : > { %v272_v34 = vadd.f32 %v270_v33, %v115_v32  ;;  %v279_v55 = vadd.f32 %v270_v33, %v116_v49 }
 0x1b4   : > { %v379_v35 = vmul.f32 -1.442695, %v272_v34  ;;  %v380_v56 = vmul.f32 -1.442695, %v279_v55 }
 0x1b5   : > { %v297_v38 = vpop.permute.xlu1 %296 }
 0x1b6   : > { %447 = vpow2.f32 %v379_v35 }
 0x1c0   : > { %v448_v36 = vpop.eup %447 }
 0x1c1   : > { %v276_v37 = vadd.f32 1.0, %v448_v36 }
 0x1c3   : > { %449 = vrcp.f32 %v276_v37 }
 0x1c4   : > { %451 = vpow2.f32 %v374_v43 }
 0x1cd   : > { %v450_v39 = vpop.eup %449 }
 0x1ce   : > { %v299_v40 = vmul.f32 %v450_v39, %v297_v38  ;;  %v452_v44 = vpop.eup %451 }
 0x1cf   : > { %v181_v45 = vadd.f32 1.0, %v452_v44 }
 0x1d0   : > { %301 = vrot.lane.b32.xlu1 %v299_v40, %s663_s12 }
 0x1d1   : > { %453 = vrcp.f32 %v181_v45 }
 0x1db   : > { %v454_v46 = vpop.eup %453 }
 0x1dc   : > { %v204_v14 = vsub.f32 1.0, %v454_v46  ;;  %v210_v16 = vmul.f32 %v645_v11, %v454_v46 }
 0x221   : > { %v195_v47 = vpop.permute.xlu0 %194 }
 0x222   : > { %v197_v48 = vmul.f32 %v454_v46, %v195_v47 }
 0x224   : > { %199 = vrot.lane.b32.xlu0 %v197_v48, %s663_s12 }
 0x242   : > { %v302_v50 = vpop.permute.xlu1 %301 }
 0x243   : > { %v304_v51 = vadd.f32 %v302_v50, %v116_v49 }
 0x245   : > { %455 = vtanh.f32 %v304_v51 }
 0x24f   : > { %v456_v52 = vpop.eup %455 }
 0x250   : > { %308 = vrot.lane.b32.xlu1 %v456_v52, %s662_s8 }
 0x296   : > { %v200_v53 = vpop.permute.xlu0 %199 }
 0x297   : > { %v202_v54 = vadd.f32 %v200_v53, %v110_v41 }
 0x299   : > { %457 = vtanh.f32 %v202_v54 }
 0x29a   : > { %459 = vpow2.f32 %v380_v56 }
 0x2a3   : > { %v458_v57 = vpop.eup %457 }
 0x2a4   : > { %206 = vrot.lane.b32.xlu0 %v458_v57, %s662_s8  ;;  %v460_v58 = vpop.eup %459 }
 0x2a5   : > { %v283_v59 = vadd.f32 1.0, %v460_v58 }
 0x2a7   : > { %461 = vrcp.f32 %v283_v59 }
 0x2b1   : > { %v462_v60 = vpop.eup %461 }
 0x2b2   : > { %v306_v61 = vsub.f32 1.0, %v462_v60  ;;  %v312_v63 = vmul.f32 %v641_v10, %v462_v60 }
 0x2c2   : > { %v309_v62 = vpop.permute.xlu1 %308 }
 0x2c3   : > { %v311_v12 = vmul.f32 %v309_v62, %v306_v61 }
 0x2c5   : > { %v313_v13 = vadd.f32 %v312_v63, %v311_v12  }
 0x2c7   : > { %v876_v10 = vmov %v313_v13  ;;  %320 = vst.msk [vmem:[#allocation12] sm:$0xff] (%p101_p12), %vm133_vm1, %v313_v13 }
 0x315   :  { %103 = sbr.rel (!%p101_p12) target bundleno = 98 (0x62), region = 77 }
 0x316   : > { %v207_v15 = vpop.permute.xlu0 %206 }
 0x317   : > { %v209_v17 = vmul.f32 %v207_v15, %v204_v14 }
 0x319   : > { %v211_v18 = vadd.f32 %v210_v16, %v209_v17  }
 0x31b   : > { %v877_v11 = vmov %v211_v18  ;;  %315 = vrot.lane.b32.xlu0 (%p101_p12), %v211_v18, %s665_s20 }
 0x31c   :  { %584 = shalt.err (!%p581_p3)
}
 0x31d   :  { %s585_s0 = scalar_lea.hbm %s875_s6, 128 }
 0x31e   :  { %p586_p4 = scmp.ne.s32.totalorder %s875_s6, %s585_s0  ;;  %p589_p5 = scmp.lt.u32.totalorder %s585_s0, %s875_s6 }
 0x320   :  { %p591_p6 = pnand %p589_p5, %p586_p4 }
 0x322   :  { %594 = shalt.err (!%p591_p6)
}
 0x323   :  { %340 = dma.vmem_to_hbm [thread:$0]  %s338_s1, 128, %s875_s6, [#allocation13]  }
 0x324   :  { %s667_s30 = smov [#allocation11]  }
 0x325   :  { %s327_s9 = sshll.u32 %s667_s30, 4  ;;  %s328_s9 = int_to_ptr.vmem [resolvable:$true] %s327_s9 }
 0x326   :  { %s595_s10 = scalar_lea.vmem %s328_s9, 128  ;;  %p600_p8 = scmp.lt.s32.totalorder %s328_s9, %s328_s9 }
 0x327   :  { %p596_p7 = scmp.ne.s32.totalorder %s328_s9, %s595_s10  ;;  %p601_p9 = scmp.lt.s32.totalorder %s595_s10, %s595_s10 }
 0x329   :  { %p602_p10 = por %p601_p9, %p600_p8 }
 0x32b   :  { %p603_p11 = pnand %p602_p10, %p596_p7 }
 0x38d   :  { %v316_v0 = vpop.permute.xlu0 %315 }
 0x38e   :  { %319 = vst.msk [vmem:[#allocation11] sm:$0xff] %vm133_vm1, %v316_v0 }
 0x38f   :  { %606 = shalt.err (!%p603_p11)
}
 0x390   :  { %s607_s2 = scalar_lea.hbm %s874_s5, 128 }
 0x391   :  { %p608_p12 = scmp.ne.s32.totalorder %s874_s5, %s607_s2  ;;  %p611_p13 = scmp.lt.u32.totalorder %s607_s2, %s874_s5 }
 0x393   :  { %p613_p0 = pnand %p611_p13, %p608_p12 }
 0x395   :  { %616 = shalt.err (!%p613_p0)
}
 0x396   :  { %330 = dma.vmem_to_hbm [thread:$0]  %s328_s9, 128, %s874_s5, [#allocation4]  }
 0x397   :  { %635 = dma.done.wait [#allocation4], 128  }
 0x398   :  { %636 = vsyncadd [#allocation4], 4294967168 }
 0x399   :  { %637 = dma.done.wait [#allocation13], 128  }
 0x39a   :  { %638 = vsyncadd [#allocation13], 4294967168 }
 0x39b   :  { %347 = vsyncpa [#allocation3], 1 }
 0x39c   :  { %348 = vsyncpa [#allocation6], 1 }
 0x39d   :  { %349 = vsyncpa [#allocation9], 1 }
 0x39e   :  { %350 = vsyncpa [#allocation4], 1 }
 0x39f   :  { %351 = vsyncpa [#allocation13], 1 }

// kernel: ec2vae_forward.10
= control target key start
LH: loop header
LB: loop body
LE: loop exit
PB: predicated region body
PF: predicated region fallthrough
CT: control target
= control target key end

     0   :  { %8 = vsyncpa [#allocation3], 0  ;;  %s438_s0 = inlined_call_operand.hbm [shape: f32[64,24], index: 0, kind: input, shape index: {}]   ;;  %s439_s1 = inlined_call_operand.hbm [shape: bf16[24,192], index: 1, kind: input, shape index: {}]   ;;  %s440_s2 = inlined_call_operand.hbm [shape: f32[1,192], index: 2, kind: input, shape index: {}]   ;;  %s441_s3 = inlined_call_operand.hbm [shape: f32[64,192], index: 3, kind: output, shape index: {}]  }
   0x1   :  { %9 = vsyncpa [#allocation6], 0 }
   0x2   :  { %10 = vsyncpa [#allocation4], 0  ;;  %s346_s12 = smov [#allocation5]   ;;  %s347_s14 = smov [#allocation2]  }
   0x3   :  { %s28_s13 = sshll.u32 %s346_s12, 4  ;;  %s16_s15 = sshll.u32 %s347_s14, 4  ;;  %s29_s13 = int_to_ptr.vmem [resolvable:$true] %s28_s13  ;;  %s375_s15 = int_to_ptr.vmem [resolvable:$true] %s16_s15 }
   0x4   :  { %s252_s18 = scalar_lea.hbm %s439_s1, 384 }
   0x5   :  { %p253_p0 = scmp.ne.s32.totalorder %s439_s1, %s252_s18  ;;  %p256_p1 = scmp.lt.u32.totalorder %s252_s18, %s439_s1 }
   0x7   :  { %p258_p2 = pnand %p256_p1, %p253_p0 }
   0x9   :  { %261 = shalt.err (!%p258_p2)
}
   0xa   :  { %s262_s23 = scalar_lea.vmem %s29_s13, 384  ;;  %p267_p4 = scmp.lt.s32.totalorder %s29_s13, %s29_s13 }
   0xb   :  { %p263_p3 = scmp.ne.s32.totalorder %s29_s13, %s262_s23  ;;  %p268_p5 = scmp.lt.s32.totalorder %s262_s23, %s262_s23 }
   0xd   :  { %p269_p6 = por %p268_p5, %p267_p4 }
   0xf   :  { %p270_p7 = pnand %p269_p6, %p263_p3 }
  0x11   :  { %273 = shalt.err (!%p270_p7)
}
  0x12   :  { %s348_s24 = smov 128   ;;  %s349_s25 = smov 8  }
  0x13   :  { %34 = dma.hbm_to_vmem [thread:$0]  %s439_s1, 384, %s29_s13, [#allocation6], %s348_s24, %s348_s24, %s349_s25  }
  0x14   :  { %s274_s30 = scalar_lea.hbm %s438_s0, 1024 }
  0x15   :  { %p275_p8 = scmp.ne.s32.totalorder %s438_s0, %s274_s30  ;;  %p278_p9 = scmp.lt.u32.totalorder %s274_s30, %s438_s0 }
  0x17   :  { %p280_p10 = pnand %p278_p9, %p275_p8 }
  0x19   :  { %283 = shalt.err (!%p280_p10)
}
  0x1a   :  { %s284_s8 = scalar_lea.vmem %s375_s15, 1024  ;;  %p289_p12 = scmp.lt.s32.totalorder %s375_s15, %s375_s15 }
  0x1b   :  { %p285_p11 = scmp.ne.s32.totalorder %s375_s15, %s284_s8  ;;  %p290_p13 = scmp.lt.s32.totalorder %s284_s8, %s284_s8 }
  0x1d   :  { %p291_p0 = por %p290_p13, %p289_p12 }
  0x1f   :  { %p292_p1 = pnand %p291_p0, %p285_p11 }
  0x21   :  { %295 = shalt.err (!%p292_p1)
}
  0x22   :  { %22 = dma.hbm_to_vmem [thread:$0]  %s438_s0, 1024, %s375_s15, [#allocation3], %s348_s24, %s348_s24, %s349_s25  }
  0x23   :  { %s350_s10 = smov [#allocation7]   ;;  %s296_s14 = scalar_lea.hbm %s440_s2, 32 }
  0x24   :  { %s41_s11 = sshll.u32 %s350_s10, 4  ;;  %p297_p2 = scmp.ne.s32.totalorder %s440_s2, %s296_s14  ;;  %s42_s11 = int_to_ptr.vmem [resolvable:$true] %s41_s11 }
  0x25   :  { %p300_p3 = scmp.lt.u32.totalorder %s296_s14, %s440_s2 }
  0x27   :  { %p302_p4 = pnand %p300_p3, %p297_p2 }
  0x29   :  { %305 = shalt.err (!%p302_p4)
}
  0x2a   :  { %s306_s20 = scalar_lea.vmem %s42_s11, 32  ;;  %p311_p6 = scmp.lt.s32.totalorder %s42_s11, %s42_s11 }
  0x2b   :  { %p307_p5 = scmp.ne.s32.totalorder %s42_s11, %s306_s20  ;;  %p312_p7 = scmp.lt.s32.totalorder %s306_s20, %s306_s20 }
  0x2d   :  { %p313_p8 = por %p312_p7, %p311_p6 }
  0x2f   :  { %p314_p9 = pnand %p313_p8, %p307_p5 }
  0x31   :  { %317 = shalt.err (!%p314_p9)
}
  0x32   :  { %44 = dma.hbm_to_vmem [thread:$0]  %s440_s2, 32, %s42_s11, [#allocation6]  }
  0x33   :  { %340 = dma.done.wait [#allocation3], 1024  }
  0x34   :  { %341 = vsyncadd [#allocation3], 4294966272 }
  0x35   :  { %342 = dma.done.wait [#allocation6], 416  }
  0x36   :  { %343 = vsyncadd [#allocation6], 4294966880  ;;  %v351_v0 = vmov 0   ;;  %v247_v1 = vld [vmem:[#allocation5 + $0x4] ss:$8 sps:$4 sm:$0xff]   ;;  %v69_v3 = vld [vmem:[#allocation5 + $0x10] sm:$0xff]  ;;  %v72_v19 = vlaneseq }
  0x37   :  { %149 = vmatprep.mubr.bf16.mxu0 %v351_v0  ;;  %169 = vmatprep.mubr.bf16.mxu1 %v351_v0  ;;  %v249_v2 = vld [vmem:[#allocation5] ss:$8 sps:$4 sm:$0xff]   ;;  %vm110_vm0 = vcmask 1043456   ;;  %v228_v4 = vcombine.high %v69_v3, %v69_v3  ;;  %v227_v5 = vcombine.low %v69_v3, %v69_v3  ;;  %vm97_vm1 = vcmask 195584   ;;  %v57_v13 = vld [vmem:[#allocation2 + $0x10] sm:$0xff]  ;;  %v58_v14 = vld [vmem:[#allocation2 + $0x18] sm:$0xff] }
  0x38   :  { %117 = vmatprep.subr.bf16.mxu0 %v247_v1  ;;  %234 = vmatprep.subr.bf16.mxu1 %v247_v1  ;;  %v55_v6 = vld [vmem:[#allocation2] sm:$0xff]  ;;  %v56_v7 = vld [vmem:[#allocation2 + $0x8] sm:$0xff]  ;;  %v61_v15 = vld [vmem:[#allocation2 + $0x30] sm:$0xff]  ;;  %v64_v17 = vpack.c.bf16 %v58_v14, %v57_v13  ;;  %v73_v20 = vshrl.u32 %v72_v19, 7  ;;  %vm191_vm2 = vcmask 523264   ;;  %s352_s2 = smov [#allocation8]  }
  0x39   :  { %118 = vmatpush1.bf16.msra.mxu0 %v249_v2  ;;  %236 = vmatpush1.bf16.msra.mxu1 %v249_v2  ;;  %v59_v8 = vld [vmem:[#allocation2 + $0x20] sm:$0xff]  ;;  %v60_v9 = vld [vmem:[#allocation2 + $0x28] sm:$0xff]  ;;  %v112_v10 = vsel %vm110_vm0, %v227_v5, 0  ;;  %v63_v11 = vpack.c.bf16 %v56_v7, %v55_v6  ;;  %v62_v16 = vld [vmem:[#allocation2 + $0x38] sm:$0xff]  ;;  %s212_s21 = sshll.u32 %s352_s2, 4  ;;  %s213_s21 = int_to_ptr.vmem [resolvable:$true] %s212_s21 }
  0x3a   :  { %229 = vmatprep.subr.msk.bf16.mxu0 %vm110_vm0, %v228_v4  ;;  %235 = vmatprep.subr.msk.bf16.mxu1 %vm110_vm0, %v228_v4  ;;  %v65_v12 = vpack.c.bf16 %v60_v9, %v59_v8  ;;  %v66_v18 = vpack.c.bf16 %v62_v16, %v61_v15  ;;  %v74_v21 = vsub.s32 0, %v73_v20  ;;  %v70_v22 = vld [vmem:[#allocation7] sm:$0x3]  ;;  %v78_v23 = vsub.s32 1, %v73_v20  ;;  %s318_s22 = scalar_lea.vmem %s213_s21, 2048  ;;  %p323_p11 = scmp.lt.s32.totalorder %s213_s21, %s213_s21 }
  0x3b   :  { %p319_p10 = scmp.ne.s32.totalorder %s213_s21, %s318_s22  ;;  %p324_p12 = scmp.lt.s32.totalorder %s318_s22, %s318_s22 }
  0x3c   :  { %v75_v24 = vrot.slane %v70_v22, %v74_v21  ;;  %v79_v25 = vrot.slane %v70_v22, %v78_v23 }
  0x3d   :  { %120 = vmatpush1.bf16.msra.mxu0 %v112_v10  ;;  %237 = vmatpush1.bf16.msra.mxu1 %v112_v10  ;;  %p325_p13 = por %p324_p12, %p323_p11 }
  0x3f   :  { %p326_p0 = pnand %p325_p13, %p319_p10 }
  0x40   :  { %230 = vmatmul.mubr.msk.bf16.vlgmr.msra.gmra.mrb[0].mxu0 %vm97_vm1, %v63_v11  ;;  %232 = vmatmul.mubr.msk.bf16.vlgmr.msra.gmra.mrb[0].mxu1 %vm97_vm1, %v65_v12 }
  0x41   :  { %159 = vmatprep.mubr.bf16.mxu0 %v351_v0  ;;  %179 = vmatprep.mubr.bf16.mxu1 %v351_v0 }
  0x48   :  { %231 = vmatmul.mubr.msk.bf16.gmra.mrb[4].mxu0 %vm97_vm1, %v64_v17  ;;  %233 = vmatmul.mubr.msk.bf16.gmra.mrb[4].mxu1 %vm97_vm1, %v66_v18 }
 0x113   :  { %v151_v26 = vpop.f32.mrb[0].mxu0  ;;  %v171_v27 = vpop.f32.mrb[0].mxu1 }
 0x114   :  { %v152_v28 = vadd.f32 %v151_v26, %v75_v24  ;;  %v172_v29 = vadd.f32 %v171_v27, %v75_v24  ;;  %v153_v30 = vpop.f32.mrb[1].mxu0  ;;  %v173_v31 = vpop.f32.mrb[1].mxu1 }
 0x115   :  { %v154_v32 = vadd.f32 %v153_v30, %v79_v25  ;;  %v174_v33 = vadd.f32 %v173_v31, %v79_v25  ;;  %v155_v34 = vpop.f32.mrb[2].mxu0  ;;  %v175_v35 = vpop.f32.mrb[2].mxu1 }
 0x116   :  { %190 = vst [vmem:[#allocation8] sm:$0xff] %v152_v28  ;;  %199 = vst [vmem:[#allocation8 + $0x40] sm:$0xff] %v172_v29  ;;  %v156_v36 = vadd.f32 %v155_v34, %v75_v24  ;;  %v176_v37 = vadd.f32 %v175_v35, %v75_v24  ;;  %v157_v38 = vpop.f32.mrb[3].mxu0  ;;  %v177_v39 = vpop.f32.mrb[3].mxu1 }
 0x117   :  { %192 = vst.msk [vmem:[#allocation8 + $0x8] sm:$0xff] %vm191_vm2, %v154_v32  ;;  %200 = vst.msk [vmem:[#allocation8 + $0x48] sm:$0xff] %vm191_vm2, %v174_v33  ;;  %v158_v40 = vadd.f32 %v157_v38, %v79_v25  ;;  %v178_v41 = vadd.f32 %v177_v39, %v79_v25 }
 0x118   :  { %193 = vst [vmem:[#allocation8 + $0x10] sm:$0xff] %v156_v36  ;;  %201 = vst [vmem:[#allocation8 + $0x50] sm:$0xff] %v176_v37 }
 0x119   :  { %194 = vst.msk [vmem:[#allocation8 + $0x18] sm:$0xff] %vm191_vm2, %v158_v40  ;;  %202 = vst.msk [vmem:[#allocation8 + $0x58] sm:$0xff] %vm191_vm2, %v178_v41 }
 0x11b   :  { %v161_v42 = vpop.f32.mrb[4].mxu0  ;;  %v181_v43 = vpop.f32.mrb[4].mxu1 }
 0x11c   :  { %v162_v44 = vadd.f32 %v161_v42, %v75_v24  ;;  %v182_v45 = vadd.f32 %v181_v43, %v75_v24  ;;  %v163_v46 = vpop.f32.mrb[5].mxu0  ;;  %v183_v47 = vpop.f32.mrb[5].mxu1 }
 0x11d   :  { %v164_v48 = vadd.f32 %v163_v46, %v79_v25  ;;  %v184_v49 = vadd.f32 %v183_v47, %v79_v25  ;;  %v165_v50 = vpop.f32.mrb[6].mxu0  ;;  %v185_v51 = vpop.f32.mrb[6].mxu1 }
 0x11e   :  { %195 = vst [vmem:[#allocation8 + $0x20] sm:$0xff] %v162_v44  ;;  %203 = vst [vmem:[#allocation8 + $0x60] sm:$0xff] %v182_v45  ;;  %v166_v52 = vadd.f32 %v165_v50, %v75_v24  ;;  %v186_v53 = vadd.f32 %v185_v51, %v75_v24  ;;  %v167_v54 = vpop.f32.mrb[7].mxu0  ;;  %v187_v55 = vpop.f32.mrb[7].mxu1 }
 0x11f   :  { %196 = vst.msk [vmem:[#allocation8 + $0x28] sm:$0xff] %vm191_vm2, %v164_v48  ;;  %204 = vst.msk [vmem:[#allocation8 + $0x68] sm:$0xff] %vm191_vm2, %v184_v49  ;;  %v168_v56 = vadd.f32 %v167_v54, %v79_v25  ;;  %v188_v57 = vadd.f32 %v187_v55, %v79_v25 }
 0x120   :  { %197 = vst [vmem:[#allocation8 + $0x30] sm:$0xff] %v166_v52  ;;  %205 = vst [vmem:[#allocation8 + $0x70] sm:$0xff] %v186_v53 }
 0x121   :  { %198 = vst.msk [vmem:[#allocation8 + $0x38] sm:$0xff] %vm191_vm2, %v168_v56  ;;  %206 = vst.msk [vmem:[#allocation8 + $0x78] sm:$0xff] %vm191_vm2, %v188_v57 }
 0x122   :  { %329 = shalt.err (!%p326_p0)
}
 0x123   :  { %s330_s25 = scalar_lea.hbm %s441_s3, 2048 }
 0x124   :  { %p331_p1 = scmp.ne.s32.totalorder %s441_s3, %s330_s25  ;;  %p334_p2 = scmp.lt.u32.totalorder %s330_s25, %s441_s3 }
 0x126   :  { %p336_p3 = pnand %p334_p2, %p331_p1 }
 0x128   :  { %339 = shalt.err (!%p336_p3)
}
 0x129   :  { %s353_s30 = smov 256   ;;  %s354_s4 = smov 16  }
 0x12a   :  { %218 = dma.vmem_to_hbm [thread:$0]  %s213_s21, 2048, %s441_s3, [#allocation4], %s353_s30, %s353_s30, %s354_s4  }
 0x12b   :  { %344 = dma.done.wait [#allocation4], 2048  }
 0x12c   :  { %345 = vsyncadd [#allocation4], 4294965248 }
 0x12d   :  { %222 = vsyncpa [#allocation3], 1 }
 0x12e   :  { %223 = vsyncpa [#allocation6], 1 }
 0x12f   :  { %224 = vsyncpa [#allocation4], 1 }

// kernel: ec2vae_forward.14
= control target key start
LH: loop header
LB: loop body
LE: loop exit
PB: predicated region body
PF: predicated region fallthrough
CT: control target
= control target key end

     0   :  { %8 = vsyncpa [#allocation3], 0  ;;  %s322_s0 = inlined_call_operand.hbm [shape: f32[8,16], index: 0, kind: input, shape index: {}]   ;;  %s323_s1 = inlined_call_operand.hbm [shape: bf16[16,96], index: 1, kind: input, shape index: {}]   ;;  %s324_s2 = inlined_call_operand.hbm [shape: f32[1,96], index: 2, kind: input, shape index: {}]   ;;  %s325_s3 = inlined_call_operand.hbm [shape: f32[8,96], index: 3, kind: output, shape index: {}]  }
   0x1   :  { %9 = vsyncpa [#allocation6], 0 }
   0x2   :  { %10 = vsyncpa [#allocation4], 0  ;;  %s246_s12 = smov [#allocation5]   ;;  %s152_s16 = scalar_lea.hbm %s323_s1, 128 }
   0x3   :  { %s26_s13 = sshll.u32 %s246_s12, 4  ;;  %p153_p0 = scmp.ne.s32.totalorder %s323_s1, %s152_s16  ;;  %s27_s13 = int_to_ptr.vmem [resolvable:$true] %s26_s13 }
   0x4   :  { %p156_p1 = scmp.lt.u32.totalorder %s152_s16, %s323_s1 }
   0x6   :  { %p158_p2 = pnand %p156_p1, %p153_p0 }
   0x8   :  { %161 = shalt.err (!%p158_p2)
}
   0x9   :  { %s162_s21 = scalar_lea.vmem %s27_s13, 128  ;;  %p167_p4 = scmp.lt.s32.totalorder %s27_s13, %s27_s13 }
   0xa   :  { %p163_p3 = scmp.ne.s32.totalorder %s27_s13, %s162_s21  ;;  %p168_p5 = scmp.lt.s32.totalorder %s162_s21, %s162_s21 }
   0xc   :  { %p169_p6 = por %p168_p5, %p167_p4 }
   0xe   :  { %p170_p7 = pnand %p169_p6, %p163_p3 }
  0x10   :  { %173 = shalt.err (!%p170_p7)
}
  0x11   :  { %s247_s22 = smov 64   ;;  %s248_s23 = smov 4  }
  0x12   :  { %32 = dma.hbm_to_vmem [thread:$0]  %s323_s1, 128, %s27_s13, [#allocation6], %s247_s22, %s247_s22, %s248_s23  }
  0x13   :  { %s249_s26 = smov [#allocation2]   ;;  %s250_s28 = smov [#allocation7]  }
  0x14   :  { %s17_s27 = sshll.u32 %s249_s26, 4  ;;  %s39_s29 = sshll.u32 %s250_s28, 4  ;;  %s18_s27 = int_to_ptr.vmem [resolvable:$true] %s17_s27  ;;  %s40_s29 = int_to_ptr.vmem [resolvable:$true] %s39_s29 }
  0x15   :  { %s174_s5 = scalar_lea.hbm %s322_s0, 128 }
  0x16   :  { %p175_p8 = scmp.ne.s32.totalorder %s322_s0, %s174_s5  ;;  %p178_p9 = scmp.lt.u32.totalorder %s174_s5, %s322_s0 }
  0x18   :  { %p180_p10 = pnand %p178_p9, %p175_p8 }
  0x1a   :  { %183 = shalt.err (!%p180_p10)
}
  0x1b   :  { %s184_s1 = scalar_lea.vmem %s18_s27, 128  ;;  %p189_p12 = scmp.lt.s32.totalorder %s18_s27, %s18_s27 }
  0x1c   :  { %p185_p11 = scmp.ne.s32.totalorder %s18_s27, %s184_s1  ;;  %p190_p13 = scmp.lt.s32.totalorder %s184_s1, %s184_s1 }
  0x1e   :  { %p191_p0 = por %p190_p13, %p189_p12 }
  0x20   :  { %p192_p1 = pnand %p191_p0, %p185_p11 }
  0x22   :  { %195 = shalt.err (!%p192_p1)
}
  0x23   :  { %20 = dma.hbm_to_vmem [thread:$0]  %s322_s0, 128, %s18_s27, [#allocation3]  }
  0x24   :  { %s196_s14 = scalar_lea.hbm %s324_s2, 16 }
  0x25   :  { %p197_p2 = scmp.ne.s32.totalorder %s324_s2, %s196_s14  ;;  %p200_p3 = scmp.lt.u32.totalorder %s196_s14, %s324_s2 }
  0x27   :  { %p202_p4 = pnand %p200_p3, %p197_p2 }
  0x29   :  { %205 = shalt.err (!%p202_p4)
}
  0x2a   :  { %s206_s19 = scalar_lea.vmem %s40_s29, 16  ;;  %s210_s20 = scalar_lea.vmem %s40_s29, 32 }
  0x2b   :  { %p207_p5 = scmp.ne.s32.totalorder %s40_s29, %s206_s19  ;;  %p211_p6 = scmp.lt.s32.totalorder %s40_s29, %s40_s29 }
  0x2c   :  { %p212_p7 = scmp.lt.s32.totalorder %s210_s20, %s206_s19 }
  0x2e   :  { %p213_p8 = por %p212_p7, %p211_p6 }
  0x30   :  { %p214_p9 = pnand %p213_p8, %p207_p5 }
  0x32   :  { %217 = shalt.err (!%p214_p9)
}
  0x33   :  { %42 = dma.hbm_to_vmem [thread:$0]  %s324_s2, 16, %s40_s29, [#allocation6]  }
  0x34   :  { %240 = dma.done.wait [#allocation3], 128  }
  0x35   :  { %241 = vsyncadd [#allocation3], 4294967168 }
  0x36   :  { %242 = dma.done.wait [#allocation6], 144  }
  0x37   :  { %243 = vsyncadd [#allocation6], 4294967152  ;;  %v251_v0 = vmov 0.0   ;;  %vm252_vm0 = vmmov 0   ;;  %v151_v1 = vld [vmem:[#allocation5] sm:$0xff]   ;;  %v53_v2 = vld [vmem:[#allocation2] sm:$0xff] }
  0x38   :  { %137 = vmatprep.subr.bf16.mxu0 %v251_v0  ;;  %139 = vmatprep.mubr.msk.bf16.mxu0 %vm252_vm0, %v251_v0  ;;  %v54_v3 = vpack.c.bf16 %v53_v2, %v53_v2  ;;  %vm70_vm1 = vcmask 130048   ;;  %v132_v4 = vld [vmem:[#allocation7] ss:$0 sm:$0xff]  ;;  %s253_s22 = smov [#allocation8]   ;;  %vm114_vm2 = vcmask 785408  }
  0x39   :  { %138 = vmatpush3.bf16.msra.mxu0 %v151_v1  ;;  %s122_s23 = sshll.u32 %s253_s22, 4  ;;  %s123_s23 = int_to_ptr.vmem [resolvable:$true] %s122_s23 }
  0x3a   :  { %s218_s2 = scalar_lea.vmem %s123_s23, 128  ;;  %p223_p11 = scmp.lt.s32.totalorder %s123_s23, %s123_s23 }
  0x3b   :  { %p219_p10 = scmp.ne.s32.totalorder %s123_s23, %s218_s2  ;;  %p224_p12 = scmp.lt.s32.totalorder %s218_s2, %s218_s2 }
  0x3c   :  { %140 = vmatmul.mubr.msk.bf16.vlgmr.msra.gmra.mrb[0].mxu0 %vm70_vm1, %v54_v3 }
  0x3d   :  { %p225_p13 = por %p224_p12, %p223_p11 }
  0x3f   :  { %p226_p0 = pnand %p225_p13, %p219_p10 }
 0x10f   :  { %v108_v5 = vpop.f32.mrb[0].mxu0 }
 0x110   :  { %v109_v6 = vadd.f32 %v132_v4, %v108_v5  ;;  %v141_v7 = vpop.f32.mrb[1].mxu0 }
 0x111   :  { %v111_v8 = vpop.f32.mrb[2].mxu0 }
 0x112   :  { %v142_v9 = vpop.f32.mrb[3].mxu0  ;;  %115 = vst.msk [vmem:[#allocation8] sm:$0xff] %vm114_vm2, %v109_v6 }
 0x113   :  { %229 = shalt.err (!%p226_p0)
}
 0x114   :  { %s230_s26 = scalar_lea.hbm %s325_s3, 128 }
 0x115   :  { %p231_p1 = scmp.ne.s32.totalorder %s325_s3, %s230_s26  ;;  %p234_p2 = scmp.lt.u32.totalorder %s230_s26, %s325_s3 }
 0x117   :  { %p236_p3 = pnand %p234_p2, %p231_p1 }
 0x119   :  { %239 = shalt.err (!%p236_p3)
}
 0x11a   :  { %125 = dma.vmem_to_hbm [thread:$0]  %s123_s23, 128, %s325_s3, [#allocation4]  }
 0x11b   :  { %244 = dma.done.wait [#allocation4], 128  }
 0x11c   :  { %245 = vsyncadd [#allocation4], 4294967168 }
 0x11d   :  { %129 = vsyncpa [#allocation3], 1 }
 0x11e   :  { %130 = vsyncpa [#allocation6], 1 }
 0x11f   :  { %131 = vsyncpa [#allocation4], 1 }

// kernel: ec2vae_forward.15
= control target key start
LH: loop header
LB: loop body
LE: loop exit
PB: predicated region body
PF: predicated region fallthrough
CT: control target
= control target key end

     0   :  { %8 = vsyncpa [#allocation3], 0  ;;  %s325_s0 = inlined_call_operand.hbm [shape: f32[8,16], index: 0, kind: input, shape index: {}]   ;;  %s326_s1 = inlined_call_operand.hbm [shape: bf16[16,32], index: 1, kind: input, shape index: {}]   ;;  %s327_s2 = inlined_call_operand.hbm [shape: f32[1,32], index: 2, kind: input, shape index: {}]   ;;  %s328_s3 = inlined_call_operand.hbm [shape: f32[8,32], index: 3, kind: output, shape index: {}]  }
   0x1   :  { %9 = vsyncpa [#allocation6], 0 }
   0x2   :  { %10 = vsyncpa [#allocation4], 0  ;;  %s249_s12 = smov [#allocation5]   ;;  %s155_s16 = scalar_lea.hbm %s326_s1, 128 }
   0x3   :  { %s26_s13 = sshll.u32 %s249_s12, 4  ;;  %p156_p0 = scmp.ne.s32.totalorder %s326_s1, %s155_s16  ;;  %s27_s13 = int_to_ptr.vmem [resolvable:$true] %s26_s13 }
   0x4   :  { %p159_p1 = scmp.lt.u32.totalorder %s155_s16, %s326_s1 }
   0x6   :  { %p161_p2 = pnand %p159_p1, %p156_p0 }
   0x8   :  { %164 = shalt.err (!%p161_p2)
}
   0x9   :  { %s165_s21 = scalar_lea.vmem %s27_s13, 128  ;;  %p170_p4 = scmp.lt.s32.totalorder %s27_s13, %s27_s13 }
   0xa   :  { %p166_p3 = scmp.ne.s32.totalorder %s27_s13, %s165_s21  ;;  %p171_p5 = scmp.lt.s32.totalorder %s165_s21, %s165_s21 }
   0xc   :  { %p172_p6 = por %p171_p5, %p170_p4 }
   0xe   :  { %p173_p7 = pnand %p172_p6, %p166_p3 }
  0x10   :  { %176 = shalt.err (!%p173_p7)
}
  0x11   :  { %s250_s22 = smov 64   ;;  %s251_s23 = smov 4  }
  0x12   :  { %32 = dma.hbm_to_vmem [thread:$0]  %s326_s1, 128, %s27_s13, [#allocation6], %s250_s22, %s250_s22, %s251_s23  }
  0x13   :  { %s252_s26 = smov [#allocation2]   ;;  %s253_s28 = smov [#allocation7]  }
  0x14   :  { %s17_s27 = sshll.u32 %s252_s26, 4  ;;  %s39_s29 = sshll.u32 %s253_s28, 4  ;;  %s18_s27 = int_to_ptr.vmem [resolvable:$true] %s17_s27  ;;  %s40_s29 = int_to_ptr.vmem [resolvable:$true] %s39_s29 }
  0x15   :  { %s177_s5 = scalar_lea.hbm %s325_s0, 128 }
  0x16   :  { %p178_p8 = scmp.ne.s32.totalorder %s325_s0, %s177_s5  ;;  %p181_p9 = scmp.lt.u32.totalorder %s177_s5, %s325_s0 }
  0x18   :  { %p183_p10 = pnand %p181_p9, %p178_p8 }
  0x1a   :  { %186 = shalt.err (!%p183_p10)
}
  0x1b   :  { %s187_s1 = scalar_lea.vmem %s18_s27, 128  ;;  %p192_p12 = scmp.lt.s32.totalorder %s18_s27, %s18_s27 }
  0x1c   :  { %p188_p11 = scmp.ne.s32.totalorder %s18_s27, %s187_s1  ;;  %p193_p13 = scmp.lt.s32.totalorder %s187_s1, %s187_s1 }
  0x1e   :  { %p194_p0 = por %p193_p13, %p192_p12 }
  0x20   :  { %p195_p1 = pnand %p194_p0, %p188_p11 }
  0x22   :  { %198 = shalt.err (!%p195_p1)
}
  0x23   :  { %20 = dma.hbm_to_vmem [thread:$0]  %s325_s0, 128, %s18_s27, [#allocation3]  }
  0x24   :  { %s199_s14 = scalar_lea.hbm %s327_s2, 16 }
  0x25   :  { %p200_p2 = scmp.ne.s32.totalorder %s327_s2, %s199_s14  ;;  %p203_p3 = scmp.lt.u32.totalorder %s199_s14, %s327_s2 }
  0x27   :  { %p205_p4 = pnand %p203_p3, %p200_p2 }
  0x29   :  { %208 = shalt.err (!%p205_p4)
}
  0x2a   :  { %s209_s19 = scalar_lea.vmem %s40_s29, 16  ;;  %s213_s20 = scalar_lea.vmem %s40_s29, 32 }
  0x2b   :  { %p210_p5 = scmp.ne.s32.totalorder %s40_s29, %s209_s19  ;;  %p214_p6 = scmp.lt.s32.totalorder %s40_s29, %s40_s29 }
  0x2c   :  { %p215_p7 = scmp.lt.s32.totalorder %s213_s20, %s209_s19 }
  0x2e   :  { %p216_p8 = por %p215_p7, %p214_p6 }
  0x30   :  { %p217_p9 = pnand %p216_p8, %p210_p5 }
  0x32   :  { %220 = shalt.err (!%p217_p9)
}
  0x33   :  { %42 = dma.hbm_to_vmem [thread:$0]  %s327_s2, 16, %s40_s29, [#allocation6]  }
  0x34   :  { %243 = dma.done.wait [#allocation3], 128  }
  0x35   :  { %244 = vsyncadd [#allocation3], 4294967168 }
  0x36   :  { %245 = dma.done.wait [#allocation6], 144  }
  0x37   :  { %246 = vsyncadd [#allocation6], 4294967152  ;;  %v254_v0 = vmov 0.0   ;;  %vm255_vm0 = vmmov 0   ;;  %v152_v1 = vld [vmem:[#allocation5] sm:$0xff]   ;;  %v53_v2 = vld [vmem:[#allocation2] sm:$0xff] }
  0x38   :  { %138 = vmatprep.subr.bf16.mxu0 %v254_v0  ;;  %140 = vmatprep.mubr.msk.bf16.mxu0 %vm255_vm0, %v254_v0  ;;  %v54_v3 = vpack.c.bf16 %v53_v2, %v53_v2  ;;  %vm70_vm1 = vcmask 130048   ;;  %v133_v4 = vld [vmem:[#allocation7] ss:$0 sm:$0xff]  ;;  %s256_s2 = smov [#allocation8]   ;;  %vm115_vm2 = vcmask 261120  }
  0x39   :  { %139 = vmatpush3.bf16.msra.mxu0 %v152_v1  ;;  %s123_s22 = sshll.u32 %s256_s2, 4  ;;  %s124_s22 = int_to_ptr.vmem [resolvable:$true] %s123_s22 }
  0x3a   :  { %s221_s23 = scalar_lea.vmem %s124_s22, 128  ;;  %p226_p11 = scmp.lt.s32.totalorder %s124_s22, %s124_s22 }
  0x3b   :  { %p222_p10 = scmp.ne.s32.totalorder %s124_s22, %s221_s23  ;;  %p227_p12 = scmp.lt.s32.totalorder %s221_s23, %s221_s23 }
  0x3c   :  { %141 = vmatmul.mubr.msk.bf16.vlgmr.msra.gmra.mrb[0].mxu0 %vm70_vm1, %v54_v3 }
  0x3d   :  { %p228_p13 = por %p227_p12, %p226_p11 }
  0x3f   :  { %p229_p0 = pnand %p228_p13, %p222_p10 }
 0x10f   :  { %v108_v5 = vpop.f32.mrb[0].mxu0 }
 0x110   :  { %v109_v6 = vadd.f32 %v133_v4, %v108_v5  ;;  %v142_v7 = vpop.f32.mrb[1].mxu0 }
 0x111   :  { %v111_v8 = vpop.f32.mrb[2].mxu0 }
 0x112   :  { %153 = vtanh.f32 %v109_v6  ;;  %v143_v9 = vpop.f32.mrb[3].mxu0 }
 0x11c   :  { %v154_v10 = vpop.eup %153 }
 0x11d   :  { %116 = vst.msk [vmem:[#allocation8] sm:$0xff] %vm115_vm2, %v154_v10 }
 0x11e   :  { %232 = shalt.err (!%p229_p0)
}
 0x11f   :  { %s233_s26 = scalar_lea.hbm %s328_s3, 128 }
 0x120   :  { %p234_p1 = scmp.ne.s32.totalorder %s328_s3, %s233_s26  ;;  %p237_p2 = scmp.lt.u32.totalorder %s233_s26, %s328_s3 }
 0x122   :  { %p239_p3 = pnand %p237_p2, %p234_p1 }
 0x124   :  { %242 = shalt.err (!%p239_p3)
}
 0x125   :  { %126 = dma.vmem_to_hbm [thread:$0]  %s124_s22, 128, %s328_s3, [#allocation4]  }
 0x126   :  { %247 = dma.done.wait [#allocation4], 128  }
 0x127   :  { %248 = vsyncadd [#allocation4], 4294967168 }
 0x128   :  { %130 = vsyncpa [#allocation3], 1 }
 0x129   :  { %131 = vsyncpa [#allocation6], 1 }
 0x12a   :  { %132 = vsyncpa [#allocation4], 1 }

// kernel: ec2vae_forward.17
= control target key start
LH: loop header
LB: loop body
LE: loop exit
PB: predicated region body
PF: predicated region fallthrough
CT: control target
= control target key end

     0   :  { %8 = vsyncpa [#allocation3], 0  ;;  %s430_s0 = inlined_call_operand.hbm [shape: f32[64,28], index: 0, kind: input, shape index: {}]   ;;  %s431_s1 = inlined_call_operand.hbm [shape: bf16[28,96], index: 1, kind: input, shape index: {}]   ;;  %s432_s2 = inlined_call_operand.hbm [shape: f32[1,96], index: 2, kind: input, shape index: {}]   ;;  %s433_s3 = inlined_call_operand.hbm [shape: f32[64,96], index: 3, kind: output, shape index: {}]  }
   0x1   :  { %9 = vsyncpa [#allocation6], 0 }
   0x2   :  { %10 = vsyncpa [#allocation4], 0  ;;  %s333_s12 = smov [#allocation5]   ;;  %s239_s16 = scalar_lea.hbm %s431_s1, 256 }
   0x3   :  { %s28_s13 = sshll.u32 %s333_s12, 4  ;;  %p240_p0 = scmp.ne.s32.totalorder %s431_s1, %s239_s16  ;;  %s29_s13 = int_to_ptr.vmem [resolvable:$true] %s28_s13 }
   0x4   :  { %p243_p1 = scmp.lt.u32.totalorder %s239_s16, %s431_s1 }
   0x6   :  { %p245_p2 = pnand %p243_p1, %p240_p0 }
   0x8   :  { %248 = shalt.err (!%p245_p2)
}
   0x9   :  { %s249_s21 = scalar_lea.vmem %s29_s13, 256  ;;  %p254_p4 = scmp.lt.s32.totalorder %s29_s13, %s29_s13 }
   0xa   :  { %p250_p3 = scmp.ne.s32.totalorder %s29_s13, %s249_s21  ;;  %p255_p5 = scmp.lt.s32.totalorder %s249_s21, %s249_s21 }
   0xc   :  { %p256_p6 = por %p255_p5, %p254_p4 }
   0xe   :  { %p257_p7 = pnand %p256_p6, %p250_p3 }
  0x10   :  { %260 = shalt.err (!%p257_p7)
}
  0x11   :  { %s334_s22 = smov 64   ;;  %s335_s23 = smov 4  }
  0x12   :  { %34 = dma.hbm_to_vmem [thread:$0]  %s431_s1, 256, %s29_s13, [#allocation6], %s334_s22, %s334_s22, %s335_s23  }
  0x13   :  { %s336_s26 = smov [#allocation2]   ;;  %s261_s30 = scalar_lea.hbm %s430_s0, 1024 }
  0x14   :  { %s16_s27 = sshll.u32 %s336_s26, 4  ;;  %p262_p8 = scmp.ne.s32.totalorder %s430_s0, %s261_s30  ;;  %s17_s27 = int_to_ptr.vmem [resolvable:$true] %s16_s27 }
  0x15   :  { %p265_p9 = scmp.lt.u32.totalorder %s261_s30, %s430_s0 }
  0x17   :  { %p267_p10 = pnand %p265_p9, %p262_p8 }
  0x19   :  { %270 = shalt.err (!%p267_p10)
}
  0x1a   :  { %s271_s8 = scalar_lea.vmem %s17_s27, 1024  ;;  %p276_p12 = scmp.lt.s32.totalorder %s17_s27, %s17_s27 }
  0x1b   :  { %p272_p11 = scmp.ne.s32.totalorder %s17_s27, %s271_s8  ;;  %p277_p13 = scmp.lt.s32.totalorder %s271_s8, %s271_s8 }
  0x1d   :  { %p278_p0 = por %p277_p13, %p276_p12 }
  0x1f   :  { %p279_p1 = pnand %p278_p0, %p272_p11 }
  0x21   :  { %282 = shalt.err (!%p279_p1)
}
  0x22   :  { %s337_s1 = smov 128   ;;  %s338_s9 = smov 8  }
  0x23   :  { %22 = dma.hbm_to_vmem [thread:$0]  %s430_s0, 1024, %s17_s27, [#allocation3], %s337_s1, %s337_s1, %s338_s9  }
  0x24   :  { %s339_s12 = smov [#allocation7]   ;;  %s283_s16 = scalar_lea.hbm %s432_s2, 16 }
  0x25   :  { %s41_s13 = sshll.u32 %s339_s12, 4  ;;  %p284_p2 = scmp.ne.s32.totalorder %s432_s2, %s283_s16  ;;  %s42_s13 = int_to_ptr.vmem [resolvable:$true] %s41_s13 }
  0x26   :  { %p287_p3 = scmp.lt.u32.totalorder %s283_s16, %s432_s2 }
  0x28   :  { %p289_p4 = pnand %p287_p3, %p284_p2 }
  0x2a   :  { %292 = shalt.err (!%p289_p4)
}
  0x2b   :  { %s293_s21 = scalar_lea.vmem %s42_s13, 16  ;;  %s297_s0 = scalar_lea.vmem %s42_s13, 32 }
  0x2c   :  { %p294_p5 = scmp.ne.s32.totalorder %s42_s13, %s293_s21  ;;  %p298_p6 = scmp.lt.s32.totalorder %s42_s13, %s42_s13 }
  0x2d   :  { %p299_p7 = scmp.lt.s32.totalorder %s297_s0, %s293_s21 }
  0x2f   :  { %p300_p8 = por %p299_p7, %p298_p6 }
  0x31   :  { %p301_p9 = pnand %p300_p8, %p294_p5 }
  0x33   :  { %304 = shalt.err (!%p301_p9)
}
  0x34   :  { %44 = dma.hbm_to_vmem [thread:$0]  %s432_s2, 16, %s42_s13, [#allocation6]  }
  0x35   :  { %327 = dma.done.wait [#allocation3], 1024  }
  0x36   :  { %328 = vsyncadd [#allocation3], 4294966272 }
  0x37   :  { %329 = dma.done.wait [#allocation6], 272  }
  0x38   :  { %330 = vsyncadd [#allocation6], 4294967024  ;;  %v237_v0 = vld [vmem:[#allocation5] sm:$0xff]   ;;  %vm102_vm0 = vcmask 1045504   ;;  %v238_v1 = vld [vmem:[#allocation5 + $0x8] sm:$0x3f]  }
  0x39   :  { %211 = vmatprep.subr.bf16.mxu0 %v237_v0  ;;  %223 = vmatprep.subr.bf16.mxu1 %v237_v0  ;;  %v55_v2 = vld [vmem:[#allocation2] sm:$0xff]  ;;  %v56_v3 = vld [vmem:[#allocation2 + $0x8] sm:$0xff]  ;;  %vm89_vm1 = vcmask 228352   ;;  %v57_v7 = vld [vmem:[#allocation2 + $0x10] sm:$0xff]  ;;  %v104_v9 = vsel %vm102_vm0, %v238_v1, 0  ;;  %vm171_vm2 = vcmask 785408  }
  0x3a   :  { %v59_v4 = vld [vmem:[#allocation2 + $0x20] sm:$0xff]  ;;  %212 = vmatpush3.bf16.msra.mxu0 %v237_v0  ;;  %225 = vmatpush3.bf16.msra.mxu1 %v237_v0  ;;  %v63_v5 = vpack.c.bf16 %v56_v3, %v55_v2  ;;  %v60_v6 = vld [vmem:[#allocation2 + $0x28] sm:$0xff]  ;;  %v58_v8 = vld [vmem:[#allocation2 + $0x18] sm:$0xff]  ;;  %s340_s2 = smov [#allocation8]  }
  0x3b   :  { %227 = vmatprep.subr.msk.bf16.mxu0 %vm102_vm0, %v238_v1  ;;  %228 = vmatprep.subr.msk.bf16.mxu1 %vm102_vm0, %v238_v1  ;;  %v65_v10 = vpack.c.bf16 %v60_v6, %v59_v4  ;;  %v61_v11 = vld [vmem:[#allocation2 + $0x30] sm:$0xff]  ;;  %v62_v12 = vld [vmem:[#allocation2 + $0x38] sm:$0xff]  ;;  %v64_v13 = vpack.c.bf16 %v58_v8, %v57_v7  ;;  %s185_s24 = sshll.u32 %s340_s2, 4  ;;  %s186_s24 = int_to_ptr.vmem [resolvable:$true] %s185_s24 }
  0x3c   :  { %215 = vmatprep.mubr.msk.bf16.mxu0 %vm89_vm1, %v63_v5  ;;  %v66_v14 = vpack.c.bf16 %v62_v12, %v61_v11  ;;  %v198_v15 = vld [vmem:[#allocation7] ss:$0 sm:$0xff]  ;;  %s305_s25 = scalar_lea.vmem %s186_s24, 1024  ;;  %p310_p11 = scmp.lt.s32.totalorder %s186_s24, %s186_s24 }
  0x3d   :  { %219 = vmatprep.mubr.msk.bf16.mxu1 %vm89_vm1, %v65_v10  ;;  %p306_p10 = scmp.ne.s32.totalorder %s186_s24, %s305_s25  ;;  %p311_p12 = scmp.lt.s32.totalorder %s305_s25, %s305_s25 }
  0x3e   :  { %214 = vmatpush3.bf16.msra.mxu0 %v104_v9  ;;  %226 = vmatpush3.bf16.msra.mxu1 %v104_v9 }
  0x3f   :  { %p312_p13 = por %p311_p12, %p310_p11 }
  0x41   :  { %216 = vmatmul.mubr.msk.bf16.vlgmr.msra.gmra.mrb[0].mxu0 %vm89_vm1, %v64_v13  ;;  %220 = vmatmul.mubr.msk.bf16.vlgmr.msra.gmra.mrb[0].mxu1 %vm89_vm1, %v66_v14  ;;  %p313_p0 = pnand %p312_p13, %p306_p10 }
 0x114   :  { %v217_v16 = vpop.f32.mrb[0].mxu0  ;;  %v221_v17 = vpop.f32.mrb[0].mxu1 }
 0x115   :  { %v149_v18 = vadd.f32 %v217_v16, %v198_v15  ;;  %v165_v19 = vadd.f32 %v221_v17, %v198_v15  ;;  %v140_v20 = vpop.f32.mrb[1].mxu0  ;;  %v156_v21 = vpop.f32.mrb[1].mxu1 }
 0x116   :  { %v141_v22 = vadd.f32 %v198_v15, %v140_v20  ;;  %v157_v23 = vadd.f32 %v198_v15, %v156_v21  ;;  %v218_v24 = vpop.f32.mrb[2].mxu0  ;;  %v222_v25 = vpop.f32.mrb[2].mxu1 }
 0x117   :  { %174 = vst.msk [vmem:[#allocation8 + $0x10] sm:$0xff] %vm171_vm2, %v149_v18  ;;  %178 = vst.msk [vmem:[#allocation8 + $0x30] sm:$0xff] %vm171_vm2, %v165_v19  ;;  %v152_v26 = vadd.f32 %v218_v24, %v198_v15  ;;  %v168_v27 = vadd.f32 %v222_v25, %v198_v15  ;;  %v143_v28 = vpop.f32.mrb[3].mxu0  ;;  %v159_v29 = vpop.f32.mrb[3].mxu1 }
 0x118   :  { %172 = vst.msk [vmem:[#allocation8] sm:$0xff] %vm171_vm2, %v141_v22  ;;  %176 = vst.msk [vmem:[#allocation8 + $0x20] sm:$0xff] %vm171_vm2, %v157_v23  ;;  %v144_v30 = vadd.f32 %v198_v15, %v143_v28  ;;  %v160_v31 = vadd.f32 %v198_v15, %v159_v29 }
 0x119   :  { %175 = vst.msk [vmem:[#allocation8 + $0x18] sm:$0xff] %vm171_vm2, %v152_v26  ;;  %179 = vst.msk [vmem:[#allocation8 + $0x38] sm:$0xff] %vm171_vm2, %v168_v27 }
 0x11a   :  { %173 = vst.msk [vmem:[#allocation8 + $0x8] sm:$0xff] %vm171_vm2, %v144_v30  ;;  %177 = vst.msk [vmem:[#allocation8 + $0x28] sm:$0xff] %vm171_vm2, %v160_v31 }
 0x11b   :  { %316 = shalt.err (!%p313_p0)
}
 0x11c   :  { %s317_s28 = scalar_lea.hbm %s433_s3, 1024 }
 0x11d   :  { %p318_p1 = scmp.ne.s32.totalorder %s433_s3, %s317_s28  ;;  %p321_p2 = scmp.lt.u32.totalorder %s317_s28, %s433_s3 }
 0x11f   :  { %p323_p3 = pnand %p321_p2, %p318_p1 }
 0x121   :  { %326 = shalt.err (!%p323_p3)
}
 0x122   :  { %191 = dma.vmem_to_hbm [thread:$0]  %s186_s24, 1024, %s433_s3, [#allocation4], %s337_s1, %s337_s1, %s338_s9  }
 0x123   :  { %331 = dma.done.wait [#allocation4], 1024  }
 0x124   :  { %332 = vsyncadd [#allocation4], 4294966272 }
 0x125   :  { %195 = vsyncpa [#allocation3], 1 }
 0x126   :  { %196 = vsyncpa [#allocation6], 1 }
 0x127   :  { %197 = vsyncpa [#allocation4], 1 }

// kernel: ec2vae_forward.16
= control target key start
LH: loop header
LB: loop body
LE: loop exit
PB: predicated region body
PF: predicated region fallthrough
CT: control target
= control target key end

     0   :  { %12 = vsyncpa [#allocation3], 0  ;;  %s1234_s0 = inlined_call_operand.hbm [shape: f32[8,96], index: 0, kind: input, shape index: {}]   ;;  %s1235_s1 = inlined_call_operand.hbm [shape: bf16[32,96], index: 1, kind: input, shape index: {}]   ;;  %s1236_s2 = inlined_call_operand.hbm [shape: f32[1,32], index: 2, kind: input, shape index: {}]   ;;  %s1237_s3 = inlined_call_operand.hbm [shape: bf16[128,96], index: 3, kind: input, shape index: {}]   ;;  %s1238_s4 = inlined_call_operand.hbm [shape: bf16[32,128], index: 4, kind: input, shape index: {}]   ;;  %s1239_s5 = inlined_call_operand.hbm [shape: f32[1,128], index: 5, kind: input, shape index: {}]   ;;  %s1240_s6 = inlined_call_operand.hbm [shape: f32[8,32], index: 6, kind: input, shape index: {}]   ;;  %s1241_s7 = inlined_call_operand.hbm [shape: f32[8,8,128], index: 7, kind: output, shape index: {}]  }
   0x1   :  { %13 = vsyncpa [#allocation6], 0 }
   0x2   :  { %14 = vsyncpa [#allocation9], 0 }
   0x3   :  { %15 = vsyncpa [#allocation12], 0 }
   0x4   :  { %16 = vsyncpa [#allocation4], 0  ;;  %s914_s24 = smov [#allocation5]   ;;  %s704_s28 = scalar_lea.hbm %s1235_s1, 256 }
   0x5   :  { %s32_s25 = sshll.u32 %s914_s24, 4  ;;  %p705_p0 = scmp.ne.s32.totalorder %s1235_s1, %s704_s28  ;;  %s33_s25 = int_to_ptr.vmem [resolvable:$true] %s32_s25 }
   0x6   :  { %p708_p1 = scmp.lt.u32.totalorder %s704_s28, %s1235_s1 }
   0x8   :  { %p710_p2 = pnand %p708_p1, %p705_p0 }
   0xa   :  { %713 = shalt.err (!%p710_p2)
}
   0xb   :  { %s714_s10 = scalar_lea.vmem %s33_s25, 256  ;;  %p719_p4 = scmp.lt.s32.totalorder %s33_s25, %s33_s25 }
   0xc   :  { %p715_p3 = scmp.ne.s32.totalorder %s33_s25, %s714_s10  ;;  %p720_p5 = scmp.lt.s32.totalorder %s714_s10, %s714_s10 }
   0xe   :  { %p721_p6 = por %p720_p5, %p719_p4 }
  0x10   :  { %p722_p7 = pnand %p721_p6, %p715_p3 }
  0x12   :  { %725 = shalt.err (!%p722_p7)
}
  0x13   :  { %s915_s11 = smov 64   ;;  %s916_s12 = smov 4  }
  0x14   :  { %38 = dma.hbm_to_vmem [thread:$0]  %s1235_s1, 256, %s33_s25, [#allocation6], %s915_s11, %s915_s11, %s916_s12  }
  0x15   :  { %s917_s15 = smov [#allocation8]   ;;  %s918_s17 = smov [#allocation11]  }
  0x16   :  { %s54_s16 = sshll.u32 %s917_s15, 4  ;;  %s79_s18 = sshll.u32 %s918_s17, 4  ;;  %s55_s16 = int_to_ptr.vmem [resolvable:$true] %s54_s16  ;;  %s80_s18 = int_to_ptr.vmem [resolvable:$true] %s79_s18 }
  0x17   :  { %s726_s21 = scalar_lea.hbm %s1237_s3, 1024 }
  0x18   :  { %p727_p8 = scmp.ne.s32.totalorder %s1237_s3, %s726_s21  ;;  %p730_p9 = scmp.lt.u32.totalorder %s726_s21, %s1237_s3 }
  0x1a   :  { %p732_p10 = pnand %p730_p9, %p727_p8 }
  0x1c   :  { %735 = shalt.err (!%p732_p10)
}
  0x1d   :  { %s736_s1 = scalar_lea.vmem %s55_s16, 1024  ;;  %p741_p12 = scmp.lt.s32.totalorder %s55_s16, %s55_s16 }
  0x1e   :  { %p737_p11 = scmp.ne.s32.totalorder %s55_s16, %s736_s1  ;;  %p742_p13 = scmp.lt.s32.totalorder %s736_s1, %s736_s1 }
  0x20   :  { %p743_p0 = por %p742_p13, %p741_p12 }
  0x22   :  { %p744_p1 = pnand %p743_p0, %p737_p11 }
  0x24   :  { %747 = shalt.err (!%p744_p1)
}
  0x25   :  { %60 = dma.hbm_to_vmem [thread:$0]  %s1237_s3, 1024, %s55_s16, [#allocation9], %s915_s11, %s915_s11, %s916_s12  }
  0x26   :  { %s748_s30 = scalar_lea.hbm %s1239_s5, 16 }
  0x27   :  { %p749_p2 = scmp.ne.s32.totalorder %s1239_s5, %s748_s30  ;;  %p752_p3 = scmp.lt.u32.totalorder %s748_s30, %s1239_s5 }
  0x29   :  { %p754_p4 = pnand %p752_p3, %p749_p2 }
  0x2b   :  { %757 = shalt.err (!%p754_p4)
}
  0x2c   :  { %s758_s14 = scalar_lea.vmem %s80_s18, 16  ;;  %s762_s15 = scalar_lea.vmem %s80_s18, 32 }
  0x2d   :  { %p759_p5 = scmp.ne.s32.totalorder %s80_s18, %s758_s14  ;;  %p763_p6 = scmp.lt.s32.totalorder %s80_s18, %s80_s18 }
  0x2e   :  { %p764_p7 = scmp.lt.s32.totalorder %s762_s15, %s758_s14 }
  0x30   :  { %p765_p8 = por %p764_p7, %p763_p6 }
  0x32   :  { %p766_p9 = pnand %p765_p8, %p759_p5 }
  0x34   :  { %769 = shalt.err (!%p766_p9)
}
  0x35   :  { %82 = dma.hbm_to_vmem [thread:$0]  %s1239_s5, 16, %s80_s18, [#allocation12]  }
  0x36   :  { %s919_s17 = smov [#allocation2]   ;;  %s920_s20 = smov [#allocation7]  }
  0x37   :  { %s23_s19 = sshll.u32 %s919_s17, 4  ;;  %s45_s21 = sshll.u32 %s920_s20, 4  ;;  %s24_s19 = int_to_ptr.vmem [resolvable:$true] %s23_s19  ;;  %s46_s21 = int_to_ptr.vmem [resolvable:$true] %s45_s21 }
  0x38   :  { %s770_s24 = scalar_lea.hbm %s1234_s0, 128 }
  0x39   :  { %p771_p10 = scmp.ne.s32.totalorder %s1234_s0, %s770_s24  ;;  %p774_p11 = scmp.lt.u32.totalorder %s770_s24, %s1234_s0 }
  0x3b   :  { %p776_p12 = pnand %p774_p11, %p771_p10 }
  0x3d   :  { %779 = shalt.err (!%p776_p12)
}
  0x3e   :  { %s780_s5 = scalar_lea.vmem %s24_s19, 128  ;;  %p785_p0 = scmp.lt.s32.totalorder %s24_s19, %s24_s19 }
  0x3f   :  { %p781_p13 = scmp.ne.s32.totalorder %s24_s19, %s780_s5  ;;  %p786_p1 = scmp.lt.s32.totalorder %s780_s5, %s780_s5 }
  0x41   :  { %p787_p2 = por %p786_p1, %p785_p0 }
  0x43   :  { %p788_p3 = pnand %p787_p2, %p781_p13 }
  0x45   :  { %791 = shalt.err (!%p788_p3)
}
  0x46   :  { %26 = dma.hbm_to_vmem [thread:$0]  %s1234_s0, 128, %s24_s19, [#allocation3]  }
  0x47   :  { %s792_s8 = scalar_lea.hbm %s1236_s2, 16 }
  0x48   :  { %p793_p4 = scmp.ne.s32.totalorder %s1236_s2, %s792_s8  ;;  %p796_p5 = scmp.lt.u32.totalorder %s792_s8, %s1236_s2 }
  0x4a   :  { %p798_p6 = pnand %p796_p5, %p793_p4 }
  0x4c   :  { %801 = shalt.err (!%p798_p6)
}
  0x4d   :  { %s802_s15 = scalar_lea.vmem %s46_s21, 16  ;;  %s806_s3 = scalar_lea.vmem %s46_s21, 32 }
  0x4e   :  { %p803_p7 = scmp.ne.s32.totalorder %s46_s21, %s802_s15  ;;  %p807_p8 = scmp.lt.s32.totalorder %s46_s21, %s46_s21 }
  0x4f   :  { %p808_p9 = scmp.lt.s32.totalorder %s806_s3, %s802_s15 }
  0x51   :  { %p809_p10 = por %p808_p9, %p807_p8 }
  0x53   :  { %p810_p11 = pnand %p809_p10, %p803_p7 }
  0x55   :  { %813 = shalt.err (!%p810_p11)
}
  0x56   :  { %48 = dma.hbm_to_vmem [thread:$0]  %s1236_s2, 16, %s46_s21, [#allocation6]  }
  0x57   :  { %s921_s17 = smov [#allocation10]   ;;  %s922_s20 = smov [#allocation13]  }
  0x58   :  { %s66_s19 = sshll.u32 %s921_s17, 4  ;;  %s89_s22 = sshll.u32 %s922_s20, 4  ;;  %s67_s19 = int_to_ptr.vmem [resolvable:$true] %s66_s19  ;;  %s90_s22 = int_to_ptr.vmem [resolvable:$true] %s89_s22 }
  0x59   :  { %s814_s26 = scalar_lea.hbm %s1238_s4, 256 }
  0x5a   :  { %p815_p12 = scmp.ne.s32.totalorder %s1238_s4, %s814_s26  ;;  %p818_p13 = scmp.lt.u32.totalorder %s814_s26, %s1238_s4 }
  0x5c   :  { %p820_p0 = pnand %p818_p13, %p815_p12 }
  0x5e   :  { %823 = shalt.err (!%p820_p0)
}
  0x5f   :  { %s824_s2 = scalar_lea.vmem %s67_s19, 256  ;;  %p829_p2 = scmp.lt.s32.totalorder %s67_s19, %s67_s19 }
  0x60   :  { %p825_p1 = scmp.ne.s32.totalorder %s67_s19, %s824_s2  ;;  %p830_p3 = scmp.lt.s32.totalorder %s824_s2, %s824_s2 }
  0x62   :  { %p831_p4 = por %p830_p3, %p829_p2 }
  0x64   :  { %p832_p5 = pnand %p831_p4, %p825_p1 }
  0x66   :  { %835 = shalt.err (!%p832_p5)
}
  0x67   :  { %72 = dma.hbm_to_vmem [thread:$0]  %s1238_s4, 256, %s67_s19, [#allocation9], %s915_s11, %s915_s11, %s916_s12  }
  0x68   :  { %s836_s30 = scalar_lea.hbm %s1240_s6, 128 }
  0x69   :  { %p837_p6 = scmp.ne.s32.totalorder %s1240_s6, %s836_s30  ;;  %p840_p7 = scmp.lt.u32.totalorder %s836_s30, %s1240_s6 }
  0x6b   :  { %p842_p8 = pnand %p840_p7, %p837_p6 }
  0x6d   :  { %845 = shalt.err (!%p842_p8)
}
  0x6e   :  { %s846_s14 = scalar_lea.vmem %s90_s22, 128  ;;  %p851_p10 = scmp.lt.s32.totalorder %s90_s22, %s90_s22 }
  0x6f   :  { %p847_p9 = scmp.ne.s32.totalorder %s90_s22, %s846_s14  ;;  %p852_p11 = scmp.lt.s32.totalorder %s846_s14, %s846_s14 }
  0x71   :  { %p853_p12 = por %p852_p11, %p851_p10 }
  0x73   :  { %p854_p13 = pnand %p853_p12, %p847_p9 }
  0x75   :  { %857 = shalt.err (!%p854_p13)
}
  0x76   :  { %92 = dma.hbm_to_vmem [thread:$0]  %s1240_s6, 128, %s90_s22, [#allocation12]  }
  0x77   :  { %892 = dma.done.wait [#allocation3], 128  }
  0x78   :  { %893 = vsyncadd [#allocation3], 4294967168 }
  0x79   :  { %894 = dma.done.wait [#allocation6], 272  }
  0x7a   :  { %895 = vsyncadd [#allocation6], 4294967024 }
  0x7b   :  { %896 = dma.done.wait [#allocation9], 1280  }
  0x7c   :  { %897 = vsyncadd [#allocation9], 4294966016 }
  0x7d   :  { %898 = dma.done.wait [#allocation12], 144  }
  0x7e   :  { %899 = vsyncadd [#allocation12], 4294967152  ;;  %v142_v0 = vlaneseq  ;;  %v923_v2 = vmov 0.0   ;;  %v1068_v4 = vld [vmem:[#allocation2] sm:$0xff]  ;;  %v1070_v5 = vld [vmem:[#allocation5] sm:$0xf] }
  0x7f   :  { %v1072_v6 = vld [vmem:[#allocation5 + $0x4] sm:$0xf]  ;;  %v1074_v7 = vld [vmem:[#allocation5 + $0x8] sm:$0xf]  ;;  %v1076_v8 = vld [vmem:[#allocation5 + $0xc] sm:$0xf] }
  0x80   :  { %v1065_v1 = vand.u32 127, %v142_v0  ;;  %v1078_v9 = vld [vmem:[#allocation7] ss:$0 sm:$0xff]  ;;  %v1080_v10 = vld [vmem:[#allocation8] sm:$0xf]  ;;  %v147_v31 = vld [vmem:[#allocation13] sm:$0xff]  }
  0x81   :  { %v1082_v11 = vld [vmem:[#allocation8 + $0x4] sm:$0xf]  ;;  %v1084_v12 = vld [vmem:[#allocation8 + $0x8] sm:$0xf]  ;;  %v1086_v13 = vld [vmem:[#allocation8 + $0xc] sm:$0xf] }
  0x82   :  { %vm144_vm0 = vcmp.eq.s32.totalorder %v1065_v1, 3  ;;  %v1088_v14 = vld [vmem:[#allocation8 + $0x10] sm:$0xf]  ;;  %v1090_v15 = vld [vmem:[#allocation8 + $0x14] sm:$0xf]  ;;  %s1126_s6 = smov 0  }
  0x83   :  { %v553_v3 = vsel %vm144_vm0, 1.0, %v923_v2   ;;  %v1092_v16 = vld [vmem:[#allocation8 + $0x18] sm:$0xf]  ;;  %v1094_v17 = vld [vmem:[#allocation8 + $0x1c] sm:$0xf] }
  0x84   :  { %v1096_v18 = vld [vmem:[#allocation8 + $0x20] sm:$0xf]  ;;  %v1098_v19 = vld [vmem:[#allocation8 + $0x24] sm:$0xf]  ;;  %v1100_v20 = vld [vmem:[#allocation8 + $0x28] sm:$0xf] }
  0x85   :  { %v1102_v21 = vld [vmem:[#allocation8 + $0x2c] sm:$0xf]  ;;  %v1104_v22 = vld [vmem:[#allocation8 + $0x30] sm:$0xf]  ;;  %v1106_v23 = vld [vmem:[#allocation8 + $0x34] sm:$0xf] }
  0x86   :  { %v1108_v24 = vld [vmem:[#allocation8 + $0x38] sm:$0xf]  ;;  %v1110_v25 = vld [vmem:[#allocation8 + $0x3c] sm:$0xf]  ;;  %v1112_v26 = vld [vmem:[#allocation10] sm:$0xf] }
  0x87   :  { %v1114_v27 = vld [vmem:[#allocation10 + $0x4] sm:$0xf]  ;;  %v1116_v28 = vld [vmem:[#allocation10 + $0x8] sm:$0xf]  ;;  %v1118_v29 = vld [vmem:[#allocation10 + $0xc] sm:$0xf] }
  0x88   :  { %v1120_v30 = vld [vmem:[#allocation11] ss:$0 sm:$0xff] }
  0x89 LB: > { %v554_v32 = vcombine.low %v1080_v10, %v1082_v11  ;;  %v562_v33 = vcombine.low %v1070_v5, %v1072_v6  ;;  %v924_v34 = vmov 0.0   ;;  %v555_v35 = vcombine.low %v1084_v12, %v1086_v13  ;;  %s926_s12 = smov 64   ;;  %s927_s15 = smov 32   ;;  %s912_s6 = sphi %s1126_s6, %s153_s6   ;;  %v908_v31 = vphi %v147_v31, %v422_v31   ;;  %v904_v3 = vphi %v553_v3, %v572_v3  }
  0x8a   : > { %588 = vmatprep.subr.bf16.mxu0 %v924_v34  ;;  %608 = vmatprep.subr.bf16.mxu1 %v924_v34  ;;  %v563_v36 = vcombine.low %v1074_v7, %v1076_v8  ;;  %vm925_vm1 = vmmov 0   ;;  %v246_v37 = vpack.c.bf16 %v908_v31, %v908_v31  ;;  %vm259_vm2 = vcmask 261120   ;;  %s928_s3 = smov 96   ;;  %s571_s0 = sshll.u32 %s912_s6, 3 }
  0x8b   : > { %589 = vmatpush3.bf16.msra.mxu0 %v554_v32  ;;  %609 = vmatpush3.bf16.msra.mxu1 %v562_v33  ;;  %v556_v38 = vcombine.low %v1088_v14, %v1090_v15  ;;  %v557_v39 = vcombine.low %v1092_v16, %v1094_v17  ;;  %v558_v40 = vcombine.low %v1096_v18, %v1098_v19  ;;  %s408_s16 = scalar_lea.vmem [#allocation14], %s571_s0  ;;  %s153_s6 = sadd.s32 1, %s912_s6  }
  0x8c   : > { %590 = vmatprep.subr.bf16.mxu0 %v924_v34  ;;  %610 = vmatprep.subr.bf16.mxu1 %v924_v34  ;;  %v559_v41 = vcombine.low %v1100_v20, %v1102_v21  ;;  %v560_v42 = vcombine.low %v1104_v22, %v1106_v23  ;;  %v561_v43 = vcombine.low %v1108_v24, %v1110_v25  ;;  %p150_p0 = scmp.ge.s32.totalorder %s153_s6, 8  }
  0x8d   : > { %612 = vmatprep.mubr.msk.bf16.mxu1 %vm925_vm1, %v924_v34  ;;  %604 = vmatprep.mubr.msk.bf16.mxu0 %vm925_vm1, %v924_v34  ;;  %v156_v44 = vpack.c.bf16 %v904_v3, %v904_v3  ;;  %v568_v2 = vcombine.low %v1112_v26, %v1114_v27  ;;  %v569_v3 = vcombine.low %v1116_v28, %v1118_v29  ;;  %s929_s17 = smov (%p150_p0), [#allocation14]  }
  0x8e   : > { %315 = vrot.lane.b32.xlu0 %v1078_v9, %s926_s12  ;;  %s525_s19 = sshll.u32 (%p150_p0), %s929_s17, 4  ;;  %s526_s19 = int_to_ptr.vmem [resolvable:$true] %s525_s19 }
  0x8f   : > { %591 = vmatpush3.bf16.msra.mxu0 %v555_v35  ;;  %611 = vmatpush3.bf16.msra.mxu1 %v563_v36  ;;  %s858_s20 = scalar_lea.vmem (%p150_p0), %s526_s19, 1024  ;;  %p863_p2 = scmp.lt.s32.totalorder (%p150_p0), %s526_s19, %s526_s19 }
  0x90   : > { %592 = vmatprep.subr.bf16.mxu0 %v924_v34  ;;  %616 = vmatprep.subr.bf16.mxu1 %v924_v34  ;;  %p859_p1 = scmp.ne.s32.totalorder (%p150_p0), %s526_s19, %s858_s20  ;;  %p864_p3 = scmp.lt.s32.totalorder (%p150_p0), %s858_s20, %s858_s20 }
  0x92   : > { %613 = vmatmul.mubr.msk.bf16.vlgmr.msra.gmra.mrb[0].mxu1 %vm259_vm2, %v246_v37  ;;  %p865_p4 = por (%p150_p0), %p864_p3, %p863_p2 }
  0x93   : > { %593 = vmatpush3.bf16.msra.mxu0 %v556_v38  ;;  %620 = vmatprep.mubr.msk.bf16.mxu1 %vm925_vm1, %v924_v34 }
  0x94   : > { %594 = vmatprep.subr.bf16.mxu0 %v924_v34  ;;  %617 = vmatpush3.bf16.msra.mxu1 %v568_v2  ;;  %p866_p5 = pnand (%p150_p0), %p865_p4, %p859_p1 }
  0x95   : > { %618 = vmatprep.subr.bf16.mxu1 %v924_v34 }
  0x97   : > { %595 = vmatpush3.bf16.msra.mxu0 %v557_v39 }
  0x98   : > { %596 = vmatprep.subr.bf16.mxu0 %v924_v34  ;;  %619 = vmatpush3.bf16.msra.mxu1 %v569_v3 }
  0x9b   : > { %597 = vmatpush3.bf16.msra.mxu0 %v558_v40 }
  0x9c   : > { %598 = vmatprep.subr.bf16.mxu0 %v924_v34 }
  0x9f   : > { %599 = vmatpush3.bf16.msra.mxu0 %v559_v41 }
  0xa0   : > { %600 = vmatprep.subr.bf16.mxu0 %v924_v34 }
  0xa3   : > { %601 = vmatpush3.bf16.msra.mxu0 %v560_v42 }
  0xa4   : > { %602 = vmatprep.subr.bf16.mxu0 %v924_v34 }
  0xa7   : > { %603 = vmatpush3.bf16.msra.mxu0 %v561_v43 }
  0xaa   : > { %605 = vmatmul.mubr.bf16.vlgmr.msra.gmra.mrb[0].mxu0 %v156_v44 }
 0x100   : > { %v316_v45 = vpop.permute.xlu0 %315 }
 0x165   : > { %v297_v46 = vpop.f32.mrb[0].mxu1 }
 0x166   : > { %v318_v47 = vadd.f32 %v316_v45, %v297_v46  ;;  %v614_v48 = vpop.f32.mrb[1].mxu1 }
 0x167   : > { %v300_v49 = vpop.f32.mrb[2].mxu1 }
 0x168   : > { %320 = vrot.lane.b32.xlu0 %v318_v47, %s926_s12  ;;  %v615_v50 = vpop.f32.mrb[3].mxu1 }
 0x16c   : > { %337 = vrot.lane.b32.xlu0 %v908_v31, %s927_s15 }
 0x17d   : > { %v239_v51 = vpop.f32.mrb[0].mxu0 }
 0x17e   : > { %v606_v52 = vpop.f32.mrb[1].mxu0  ;;  %v245_v55 = vadd.f32 %v239_v51, %v1068_v4 }
 0x17f   : > { %v242_v53 = vpop.f32.mrb[2].mxu0 }
 0x180   : > { %v607_v54 = vpop.f32.mrb[3].mxu0  ;;  %v303_v56 = vadd.f32 %v297_v46, %v245_v55  ;;  %v412_v46 = vcvt.s32.f32 %v1065_v1 }
 0x182   : > { %v565_v57 = vmul.f32 -1.442695, %v303_v56 }
 0x184   : > { %666 = vpow2.f32 %v565_v57 }
 0x18e   : > { %v667_v58 = vpop.eup %666 }
 0x18f   : > { %v307_v59 = vadd.f32 1.0, %v667_v58 }
 0x191   : > { %668 = vrcp.f32 %v307_v59 }
 0x19b   : > { %v669_v60 = vpop.eup %668 }
 0x19c   : > { %v330_v33 = vsub.f32 1.0, %v669_v60 }
 0x1da   : > { %v321_v61 = vpop.permute.xlu0 %320 }
 0x1db   : > { %v323_v62 = vmul.f32 %v669_v60, %v321_v61 }
 0x1dd   : > { %325 = vrot.lane.b32.xlu1 %v323_v62, %s926_s12 }
 0x1de   : > { %v338_v32 = vpop.permute.xlu0 %337 }
 0x1df   : > { %v340_v36 = vmul.f32 %v669_v60, %v338_v32 }
 0x24f   : > { %v326_v63 = vpop.permute.xlu1 %325 }
 0x250   : > { %v328_v0 = vadd.f32 %v326_v63, %v245_v55 }
 0x252   : > { %670 = vtanh.f32 %v328_v0 }
 0x25c   : > { %v671_v31 = vpop.eup %670 }
 0x25d   : > { %332 = vrot.lane.b32.xlu1 %v671_v31, %s928_s3 }
 0x2cf   : > { %v333_v35 = vpop.permute.xlu1 %332 }
 0x2d0   : > { %v335_v37 = vmul.f32 %v333_v35, %v330_v33 }
 0x2d2   : > { %v341_v38 = vadd.f32 %v340_v36, %v335_v37 }
 0x2d4   : > { %v342_v39 = vpack.c.bf16 %v341_v38, %v341_v38 }
 0x2d6   : > { %350 = vrot.lane.b32.xlu1 %v342_v39, %s928_s3 }
 0x348   : > { %v351_v40 = vpop.permute.xlu1 %350 }
 0x349   : > { %621 = vmatmul.mubr.msk.bf16.vlgmr.msra.gmra.mrb[4].mxu1 %vm259_vm2, %v351_v40 }
 0x41c   : > { %v401_v41 = vpop.f32.mrb[4].mxu1 }
 0x41d   : > { %v402_v42 = vadd.f32 %v1120_v30, %v401_v41  ;;  %v622_v43 = vpop.f32.mrb[5].mxu1 }
 0x41e   : > { %v404_v44 = vpop.f32.mrb[6].mxu1 }
 0x41f   : > { %409 = vst [vmem:[%s408_s16] sm:$0xff] %v402_v42  ;;  %410 = vmax.xlane.f32.xlu0 %v402_v42  ;;  %v623_v45 = vpop.f32.mrb[7].mxu1 }
 0x426   :  { %v424_v50 = vld [vmem:[#allocation14] sm:$0xff] (%p150_p0)  ;;  %v426_v51 = vld [vmem:[#allocation14 + $0x10] sm:$0xff] (%p150_p0)  ;;  %v425_v52 = vld [vmem:[#allocation14 + $0x8] sm:$0xff] (%p150_p0) }
 0x427   :  { %v427_v53 = vld [vmem:[#allocation14 + $0x18] sm:$0xff] (%p150_p0)  ;;  %v428_v54 = vld [vmem:[#allocation14 + $0x20] sm:$0xff] (%p150_p0)  ;;  %v430_v55 = vld [vmem:[#allocation14 + $0x30] sm:$0xff] (%p150_p0) }
 0x428   :  { %v431_v56 = vld [vmem:[#allocation14 + $0x38] sm:$0xff] (%p150_p0) }
 0x435   : > { %421 = vrot.lane.b32.xlu0 %v341_v38, %s928_s3 }
 0x454   :  { %432 = vmax.xlane.f32.xlu0 (%p150_p0), %v424_v50 }
 0x458   :  { %434 = vmax.xlane.f32.xlu0 (%p150_p0), %v425_v52 }
 0x45c   :  { %440 = vmax.xlane.f32.xlu0 (%p150_p0), %v428_v54 }
 0x460   :  { %444 = vmax.xlane.f32.xlu0 (%p150_p0), %v430_v55 }
 0x4ac   : > { %v411_v47 = vpop.xlane.xlu0 %410 }
 0x4ad   : > { %vm413_vm3 = vcmp.eq.f32.partialorder %v402_v42, %v411_v47 }
 0x4ae   : > { %v414_v48 = vsel %vm413_vm3, %v412_v46, 128.0 }
 0x4af   : > { %415 = vmin.xlane.f32.xlu1 %v414_v48 }
 0x4b0   : > { %v422_v31 = vpop.permute.xlu0 %421  }
 0x4b3   :  { %436 = vmax.xlane.f32.xlu1 (%p150_p0), %v426_v51 }
 0x4b7   :  { %438 = vmax.xlane.f32.xlu1 (%p150_p0), %v427_v53 }
 0x4e1   :  { %v433_v57 = vpop.xlane.xlu0 (%p150_p0), %432 }
 0x4e2   :  { %v1190_v59 = vsub.f32 (%p150_p0), %v424_v50, %v433_v57 }
 0x4e4   :  { %v456_v4 = vmul.f32 (%p150_p0), 1.442695, %v1190_v59 }
 0x4e5   :  { %v435_v6 = vpop.xlane.xlu0 (%p150_p0), %434 }
 0x4e6   :  { %672 = vpow2.f32 (%p150_p0), %v456_v4  ;;  %v1196_v8 = vsub.f32 (%p150_p0), %v425_v52, %v435_v6 }
 0x4e8   :  { %v458_v10 = vmul.f32 (%p150_p0), 1.442695, %v1196_v8 }
 0x4e9   :  { %v441_v12 = vpop.xlane.xlu0 (%p150_p0), %440 }
 0x4ea   :  { %v1202_v14 = vsub.f32 (%p150_p0), %v428_v54, %v441_v12 }
 0x4ec   :  { %v464_v16 = vmul.f32 (%p150_p0), 1.442695, %v1202_v14 }
 0x4ed   :  { %v445_v18 = vpop.xlane.xlu0 (%p150_p0), %444 }
 0x4ee   :  { %v1208_v20 = vsub.f32 (%p150_p0), %v430_v55, %v445_v18 }
 0x4f0   :  { %v673_v22 = vpop.eup (%p150_p0), %672  ;;  %v468_v23 = vmul.f32 (%p150_p0), 1.442695, %v1208_v20 }
 0x4f1   :  { %472 = vadd.xlane.f32.xlu0 (%p150_p0), %v673_v22 }
 0x538   :  { %152 = sbr.rel (!%p150_p0) target bundleno = 137 (0x89), region = 84 }
 0x53c   : > { %v416_v49 = vpop.xlane.xlu1 %415 }
 0x53d   : > { %vm417_vm4 = vcmp.eq.f32.partialorder %v412_v46, %v416_v49 }
 0x53e   : > { %v572_v3 = vsel %vm417_vm4, 1.0, %v924_v34   ;;  %v429_v34 = vld [vmem:[#allocation14 + $0x28] sm:$0xff] (%p150_p0) }
 0x53f   :  { %442 = vmax.xlane.f32.xlu1 %v429_v34 }
 0x540   :  { %v437_v58 = vpop.xlane.xlu1 %436 }
 0x541   :  { %v1192_v1 = vsub.f32 %v426_v51, %v437_v58 }
 0x543   :  { %446 = vmax.xlane.f32.xlu1 %v431_v56  ;;  %v460_v5 = vmul.f32 1.442695, %v1192_v1 }
 0x544   :  { %v439_v7 = vpop.xlane.xlu1 %438 }
 0x545   :  { %v1198_v9 = vsub.f32 %v427_v53, %v439_v7  ;;  %674 = vpow2.f32 %v460_v5 }
 0x546   :  { %676 = vpow2.f32 %v458_v10 }
 0x547   :  { %v462_v11 = vmul.f32 1.442695, %v1198_v9 }
 0x549   :  { %678 = vpow2.f32 %v462_v11 }
 0x54a   :  { %680 = vpow2.f32 %v464_v16 }
 0x54f   :  { %v675_v25 = vpop.eup %674 }
 0x550   :  { %v677_v26 = vpop.eup %676  ;;  %476 = vadd.xlane.f32.xlu0 %v675_v25 }
 0x551   :  { %474 = vadd.xlane.f32.xlu1 %v677_v26 }
 0x553   :  { %v679_v27 = vpop.eup %678 }
 0x554   :  { %v681_v28 = vpop.eup %680 }
 0x555   :  { %478 = vadd.xlane.f32.xlu1 %v679_v27  ;;  %480 = vadd.xlane.f32.xlu0 %v681_v28 }
 0x57e   :  { %v473_v61 = vpop.xlane.xlu0 %472 }
 0x5cc   :  { %v443_v13 = vpop.xlane.xlu1 %442 }
 0x5cd   :  { %v1204_v15 = vsub.f32 %v429_v34, %v443_v13 }
 0x5cf   :  { %v466_v17 = vmul.f32 1.442695, %v1204_v15 }
 0x5d0   :  { %v447_v19 = vpop.xlane.xlu1 %446 }
 0x5d1   :  { %v1210_v21 = vsub.f32 %v431_v56, %v447_v19  ;;  %682 = vpow2.f32 %v466_v17 }
 0x5d2   :  { %684 = vpow2.f32 %v468_v23 }
 0x5d3   :  { %v470_v24 = vmul.f32 1.442695, %v1210_v21 }
 0x5d5   :  { %686 = vpow2.f32 %v470_v24 }
 0x5d6   :  { %688 = vlog2.f32 %v473_v61 }
 0x5db   :  { %v683_v29 = vpop.eup %682 }
 0x5dc   :  { %v685_v30 = vpop.eup %684  ;;  %482 = vadd.xlane.f32.xlu1 %v683_v29 }
 0x5dd   :  { %484 = vadd.xlane.f32.xlu0 %v685_v30  ;;  %v477_v63 = vpop.xlane.xlu0 %476 }
 0x5de   :  { %v475_v62 = vpop.xlane.xlu1 %474 }
 0x5df   :  { %v687_v60 = vpop.eup %686  ;;  %690 = vlog2.f32 %v475_v62 }
 0x5e0   :  { %486 = vadd.xlane.f32.xlu1 %v687_v60  ;;  %692 = vlog2.f32 %v477_v63  ;;  %v689_v3 = vpop.eup %688 }
 0x5e1   :  { %v489_v31 = vmul.f32 0.6931472, %v689_v3 }
 0x5e2   :  { %v479_v0 = vpop.xlane.xlu1 %478  ;;  %v481_v2 = vpop.xlane.xlu0 %480 }
 0x5e3   :  { %694 = vlog2.f32 %v479_v0  ;;  %v504_v35 = vsub.f32 %v1190_v59, %v489_v31 }
 0x5e4   :  { %696 = vlog2.f32 %v481_v2 }
 0x5e5   :  { %512 = vst [vmem:[#allocation14] sm:$0xff] %v504_v35 }
 0x5e9   :  { %v691_v36 = vpop.eup %690 }
 0x5ea   :  { %v693_v37 = vpop.eup %692  ;;  %v491_v38 = vmul.f32 0.6931472, %v691_v36 }
 0x5eb   :  { %v493_v40 = vmul.f32 0.6931472, %v693_v37 }
 0x5ec   :  { %v505_v41 = vsub.f32 %v1196_v8, %v491_v38 }
 0x5ed   :  { %v695_v42 = vpop.eup %694  ;;  %v506_v43 = vsub.f32 %v1192_v1, %v493_v40 }
 0x5ee   :  { %v697_v44 = vpop.eup %696  ;;  %513 = vst [vmem:[#allocation14 + $0x8] sm:$0xff] %v505_v41  ;;  %v495_v45 = vmul.f32 0.6931472, %v695_v42 }
 0x5ef   :  { %514 = vst [vmem:[#allocation14 + $0x10] sm:$0xff] %v506_v43  ;;  %v497_v46 = vmul.f32 0.6931472, %v697_v44 }
 0x5f0   :  { %v507_v47 = vsub.f32 %v1198_v9, %v495_v45 }
 0x5f1   :  { %v508_v49 = vsub.f32 %v1202_v14, %v497_v46 }
 0x5f2   :  { %515 = vst [vmem:[#allocation14 + $0x18] sm:$0xff] %v507_v47 }
 0x5f3   :  { %516 = vst [vmem:[#allocation14 + $0x20] sm:$0xff] %v508_v49 }
 0x669   :  { %v483_v32 = vpop.xlane.xlu1 %482 }
 0x66a   :  { %v485_v33 = vpop.xlane.xlu0 %484  ;;  %698 = vlog2.f32 %v483_v32 }
 0x66b   :  { %700 = vlog2.f32 %v485_v33 }
 0x66d   :  { %v487_v39 = vpop.xlane.xlu1 %486 }
 0x66e   :  { %702 = vlog2.f32 %v487_v39 }
 0x674   :  { %v699_v48 = vpop.eup %698 }
 0x675   :  { %v701_v50 = vpop.eup %700  ;;  %v499_v51 = vmul.f32 0.6931472, %v699_v48 }
 0x676   :  { %v501_v52 = vmul.f32 0.6931472, %v701_v50 }
 0x677   :  { %v509_v53 = vsub.f32 %v1204_v15, %v499_v51 }
 0x678   :  { %v703_v54 = vpop.eup %702  ;;  %v510_v34 = vsub.f32 %v1208_v20, %v501_v52 }
 0x679   :  { %517 = vst [vmem:[#allocation14 + $0x28] sm:$0xff] %v509_v53  ;;  %v503_v55 = vmul.f32 0.6931472, %v703_v54 }
 0x67a   :  { %518 = vst [vmem:[#allocation14 + $0x30] sm:$0xff] %v510_v34 }
 0x67b   :  { %v511_v56 = vsub.f32 %v1210_v21, %v503_v55 }
 0x67d   :  { %519 = vst [vmem:[#allocation14 + $0x38] sm:$0xff] %v511_v56 }
 0x67e   :  { %869 = shalt.err (!%p866_p5)
}
 0x67f   :  { %s870_s24 = scalar_lea.hbm %s1241_s7, 1024 }
 0x680   :  { %p871_p6 = scmp.ne.s32.totalorder %s1241_s7, %s870_s24  ;;  %p874_p7 = scmp.lt.u32.totalorder %s870_s24, %s1241_s7 }
 0x682   :  { %p876_p8 = pnand %p874_p7, %p871_p6 }
 0x684   :  { %879 = shalt.err (!%p876_p8)
}
 0x685   :  { %s930_s5 = smov 128   ;;  %s931_s2 = smov 8  }
 0x686   :  { %531 = dma.vmem_to_hbm [thread:$0]  %s526_s19, 1024, %s1241_s7, [#allocation4], %s930_s5, %s930_s5, %s931_s2  }
 0x687   :  { %900 = dma.done.wait [#allocation4], 1024  }
 0x688   :  { %901 = vsyncadd [#allocation4], 4294966272 }
 0x689   :  { %535 = vsyncpa [#allocation3], 1 }
 0x68a   :  { %536 = vsyncpa [#allocation6], 1 }
 0x68b   :  { %537 = vsyncpa [#allocation9], 1 }
 0x68c   :  { %538 = vsyncpa [#allocation12], 1 }
 0x68d   :  { %539 = vsyncpa [#allocation4], 1 }

// kernel: ec2vae_forward.19
= control target key start
LH: loop header
LB: loop body
LE: loop exit
PB: predicated region body
PF: predicated region fallthrough
CT: control target
= control target key end

     0   :  { %16 = vsyncpa [#allocation3], 0  ;;  %s1796_s0 = inlined_call_operand.hbm [shape: f32[8,8,96], index: 0, kind: input, shape index: {}]   ;;  %s1797_s1 = inlined_call_operand.hbm [shape: bf16[32,96], index: 1, kind: input, shape index: {}]   ;;  %s1798_s2 = inlined_call_operand.hbm [shape: f32[1,32], index: 2, kind: input, shape index: {}]   ;;  %s1799_s3 = inlined_call_operand.hbm [shape: bf16[128,96], index: 3, kind: input, shape index: {}]   ;;  %s1800_s4 = inlined_call_operand.hbm [shape: bf16[32,96], index: 4, kind: input, shape index: {}]   ;;  %s1801_s5 = inlined_call_operand.hbm [shape: f32[1,96], index: 5, kind: input, shape index: {}]   ;;  %s1802_s6 = inlined_call_operand.hbm [shape: bf16[32,96], index: 6, kind: input, shape index: {}]   ;;  %s1803_s7 = inlined_call_operand.hbm [shape: f32[1,32], index: 7, kind: input, shape index: {}]   ;;  %s1804_s8 = inlined_call_operand.hbm [shape: bf16[32,128], index: 8, kind: input, shape index: {}]   ;;  %s1805_s9 = inlined_call_operand.hbm [shape: f32[1,128], index: 9, kind: input, shape index: {}]   ;;  %s1806_s10 = inlined_call_operand.hbm [shape: f32[8,32], index: 10, kind: input, shape index: {}]   ;;  %s1807_s11 = inlined_call_operand.hbm [shape: f32[8,8,128], index: 11, kind: output, shape index: {}]  }
   0x1   :  { %17 = vsyncpa [#allocation6], 0 }
   0x2   :  { %18 = vsyncpa [#allocation9], 0 }
   0x3   :  { %19 = vsyncpa [#allocation12], 0 }
   0x4   :  { %20 = vsyncpa [#allocation15], 0 }
   0x5   :  { %21 = vsyncpa [#allocation18], 0 }
   0x6   :  { %22 = vsyncpa [#allocation4], 0  ;;  %s1310_s17 = smov [#allocation5]   ;;  %s1000_s21 = scalar_lea.hbm %s1797_s1, 256 }
   0x7   :  { %s40_s18 = sshll.u32 %s1310_s17, 4  ;;  %p1001_p0 = scmp.ne.s32.totalorder %s1797_s1, %s1000_s21  ;;  %s41_s18 = int_to_ptr.vmem [resolvable:$true] %s40_s18 }
   0x8   :  { %p1004_p1 = scmp.lt.u32.totalorder %s1000_s21, %s1797_s1 }
   0xa   :  { %p1006_p2 = pnand %p1004_p1, %p1001_p0 }
   0xc   :  { %1009 = shalt.err (!%p1006_p2)
}
   0xd   :  { %s1010_s26 = scalar_lea.vmem %s41_s18, 256  ;;  %p1015_p4 = scmp.lt.s32.totalorder %s41_s18, %s41_s18 }
   0xe   :  { %p1011_p3 = scmp.ne.s32.totalorder %s41_s18, %s1010_s26  ;;  %p1016_p5 = scmp.lt.s32.totalorder %s1010_s26, %s1010_s26 }
  0x10   :  { %p1017_p6 = por %p1016_p5, %p1015_p4 }
  0x12   :  { %p1018_p7 = pnand %p1017_p6, %p1011_p3 }
  0x14   :  { %1021 = shalt.err (!%p1018_p7)
}
  0x15   :  { %s1311_s27 = smov 64   ;;  %s1312_s28 = smov 4  }
  0x16   :  { %46 = dma.hbm_to_vmem [thread:$0]  %s1797_s1, 256, %s41_s18, [#allocation6], %s1311_s27, %s1311_s27, %s1312_s28  }
  0x17   :  { %s1313_s12 = smov [#allocation8]   ;;  %s1314_s14 = smov [#allocation11]  }
  0x18   :  { %s62_s13 = sshll.u32 %s1313_s12, 4  ;;  %s87_s15 = sshll.u32 %s1314_s14, 4  ;;  %s63_s13 = int_to_ptr.vmem [resolvable:$true] %s62_s13  ;;  %s88_s15 = int_to_ptr.vmem [resolvable:$true] %s87_s15 }
  0x19   :  { %s1022_s19 = scalar_lea.hbm %s1799_s3, 1024 }
  0x1a   :  { %p1023_p8 = scmp.ne.s32.totalorder %s1799_s3, %s1022_s19  ;;  %p1026_p9 = scmp.lt.u32.totalorder %s1022_s19, %s1799_s3 }
  0x1c   :  { %p1028_p10 = pnand %p1026_p9, %p1023_p8 }
  0x1e   :  { %1031 = shalt.err (!%p1028_p10)
}
  0x1f   :  { %s1032_s1 = scalar_lea.vmem %s63_s13, 1024  ;;  %p1037_p12 = scmp.lt.s32.totalorder %s63_s13, %s63_s13 }
  0x20   :  { %p1033_p11 = scmp.ne.s32.totalorder %s63_s13, %s1032_s1  ;;  %p1038_p13 = scmp.lt.s32.totalorder %s1032_s1, %s1032_s1 }
  0x22   :  { %p1039_p0 = por %p1038_p13, %p1037_p12 }
  0x24   :  { %p1040_p1 = pnand %p1039_p0, %p1033_p11 }
  0x26   :  { %1043 = shalt.err (!%p1040_p1)
}
  0x27   :  { %68 = dma.hbm_to_vmem [thread:$0]  %s1799_s3, 1024, %s63_s13, [#allocation9], %s1311_s27, %s1311_s27, %s1312_s28  }
  0x28   :  { %s1044_s29 = scalar_lea.hbm %s1801_s5, 16 }
  0x29   :  { %p1045_p2 = scmp.ne.s32.totalorder %s1801_s5, %s1044_s29  ;;  %p1048_p3 = scmp.lt.u32.totalorder %s1044_s29, %s1801_s5 }
  0x2b   :  { %p1050_p4 = pnand %p1048_p3, %p1045_p2 }
  0x2d   :  { %1053 = shalt.err (!%p1050_p4)
}
  0x2e   :  { %s1054_s17 = scalar_lea.vmem %s88_s15, 16  ;;  %s1058_s19 = scalar_lea.vmem %s88_s15, 32 }
  0x2f   :  { %p1055_p5 = scmp.ne.s32.totalorder %s88_s15, %s1054_s17  ;;  %p1059_p6 = scmp.lt.s32.totalorder %s88_s15, %s88_s15 }
  0x30   :  { %p1060_p7 = scmp.lt.s32.totalorder %s1058_s19, %s1054_s17 }
  0x32   :  { %p1061_p8 = por %p1060_p7, %p1059_p6 }
  0x34   :  { %p1062_p9 = pnand %p1061_p8, %p1055_p5 }
  0x36   :  { %1065 = shalt.err (!%p1062_p9)
}
  0x37   :  { %90 = dma.hbm_to_vmem [thread:$0]  %s1801_s5, 16, %s88_s15, [#allocation12]  }
  0x38   :  { %s1315_s20 = smov [#allocation14]   ;;  %s1316_s22 = smov [#allocation17]  }
  0x39   :  { %s109_s21 = sshll.u32 %s1315_s20, 4  ;;  %s131_s23 = sshll.u32 %s1316_s22, 4  ;;  %s110_s21 = int_to_ptr.vmem [resolvable:$true] %s109_s21  ;;  %s132_s23 = int_to_ptr.vmem [resolvable:$true] %s131_s23 }
  0x3a   :  { %s1066_s24 = scalar_lea.hbm %s1803_s7, 16 }
  0x3b   :  { %p1067_p10 = scmp.ne.s32.totalorder %s1803_s7, %s1066_s24  ;;  %p1070_p11 = scmp.lt.u32.totalorder %s1066_s24, %s1803_s7 }
  0x3d   :  { %p1072_p12 = pnand %p1070_p11, %p1067_p10 }
  0x3f   :  { %1075 = shalt.err (!%p1072_p12)
}
  0x40   :  { %s1076_s5 = scalar_lea.vmem %s110_s21, 16  ;;  %s1080_s15 = scalar_lea.vmem %s110_s21, 32 }
  0x41   :  { %p1077_p13 = scmp.ne.s32.totalorder %s110_s21, %s1076_s5  ;;  %p1081_p0 = scmp.lt.s32.totalorder %s110_s21, %s110_s21 }
  0x42   :  { %p1082_p1 = scmp.lt.s32.totalorder %s1080_s15, %s1076_s5 }
  0x44   :  { %p1083_p2 = por %p1082_p1, %p1081_p0 }
  0x46   :  { %p1084_p3 = pnand %p1083_p2, %p1077_p13 }
  0x48   :  { %1087 = shalt.err (!%p1084_p3)
}
  0x49   :  { %112 = dma.hbm_to_vmem [thread:$0]  %s1803_s7, 16, %s110_s21, [#allocation15]  }
  0x4a   :  { %s1088_s19 = scalar_lea.hbm %s1805_s9, 16 }
  0x4b   :  { %p1089_p4 = scmp.ne.s32.totalorder %s1805_s9, %s1088_s19  ;;  %p1092_p5 = scmp.lt.u32.totalorder %s1088_s19, %s1805_s9 }
  0x4d   :  { %p1094_p6 = pnand %p1092_p5, %p1089_p4 }
  0x4f   :  { %1097 = shalt.err (!%p1094_p6)
}
  0x50   :  { %s1098_s1 = scalar_lea.vmem %s132_s23, 16  ;;  %s1102_s18 = scalar_lea.vmem %s132_s23, 32 }
  0x51   :  { %p1099_p7 = scmp.ne.s32.totalorder %s132_s23, %s1098_s1  ;;  %p1103_p8 = scmp.lt.s32.totalorder %s132_s23, %s132_s23 }
  0x52   :  { %p1104_p9 = scmp.lt.s32.totalorder %s1102_s18, %s1098_s1 }
  0x54   :  { %p1105_p10 = por %p1104_p9, %p1103_p8 }
  0x56   :  { %p1106_p11 = pnand %p1105_p10, %p1099_p7 }
  0x58   :  { %1109 = shalt.err (!%p1106_p11)
}
  0x59   :  { %134 = dma.hbm_to_vmem [thread:$0]  %s1805_s9, 16, %s132_s23, [#allocation18]  }
  0x5a   :  { %s1317_s24 = smov [#allocation2]   ;;  %s1110_s30 = scalar_lea.hbm %s1796_s0, 1024 }
  0x5b   :  { %s28_s25 = sshll.u32 %s1317_s24, 4  ;;  %p1111_p12 = scmp.ne.s32.totalorder %s1796_s0, %s1110_s30  ;;  %s29_s25 = int_to_ptr.vmem [resolvable:$true] %s28_s25 }
  0x5c   :  { %p1114_p13 = scmp.lt.u32.totalorder %s1110_s30, %s1796_s0 }
  0x5e   :  { %p1116_p0 = pnand %p1114_p13, %p1111_p12 }
  0x60   :  { %1119 = shalt.err (!%p1116_p0)
}
  0x61   :  { %s1120_s16 = scalar_lea.vmem %s29_s25, 1024  ;;  %p1125_p2 = scmp.lt.s32.totalorder %s29_s25, %s29_s25 }
  0x62   :  { %p1121_p1 = scmp.ne.s32.totalorder %s29_s25, %s1120_s16  ;;  %p1126_p3 = scmp.lt.s32.totalorder %s1120_s16, %s1120_s16 }
  0x64   :  { %p1127_p4 = por %p1126_p3, %p1125_p2 }
  0x66   :  { %p1128_p5 = pnand %p1127_p4, %p1121_p1 }
  0x68   :  { %1131 = shalt.err (!%p1128_p5)
}
  0x69   :  { %s1318_s9 = smov 128   ;;  %s1319_s23 = smov 8  }
  0x6a   :  { %34 = dma.hbm_to_vmem [thread:$0]  %s1796_s0, 1024, %s29_s25, [#allocation3], %s1318_s9, %s1318_s9, %s1319_s23  }
  0x6b   :  { %s1320_s3 = smov [#allocation7]   ;;  %s1321_s20 = smov [#allocation10]  }
  0x6c   :  { %s53_s13 = sshll.u32 %s1320_s3, 4  ;;  %s74_s22 = sshll.u32 %s1321_s20, 4  ;;  %s54_s13 = int_to_ptr.vmem [resolvable:$true] %s53_s13  ;;  %s1473_s22 = int_to_ptr.vmem [resolvable:$true] %s74_s22 }
  0x6d   :  { %s1132_s7 = scalar_lea.hbm %s1798_s2, 16 }
  0x6e   :  { %p1133_p6 = scmp.ne.s32.totalorder %s1798_s2, %s1132_s7  ;;  %p1136_p7 = scmp.lt.u32.totalorder %s1132_s7, %s1798_s2 }
  0x70   :  { %p1138_p8 = pnand %p1136_p7, %p1133_p6 }
  0x72   :  { %1141 = shalt.err (!%p1138_p8)
}
  0x73   :  { %s1142_s0 = scalar_lea.vmem %s54_s13, 16  ;;  %s1146_s25 = scalar_lea.vmem %s54_s13, 32 }
  0x74   :  { %p1143_p9 = scmp.ne.s32.totalorder %s54_s13, %s1142_s0  ;;  %p1147_p10 = scmp.lt.s32.totalorder %s54_s13, %s54_s13 }
  0x75   :  { %p1148_p11 = scmp.lt.s32.totalorder %s1146_s25, %s1142_s0 }
  0x77   :  { %p1149_p12 = por %p1148_p11, %p1147_p10 }
  0x79   :  { %p1150_p13 = pnand %p1149_p12, %p1143_p9 }
  0x7b   :  { %1153 = shalt.err (!%p1150_p13)
}
  0x7c   :  { %56 = dma.hbm_to_vmem [thread:$0]  %s1798_s2, 16, %s54_s13, [#allocation6]  }
  0x7d   :  { %s1154_s14 = scalar_lea.hbm %s1800_s4, 256 }
  0x7e   :  { %p1155_p0 = scmp.ne.s32.totalorder %s1800_s4, %s1154_s14  ;;  %p1158_p1 = scmp.lt.u32.totalorder %s1154_s14, %s1800_s4 }
  0x80   :  { %p1160_p2 = pnand %p1158_p1, %p1155_p0 }
  0x82   :  { %1163 = shalt.err (!%p1160_p2)
}
  0x83   :  { %s1164_s20 = scalar_lea.vmem %s1473_s22, 256  ;;  %p1169_p4 = scmp.lt.s32.totalorder %s1473_s22, %s1473_s22 }
  0x84   :  { %p1165_p3 = scmp.ne.s32.totalorder %s1473_s22, %s1164_s20  ;;  %p1170_p5 = scmp.lt.s32.totalorder %s1164_s20, %s1164_s20 }
  0x86   :  { %p1171_p6 = por %p1170_p5, %p1169_p4 }
  0x88   :  { %p1172_p7 = pnand %p1171_p6, %p1165_p3 }
  0x8a   :  { %1175 = shalt.err (!%p1172_p7)
}
  0x8b   :  { %80 = dma.hbm_to_vmem [thread:$0]  %s1800_s4, 256, %s1473_s22, [#allocation9], %s1311_s27, %s1311_s27, %s1312_s28  }
  0x8c   :  { %s1322_s1 = smov [#allocation13]   ;;  %s1323_s7 = smov [#allocation16]  }
  0x8d   :  { %s96_s18 = sshll.u32 %s1322_s1, 4  ;;  %s118_s21 = sshll.u32 %s1323_s7, 4  ;;  %s97_s18 = int_to_ptr.vmem [resolvable:$true] %s96_s18  ;;  %s1507_s21 = int_to_ptr.vmem [resolvable:$true] %s118_s21 }
  0x8e   :  { %s1176_s29 = scalar_lea.hbm %s1802_s6, 256 }
  0x8f   :  { %p1177_p8 = scmp.ne.s32.totalorder %s1802_s6, %s1176_s29  ;;  %p1180_p9 = scmp.lt.u32.totalorder %s1176_s29, %s1802_s6 }
  0x91   :  { %p1182_p10 = pnand %p1180_p9, %p1177_p8 }
  0x93   :  { %1185 = shalt.err (!%p1182_p10)
}
  0x94   :  { %s1186_s4 = scalar_lea.vmem %s97_s18, 256  ;;  %p1191_p12 = scmp.lt.s32.totalorder %s97_s18, %s97_s18 }
  0x95   :  { %p1187_p11 = scmp.ne.s32.totalorder %s97_s18, %s1186_s4  ;;  %p1192_p13 = scmp.lt.s32.totalorder %s1186_s4, %s1186_s4 }
  0x97   :  { %p1193_p0 = por %p1192_p13, %p1191_p12 }
  0x99   :  { %p1194_p1 = pnand %p1193_p0, %p1187_p11 }
  0x9b   :  { %1197 = shalt.err (!%p1194_p1)
}
  0x9c   :  { %102 = dma.hbm_to_vmem [thread:$0]  %s1802_s6, 256, %s97_s18, [#allocation12], %s1311_s27, %s1311_s27, %s1312_s28  }
  0x9d   :  { %s1198_s16 = scalar_lea.hbm %s1804_s8, 256 }
  0x9e   :  { %p1199_p2 = scmp.ne.s32.totalorder %s1804_s8, %s1198_s16  ;;  %p1202_p3 = scmp.lt.u32.totalorder %s1198_s16, %s1804_s8 }
  0xa0   :  { %p1204_p4 = pnand %p1202_p3, %p1199_p2 }
  0xa2   :  { %1207 = shalt.err (!%p1204_p4)
}
  0xa3   :  { %s1208_s2 = scalar_lea.vmem %s1507_s21, 256  ;;  %p1213_p6 = scmp.lt.s32.totalorder %s1507_s21, %s1507_s21 }
  0xa4   :  { %p1209_p5 = scmp.ne.s32.totalorder %s1507_s21, %s1208_s2  ;;  %p1214_p7 = scmp.lt.s32.totalorder %s1208_s2, %s1208_s2 }
  0xa6   :  { %p1215_p8 = por %p1214_p7, %p1213_p6 }
  0xa8   :  { %p1216_p9 = pnand %p1215_p8, %p1209_p5 }
  0xaa   :  { %1219 = shalt.err (!%p1216_p9)
}
  0xab   :  { %124 = dma.hbm_to_vmem [thread:$0]  %s1804_s8, 256, %s1507_s21, [#allocation15], %s1311_s27, %s1311_s27, %s1312_s28  }
  0xac   :  { %s1324_s1 = smov [#allocation19]   ;;  %s1220_s26 = scalar_lea.hbm %s1806_s10, 128 }
  0xad   :  { %s141_s18 = sshll.u32 %s1324_s1, 4  ;;  %p1221_p10 = scmp.ne.s32.totalorder %s1806_s10, %s1220_s26  ;;  %s142_s18 = int_to_ptr.vmem [resolvable:$true] %s141_s18 }
  0xae   :  { %p1224_p11 = scmp.lt.u32.totalorder %s1220_s26, %s1806_s10 }
  0xb0   :  { %p1226_p12 = pnand %p1224_p11, %p1221_p10 }
  0xb2   :  { %1229 = shalt.err (!%p1226_p12)
}
  0xb3   :  { %s1230_s5 = scalar_lea.vmem %s142_s18, 128  ;;  %p1235_p0 = scmp.lt.s32.totalorder %s142_s18, %s142_s18 }
  0xb4   :  { %p1231_p13 = scmp.ne.s32.totalorder %s142_s18, %s1230_s5  ;;  %p1236_p1 = scmp.lt.s32.totalorder %s1230_s5, %s1230_s5 }
  0xb6   :  { %p1237_p2 = por %p1236_p1, %p1235_p0 }
  0xb8   :  { %p1238_p3 = pnand %p1237_p2, %p1231_p13 }
  0xba   :  { %1241 = shalt.err (!%p1238_p3)
}
  0xbb   :  { %144 = dma.hbm_to_vmem [thread:$0]  %s1806_s10, 128, %s142_s18, [#allocation18]  }
  0xbc   :  { %1280 = dma.done.wait [#allocation3], 1024  }
  0xbd   :  { %1281 = vsyncadd [#allocation3], 4294966272 }
  0xbe   :  { %1282 = dma.done.wait [#allocation6], 272  }
  0xbf   :  { %1283 = vsyncadd [#allocation6], 4294967024 }
  0xc0   :  { %1284 = dma.done.wait [#allocation9], 1280  }
  0xc1   :  { %1285 = vsyncadd [#allocation9], 4294966016 }
  0xc2   :  { %1286 = dma.done.wait [#allocation12], 272  }
  0xc3   :  { %1287 = vsyncadd [#allocation12], 4294967024 }
  0xc4   :  { %1288 = dma.done.wait [#allocation15], 272  }
  0xc5   :  { %1289 = vsyncadd [#allocation15], 4294967024 }
  0xc6   :  { %1290 = dma.done.wait [#allocation18], 144  }
  0xc7   :  { %1291 = vsyncadd [#allocation18], 4294967152  ;;  %v215_v0 = vlaneseq  ;;  %v1325_v2 = vmov 0.0   ;;  %v1559_v4 = vld [vmem:[#allocation5] sm:$0xf]  ;;  %v220_v40 = vld [vmem:[#allocation19] sm:$0xff]  }
  0xc8   :  { %v1561_v5 = vld [vmem:[#allocation5 + $0x4] sm:$0xf]  ;;  %v1563_v6 = vld [vmem:[#allocation5 + $0x8] sm:$0xf]  ;;  %v1565_v7 = vld [vmem:[#allocation5 + $0xc] sm:$0xf] }
  0xc9   :  { %v1556_v1 = vand.u32 127, %v215_v0  ;;  %v1567_v8 = vld [vmem:[#allocation7] ss:$0 sm:$0xff]  ;;  %v1569_v9 = vld [vmem:[#allocation8] sm:$0xf]  ;;  %v1633_v41 = vmov 0.0  }
  0xca   :  { %v1571_v10 = vld [vmem:[#allocation8 + $0x4] sm:$0xf]  ;;  %v1573_v11 = vld [vmem:[#allocation8 + $0x8] sm:$0xf]  ;;  %v1575_v12 = vld [vmem:[#allocation8 + $0xc] sm:$0xf] }
  0xcb   :  { %vm217_vm0 = vcmp.eq.s32.totalorder %v1556_v1, 15  ;;  %v1577_v13 = vld [vmem:[#allocation8 + $0x10] sm:$0xf]  ;;  %v1579_v14 = vld [vmem:[#allocation8 + $0x14] sm:$0xf]  ;;  %s1637_s10 = smov 0  }
  0xcc   :  { %v800_v3 = vsel %vm217_vm0, 1.0, %v1325_v2   ;;  %v1581_v15 = vld [vmem:[#allocation8 + $0x18] sm:$0xf]  ;;  %v1583_v16 = vld [vmem:[#allocation8 + $0x1c] sm:$0xf] }
  0xcd   :  { %v1585_v17 = vld [vmem:[#allocation8 + $0x20] sm:$0xf]  ;;  %v1587_v18 = vld [vmem:[#allocation8 + $0x24] sm:$0xf]  ;;  %v1589_v19 = vld [vmem:[#allocation8 + $0x28] sm:$0xf] }
  0xce   :  { %v1591_v20 = vld [vmem:[#allocation8 + $0x2c] sm:$0xf]  ;;  %v1593_v21 = vld [vmem:[#allocation8 + $0x30] sm:$0xf]  ;;  %v1595_v22 = vld [vmem:[#allocation8 + $0x34] sm:$0xf] }
  0xcf   :  { %v1597_v23 = vld [vmem:[#allocation8 + $0x38] sm:$0xf]  ;;  %v1599_v24 = vld [vmem:[#allocation8 + $0x3c] sm:$0xf]  ;;  %v1601_v25 = vld [vmem:[#allocation10] sm:$0xf] }
  0xd0   :  { %v1603_v26 = vld [vmem:[#allocation10 + $0x4] sm:$0xf]  ;;  %v1605_v27 = vld [vmem:[#allocation10 + $0x8] sm:$0xf]  ;;  %v1607_v28 = vld [vmem:[#allocation10 + $0xc] sm:$0xf] }
  0xd1   :  { %v1609_v29 = vld [vmem:[#allocation11] ss:$0 sm:$0xff]  ;;  %v1611_v30 = vld [vmem:[#allocation13] sm:$0xf]  ;;  %v1613_v31 = vld [vmem:[#allocation13 + $0x4] sm:$0xf] }
  0xd2   :  { %v1615_v32 = vld [vmem:[#allocation13 + $0x8] sm:$0xf]  ;;  %v1617_v33 = vld [vmem:[#allocation13 + $0xc] sm:$0xf]  ;;  %v1619_v34 = vld [vmem:[#allocation14] ss:$0 sm:$0xff] }
  0xd3   :  { %v1621_v35 = vld [vmem:[#allocation16] sm:$0xf]  ;;  %v1623_v36 = vld [vmem:[#allocation16 + $0x4] sm:$0xf]  ;;  %v1625_v37 = vld [vmem:[#allocation16 + $0x8] sm:$0xf] }
  0xd4   :  { %v1627_v38 = vld [vmem:[#allocation16 + $0xc] sm:$0xf]  ;;  %v1629_v39 = vld [vmem:[#allocation17] ss:$0 sm:$0xff] }
  0xd5 LB: > { %v801_v42 = vcombine.low %v1569_v9, %v1571_v10  ;;  %v810_v43 = vcombine.low %v1559_v4, %v1561_v5  ;;  %v1326_v44 = vmov 0.0   ;;  %v802_v45 = vcombine.low %v1573_v11, %v1575_v12  ;;  %s1328_s28 = smov 64   ;;  %s1329_s21 = smov 32   ;;  %s1308_s10 = sphi %s1637_s10, %s226_s10   ;;  %v1304_v40 = vphi %v220_v40, %v662_v40   ;;  %v1300_v41 = vphi %v1633_v41, %v582_v41   ;;  %v1296_v3 = vphi %v800_v3, %v828_v3  }
  0xd6   : > { %850 = vmatprep.subr.bf16.mxu0 %v1326_v44  ;;  %870 = vmatprep.subr.bf16.mxu1 %v1326_v44  ;;  %v811_v46 = vcombine.low %v1563_v6, %v1565_v7  ;;  %vm1327_vm1 = vmmov 0   ;;  %v323_v47 = vpack.c.bf16 %v1304_v40, %v1304_v40  ;;  %vm336_vm2 = vcmask 261120   ;;  %s809_s4 = sshll.u32 %s1308_s10, 3  ;;  %s1330_s15 = smov 96  }
  0xd7   : > { %851 = vmatpush3.bf16.msra.mxu0 %v801_v42  ;;  %871 = vmatpush3.bf16.msra.mxu1 %v810_v43  ;;  %v803_v48 = vcombine.low %v1577_v13, %v1579_v14  ;;  %v804_v49 = vcombine.low %v1581_v15, %v1583_v16  ;;  %v805_v50 = vcombine.low %v1585_v17, %v1587_v18  ;;  %s320_s22 = scalar_lea.vmem [#allocation2], %s809_s4  ;;  %p419_p4 = scmp.eq.s32.totalorder %s1308_s10, 0 }
  0xd8   : > { %852 = vmatprep.subr.bf16.mxu0 %v1326_v44  ;;  %872 = vmatprep.subr.bf16.mxu1 %v1326_v44  ;;  %v806_v51 = vcombine.low %v1589_v19, %v1591_v20  ;;  %v807_v52 = vcombine.low %v1593_v21, %v1595_v22  ;;  %v808_v53 = vcombine.low %v1597_v23, %v1599_v24  ;;  %v321_v2 = vld [vmem:[%s320_s22] sm:$0xff]  ;;  %s648_s14 = scalar_lea.vmem [#allocation20], %s809_s4  ;;  %s226_s10 = sadd.s32 1, %s1308_s10  }
  0xd9   : > { %874 = vmatprep.mubr.msk.bf16.mxu1 %vm1327_vm1, %v1326_v44  ;;  %866 = vmatprep.mubr.msk.bf16.mxu0 %vm1327_vm1, %v1326_v44  ;;  %v230_v54 = vpack.c.bf16 %v1296_v3, %v1296_v3  ;;  %s420_s12 = scalar_select %p419_p4, 1, 0 }
  0xda   : > { %392 = vrot.lane.b32.xlu0 %v1567_v8, %s1328_s28  ;;  %p223_p5 = scmp.ge.s32.totalorder %s226_s10, 8  }
  0xdb   : > { %853 = vmatpush3.bf16.msra.mxu0 %v802_v45  ;;  %873 = vmatpush3.bf16.msra.mxu1 %v811_v46  ;;  %s1331_s16 = smov (%p223_p5), [#allocation20]  }
  0xdc   : > { %854 = vmatprep.subr.bf16.mxu0 %v1326_v44  ;;  %878 = vmatprep.subr.bf16.mxu1 %v1326_v44  ;;  %s765_s17 = sshll.u32 (%p223_p5), %s1331_s16, 4  ;;  %s766_s17 = int_to_ptr.vmem [resolvable:$true] %s765_s17 }
  0xdd   :  { %s1242_s19 = scalar_lea.vmem (%p223_p5), %s766_s17, 1024  ;;  %p1247_p7 = scmp.lt.s32.totalorder (%p223_p5), %s766_s17, %s766_s17 }
  0xde   : > { %875 = vmatmul.mubr.msk.bf16.vlgmr.msra.gmra.mrb[0].mxu1 %vm336_vm2, %v323_v47  ;;  %p1243_p6 = scmp.ne.s32.totalorder (%p223_p5), %s766_s17, %s1242_s19  ;;  %p1248_p8 = scmp.lt.s32.totalorder (%p223_p5), %s1242_s19, %s1242_s19 }
  0xdf   : > { %855 = vmatpush3.bf16.msra.mxu0 %v803_v48  ;;  %882 = vmatprep.mubr.msk.bf16.mxu1 %vm1327_vm1, %v1326_v44 }
  0xe0   : > { %856 = vmatprep.subr.bf16.mxu0 %v1326_v44  ;;  %p1249_p9 = por (%p223_p5), %p1248_p8, %p1247_p7 }
  0xe2   :  { %p1250_p10 = pnand (%p223_p5), %p1249_p9, %p1243_p6 }
  0xe3   : > { %857 = vmatpush3.bf16.msra.mxu0 %v804_v49 }
  0xe4   : > { %858 = vmatprep.subr.bf16.mxu0 %v1326_v44 }
  0xe7   : > { %859 = vmatpush3.bf16.msra.mxu0 %v805_v50 }
  0xe8   : > { %860 = vmatprep.subr.bf16.mxu0 %v1326_v44 }
  0xeb   : > { %861 = vmatpush3.bf16.msra.mxu0 %v806_v51  ;;  %v816_v51 = vcombine.low %v1601_v25, %v1603_v26 }
  0xec   : > { %862 = vmatprep.subr.bf16.mxu0 %v1326_v44 }
  0xed   : > { %879 = vmatpush3.bf16.msra.mxu1 %v816_v51 }
  0xee   : > { %880 = vmatprep.subr.bf16.mxu1 %v1326_v44 }
  0xef   : > { %863 = vmatpush3.bf16.msra.mxu0 %v807_v52  ;;  %v817_v52 = vcombine.low %v1605_v27, %v1607_v28 }
  0xf0   : > { %864 = vmatprep.subr.bf16.mxu0 %v1326_v44 }
  0xf1   : > { %881 = vmatpush3.bf16.msra.mxu1 %v817_v52 }
  0xf2   : > { %886 = vmatprep.subr.bf16.mxu1 %v1326_v44 }
  0xf3   : > { %865 = vmatpush3.bf16.msra.mxu0 %v808_v53 }
  0xf6   : > { %867 = vmatmul.mubr.bf16.vlgmr.msra.gmra.mrb[0].mxu0 %v230_v54 }
 0x14c   : > { %v393_v55 = vpop.permute.xlu0 %392 }
 0x1b1   : > { %v374_v56 = vpop.f32.mrb[0].mxu1 }
 0x1b2   : > { %v395_v57 = vadd.f32 %v393_v55, %v374_v56  ;;  %v876_v58 = vpop.f32.mrb[1].mxu1  ;;  %v421_v55 = vstv %s420_s12 }
 0x1b3   : > { %v377_v59 = vpop.f32.mrb[2].mxu1  ;;  %vm422_vm3 = vcmp.eq.s32.totalorder %v421_v55, 1 }
 0x1b4   : > { %397 = vrot.lane.b32.xlu0 %v395_v57, %s1328_s28  ;;  %v877_v60 = vpop.f32.mrb[3].mxu1 }
 0x1b8   : > { %414 = vrot.lane.b32.xlu0 %v1304_v40, %s1329_s21 }
 0x1c9   : > { %v313_v61 = vpop.f32.mrb[0].mxu0 }
 0x1ca   : > { %v868_v62 = vpop.f32.mrb[1].mxu0  ;;  %v322_v3 = vadd.f32 %v321_v2, %v313_v61 }
 0x1cb   : > { %v316_v63 = vpop.f32.mrb[2].mxu0 }
 0x1cc   : > { %v869_v0 = vpop.f32.mrb[3].mxu0  ;;  %v380_v42 = vadd.f32 %v374_v56, %v322_v3 }
 0x1cd   : > { %v819_v0 = vcombine.low %v1611_v30, %v1613_v31 }
 0x1ce   : > { %v813_v43 = vmul.f32 -1.442695, %v380_v42 }
 0x1d0   : > { %956 = vpow2.f32 %v813_v43 }
 0x1da   : > { %v957_v45 = vpop.eup %956 }
 0x1db   : > { %v384_v46 = vadd.f32 1.0, %v957_v45 }
 0x1dd   : > { %958 = vrcp.f32 %v384_v46 }
 0x1e7   : > { %v959_v47 = vpop.eup %958 }
 0x1e8   : > { %v407_v56 = vsub.f32 1.0, %v959_v47 }
 0x226   : > { %v398_v48 = vpop.permute.xlu0 %397 }
 0x227   : > { %v400_v49 = vmul.f32 %v959_v47, %v398_v48 }
 0x229   : > { %402 = vrot.lane.b32.xlu1 %v400_v49, %s1328_s28 }
 0x22a   : > { %v415_v54 = vpop.permute.xlu0 %414 }
 0x22b   : > { %v417_v58 = vmul.f32 %v959_v47, %v415_v54 }
 0x29b   : > { %v403_v40 = vpop.permute.xlu1 %402 }
 0x29c   : > { %v405_v50 = vadd.f32 %v403_v40, %v322_v3  ;;  %v820_v3 = vcombine.low %v1615_v32, %v1617_v33 }
 0x29e   : > { %960 = vtanh.f32 %v405_v50 }
 0x2a8   : > { %v961_v53 = vpop.eup %960 }
 0x2a9   : > { %409 = vrot.lane.b32.xlu1 %v961_v53, %s1330_s15 }
 0x31b   : > { %v410_v57 = vpop.permute.xlu1 %409 }
 0x31c   : > { %v412_v59 = vmul.f32 %v410_v57, %v407_v56 }
 0x31e   : > { %v1700_v60 = vadd.f32 %v417_v58, %v412_v59 }
 0x320   : > { %v424_v61 = vpack.c.bf16 %v1700_v60, %v1700_v60  ;;  %v423_v62 = vsel %vm422_vm3, %v1700_v60, %v1300_v41 }
 0x321   : > { %v489_v63 = vpack.c.bf16 %v423_v62, %v423_v62 }
 0x322   : > { %432 = vrot.lane.b32.xlu1 %v424_v61, %s1330_s15 }
 0x323   : > { %491 = vrot.lane.b32.xlu0 %v489_v63, %s1330_s15 }
 0x326   : > { %560 = vrot.lane.b32.xlu1 %v1619_v34, %s1328_s28 }
 0x394   : > { %v433_v2 = vpop.permute.xlu1 %432 }
 0x395   : > { %883 = vmatmul.mubr.msk.bf16.vlgmr.msra.gmra.mrb[4].mxu1 %vm336_vm2, %v433_v2  ;;  %v492_v41 = vpop.permute.xlu0 %491  ;;  %v826_v2 = vcombine.low %v1625_v37, %v1627_v38 }
 0x396   : > { %887 = vmatpush3.bf16.msra.mxu1 %v819_v0  ;;  %890 = vmatprep.mubr.msk.bf16.mxu1 %vm1327_vm1, %v1326_v44  ;;  %v825_v0 = vcombine.low %v1621_v35, %v1623_v36 }
 0x397   : > { %888 = vmatprep.subr.bf16.mxu1 %v1326_v44 }
 0x398   : > { %v561_v47 = vpop.permute.xlu1 %560 }
 0x39a   : > { %889 = vmatpush3.bf16.msra.mxu1 %v820_v3 }
 0x39b   : > { %894 = vmatprep.subr.bf16.mxu1 %v1326_v44 }
 0x39d   : > { %891 = vmatmul.mubr.msk.bf16.vlgmr.msra.gmra.mrb[8].mxu1 %vm336_vm2, %v492_v41 }
 0x39e   : > { %898 = vmatprep.mubr.msk.bf16.mxu1 %vm1327_vm1, %v1326_v44  ;;  %895 = vmatpush3.bf16.msra.mxu1 %v825_v0 }
 0x39f   : > { %896 = vmatprep.subr.bf16.mxu1 %v1326_v44 }
 0x3a2   : > { %897 = vmatpush3.bf16.msra.mxu1 %v826_v2 }
 0x468   : > { %v483_v42 = vpop.f32.mrb[4].mxu1 }
 0x469   : > { %v884_v43 = vpop.f32.mrb[5].mxu1  ;;  %v484_v52 = vadd.f32 %v1609_v29, %v483_v42 }
 0x46a   : > { %v486_v45 = vpop.f32.mrb[6].mxu1 }
 0x46b   : > { %v885_v46 = vpop.f32.mrb[7].mxu1 }
 0x470   : > { %v542_v48 = vpop.f32.mrb[8].mxu1 }
 0x471   : > { %v563_v49 = vadd.f32 %v561_v47, %v542_v48  ;;  %v892_v40 = vpop.f32.mrb[9].mxu1  ;;  %v548_v53 = vadd.f32 %v542_v48, %v484_v52 }
 0x472   : > { %v545_v50 = vpop.f32.mrb[10].mxu1 }
 0x473   : > { %565 = vrot.lane.b32.xlu0 %v563_v49, %s1328_s28  ;;  %v893_v51 = vpop.f32.mrb[11].mxu1  ;;  %v822_v54 = vmul.f32 -1.442695, %v548_v53 }
 0x475   : > { %962 = vpow2.f32 %v822_v54 }
 0x47f   : > { %v963_v55 = vpop.eup %962 }
 0x480   : > { %v552_v56 = vadd.f32 1.0, %v963_v55 }
 0x482   : > { %964 = vrcp.f32 %v552_v56 }
 0x48c   : > { %v965_v57 = vpop.eup %964 }
 0x48d   : > { %v575_v41 = vsub.f32 1.0, %v965_v57  ;;  %v581_v43 = vmul.f32 %v965_v57, %v423_v62  ;;  %v652_v62 = vcvt.s32.f32 %v1556_v1 }
 0x4e5   : > { %v566_v58 = vpop.permute.xlu0 %565 }
 0x4e6   : > { %v568_v59 = vmul.f32 %v965_v57, %v566_v58 }
 0x4e8   : > { %570 = vrot.lane.b32.xlu1 %v568_v59, %s1328_s28 }
 0x55a   : > { %v571_v61 = vpop.permute.xlu1 %570 }
 0x55b   : > { %v573_v63 = vadd.f32 %v571_v61, %v484_v52 }
 0x55d   : > { %966 = vtanh.f32 %v573_v63 }
 0x567   : > { %v967_v3 = vpop.eup %966 }
 0x568   : > { %577 = vrot.lane.b32.xlu0 %v967_v3, %s1330_s15 }
 0x5da   : > { %v578_v42 = vpop.permute.xlu0 %577 }
 0x5db   : > { %v580_v45 = vmul.f32 %v578_v42, %v575_v41 }
 0x5dd   : > { %v582_v41 = vadd.f32 %v581_v43, %v580_v45  }
 0x5df   : > { %v583_v46 = vpack.c.bf16 %v582_v41, %v582_v41 }
 0x5e1   : > { %591 = vrot.lane.b32.xlu1 %v583_v46, %s1330_s15 }
 0x653   : > { %v592_v47 = vpop.permute.xlu1 %591 }
 0x654   : > { %899 = vmatmul.mubr.msk.bf16.vlgmr.msra.gmra.mrb[12].mxu1 %vm336_vm2, %v592_v47 }
 0x727   : > { %v642_v48 = vpop.f32.mrb[12].mxu1 }
 0x728   : > { %v643_v49 = vadd.f32 %v1629_v39, %v642_v48  ;;  %v900_v40 = vpop.f32.mrb[13].mxu1 }
 0x729   : > { %v645_v50 = vpop.f32.mrb[14].mxu1 }
 0x72a   : > { %649 = vst [vmem:[%s648_s14] sm:$0xff] %v643_v49  ;;  %650 = vmax.xlane.f32.xlu0 %v643_v49  ;;  %v901_v51 = vpop.f32.mrb[15].mxu1 }
 0x731   :  { %v666_v55 = vld [vmem:[#allocation20 + $0x10] sm:$0xff] (%p223_p5)  ;;  %v665_v56 = vld [vmem:[#allocation20 + $0x8] sm:$0xff] (%p223_p5)  ;;  %v667_v57 = vld [vmem:[#allocation20 + $0x18] sm:$0xff] (%p223_p5) }
 0x732   :  { %v669_v58 = vld [vmem:[#allocation20 + $0x28] sm:$0xff] (%p223_p5)  ;;  %v670_v59 = vld [vmem:[#allocation20 + $0x30] sm:$0xff] (%p223_p5)  ;;  %v671_v61 = vld [vmem:[#allocation20 + $0x38] sm:$0xff] (%p223_p5) }
 0x740   : > { %661 = vrot.lane.b32.xlu0 %v1700_v60, %s1330_s15  ;;  %v664_v60 = vld [vmem:[#allocation20] sm:$0xff] (%p223_p5) }
 0x75f   :  { %672 = vmax.xlane.f32.xlu0 (%p223_p5), %v664_v60 }
 0x763   :  { %674 = vmax.xlane.f32.xlu0 (%p223_p5), %v665_v56 }
 0x7b7   : > { %v651_v52 = vpop.xlane.xlu0 %650 }
 0x7b8   : > { %vm653_vm4 = vcmp.eq.f32.partialorder %v643_v49, %v651_v52 }
 0x7b9   : > { %v654_v53 = vsel %vm653_vm4, %v652_v62, 128.0 }
 0x7ba   : > { %655 = vmin.xlane.f32.xlu1 %v654_v53 }
 0x7bb   : > { %v662_v40 = vpop.permute.xlu0 %661  }
 0x7be   :  { %676 = vmax.xlane.f32.xlu1 (%p223_p5), %v666_v55 }
 0x7c2   :  { %678 = vmax.xlane.f32.xlu1 (%p223_p5), %v667_v57 }
 0x7c6   :  { %682 = vmax.xlane.f32.xlu1 (%p223_p5), %v669_v58 }
 0x7ca   :  { %686 = vmax.xlane.f32.xlu1 (%p223_p5), %v671_v61 }
 0x7ec   :  { %v673_v63 = vpop.xlane.xlu0 (%p223_p5), %672 }
 0x7ed   :  { %v1749_v2 = vsub.f32 (%p223_p5), %v664_v60, %v673_v63 }
 0x7ef   :  { %v696_v4 = vmul.f32 (%p223_p5), 1.442695, %v1749_v2 }
 0x7f0   :  { %v675_v6 = vpop.xlane.xlu0 (%p223_p5), %674 }
 0x7f1   :  { %968 = vpow2.f32 (%p223_p5), %v696_v4  ;;  %v1755_v8 = vsub.f32 (%p223_p5), %v665_v56, %v675_v6 }
 0x7f3   :  { %v698_v10 = vmul.f32 (%p223_p5), 1.442695, %v1755_v8 }
 0x7fb   :  { %v969_v22 = vpop.eup (%p223_p5), %968 }
 0x843   :  { %225 = sbr.rel (!%p223_p5) target bundleno = 213 (0xd5), region = 117 }
 0x847   : > { %v656_v54 = vpop.xlane.xlu1 %655 }
 0x848   : > { %vm657_vm5 = vcmp.eq.f32.partialorder %v652_v62, %v656_v54 }
 0x849   : > { %v828_v3 = vsel %vm657_vm5, 1.0, %v1326_v44   ;;  %v668_v44 = vld [vmem:[#allocation20 + $0x20] sm:$0xff] (%p223_p5) }
 0x84a   :  { %680 = vmax.xlane.f32.xlu0 %v668_v44 }
 0x84b   :  { %v677_v0 = vpop.xlane.xlu1 %676 }
 0x84c   :  { %v1751_v1 = vsub.f32 %v666_v55, %v677_v0 }
 0x84e   :  { %684 = vmax.xlane.f32.xlu0 %v670_v59  ;;  %v700_v5 = vmul.f32 1.442695, %v1751_v1 }
 0x84f   :  { %v679_v7 = vpop.xlane.xlu1 %678 }
 0x850   :  { %v1757_v9 = vsub.f32 %v667_v57, %v679_v7  ;;  %970 = vpow2.f32 %v700_v5 }
 0x851   :  { %972 = vpow2.f32 %v698_v10 }
 0x852   :  { %v702_v11 = vmul.f32 1.442695, %v1757_v9  ;;  %712 = vadd.xlane.f32.xlu0 %v969_v22 }
 0x853   :  { %v683_v13 = vpop.xlane.xlu1 %682 }
 0x854   :  { %v1763_v15 = vsub.f32 %v669_v58, %v683_v13  ;;  %974 = vpow2.f32 %v702_v11 }
 0x856   :  { %v706_v17 = vmul.f32 1.442695, %v1763_v15 }
 0x857   :  { %v687_v19 = vpop.xlane.xlu1 %686 }
 0x858   :  { %v1769_v21 = vsub.f32 %v671_v61, %v687_v19 }
 0x85a   :  { %v710_v24 = vmul.f32 1.442695, %v1769_v21  ;;  %v971_v25 = vpop.eup %970 }
 0x85b   :  { %v973_v26 = vpop.eup %972  ;;  %716 = vadd.xlane.f32.xlu0 %v971_v25 }
 0x85c   :  { %714 = vadd.xlane.f32.xlu1 %v973_v26 }
 0x85e   :  { %v975_v27 = vpop.eup %974 }
 0x860   :  { %718 = vadd.xlane.f32.xlu1 %v975_v27 }
 0x8d7   :  { %v681_v12 = vpop.xlane.xlu0 %680 }
 0x8d8   :  { %v1761_v14 = vsub.f32 %v668_v44, %v681_v12 }
 0x8da   :  { %v704_v16 = vmul.f32 1.442695, %v1761_v14 }
 0x8db   :  { %v685_v18 = vpop.xlane.xlu0 %684 }
 0x8dc   :  { %976 = vpow2.f32 %v704_v16  ;;  %v1767_v20 = vsub.f32 %v670_v59, %v685_v18 }
 0x8dd   :  { %978 = vpow2.f32 %v706_v17 }
 0x8de   :  { %v708_v23 = vmul.f32 1.442695, %v1767_v20 }
 0x8df   :  { %v713_v32 = vpop.xlane.xlu0 %712 }
 0x8e0   :  { %980 = vpow2.f32 %v708_v23 }
 0x8e1   :  { %982 = vpow2.f32 %v710_v24 }
 0x8e2   :  { %984 = vlog2.f32 %v713_v32 }
 0x8e6   :  { %v977_v28 = vpop.eup %976 }
 0x8e7   :  { %720 = vadd.xlane.f32.xlu0 %v977_v28  ;;  %v979_v29 = vpop.eup %978 }
 0x8e8   :  { %722 = vadd.xlane.f32.xlu1 %v979_v29  ;;  %v717_v34 = vpop.xlane.xlu0 %716 }
 0x8e9   :  { %v715_v33 = vpop.xlane.xlu1 %714 }
 0x8ea   :  { %v981_v30 = vpop.eup %980  ;;  %986 = vlog2.f32 %v715_v33 }
 0x8eb   :  { %724 = vadd.xlane.f32.xlu0 %v981_v30  ;;  %v983_v31 = vpop.eup %982  ;;  %988 = vlog2.f32 %v717_v34 }
 0x8ec   :  { %726 = vadd.xlane.f32.xlu1 %v983_v31  ;;  %v985_v37 = vpop.eup %984 }
 0x8ed   :  { %v719_v35 = vpop.xlane.xlu1 %718  ;;  %v729_v38 = vmul.f32 0.6931472, %v985_v37 }
 0x8ee   :  { %990 = vlog2.f32 %v719_v35 }
 0x8ef   :  { %v744_v41 = vsub.f32 %v1749_v2, %v729_v38 }
 0x8f1   :  { %752 = vst [vmem:[#allocation20] sm:$0xff] %v744_v41 }
 0x8f4   :  { %v987_v42 = vpop.eup %986 }
 0x8f5   :  { %v989_v43 = vpop.eup %988  ;;  %v731_v45 = vmul.f32 0.6931472, %v987_v42 }
 0x8f6   :  { %v733_v47 = vmul.f32 0.6931472, %v989_v43 }
 0x8f7   :  { %v745_v48 = vsub.f32 %v1755_v8, %v731_v45 }
 0x8f8   :  { %v991_v49 = vpop.eup %990  ;;  %v746_v40 = vsub.f32 %v1751_v1, %v733_v47 }
 0x8f9   :  { %753 = vst [vmem:[#allocation20 + $0x8] sm:$0xff] %v745_v48  ;;  %v735_v51 = vmul.f32 0.6931472, %v991_v49 }
 0x8fa   :  { %754 = vst [vmem:[#allocation20 + $0x10] sm:$0xff] %v746_v40 }
 0x8fb   :  { %v747_v52 = vsub.f32 %v1757_v9, %v735_v51 }
 0x8fd   :  { %755 = vst [vmem:[#allocation20 + $0x18] sm:$0xff] %v747_v52 }
 0x974   :  { %v721_v36 = vpop.xlane.xlu0 %720 }
 0x975   :  { %992 = vlog2.f32 %v721_v36  ;;  %v723_v39 = vpop.xlane.xlu1 %722 }
 0x976   :  { %994 = vlog2.f32 %v723_v39 }
 0x978   :  { %v725_v3 = vpop.xlane.xlu0 %724 }
 0x979   :  { %996 = vlog2.f32 %v725_v3  ;;  %v727_v46 = vpop.xlane.xlu1 %726 }
 0x97a   :  { %998 = vlog2.f32 %v727_v46 }
 0x97f   :  { %v993_v50 = vpop.eup %992 }
 0x980   :  { %v737_v62 = vmul.f32 0.6931472, %v993_v50  ;;  %v995_v53 = vpop.eup %994 }
 0x981   :  { %v739_v55 = vmul.f32 0.6931472, %v995_v53 }
 0x982   :  { %v748_v54 = vsub.f32 %v1761_v14, %v737_v62 }
 0x983   :  { %v997_v60 = vpop.eup %996  ;;  %v749_v57 = vsub.f32 %v1763_v15, %v739_v55 }
 0x984   :  { %756 = vst [vmem:[#allocation20 + $0x20] sm:$0xff] %v748_v54  ;;  %v741_v56 = vmul.f32 0.6931472, %v997_v60  ;;  %v999_v44 = vpop.eup %998 }
 0x985   :  { %757 = vst [vmem:[#allocation20 + $0x28] sm:$0xff] %v749_v57  ;;  %v743_v59 = vmul.f32 0.6931472, %v999_v44 }
 0x986   :  { %v750_v58 = vsub.f32 %v1767_v20, %v741_v56 }
 0x987   :  { %v751_v61 = vsub.f32 %v1769_v21, %v743_v59 }
 0x988   :  { %758 = vst [vmem:[#allocation20 + $0x30] sm:$0xff] %v750_v58 }
 0x989   :  { %759 = vst [vmem:[#allocation20 + $0x38] sm:$0xff] %v751_v61 }
 0x98a   :  { %1253 = shalt.err (!%p1250_p10)
}
 0x98b   :  { %s1254_s2 = scalar_lea.hbm %s1807_s11, 1024 }
 0x98c   :  { %p1255_p11 = scmp.ne.s32.totalorder %s1807_s11, %s1254_s2  ;;  %p1258_p12 = scmp.lt.u32.totalorder %s1254_s2, %s1807_s11 }
 0x98e   :  { %p1260_p13 = pnand %p1258_p12, %p1255_p11 }
 0x990   :  { %1263 = shalt.err (!%p1260_p13)
}
 0x991   :  { %771 = dma.vmem_to_hbm [thread:$0]  %s766_s17, 1024, %s1807_s11, [#allocation4], %s1318_s9, %s1318_s9, %s1319_s23  }
 0x992   :  { %1292 = dma.done.wait [#allocation4], 1024  }
 0x993   :  { %1293 = vsyncadd [#allocation4], 4294966272 }
 0x994   :  { %775 = vsyncpa [#allocation3], 1 }
 0x995   :  { %776 = vsyncpa [#allocation6], 1 }
 0x996   :  { %777 = vsyncpa [#allocation9], 1 }
 0x997   :  { %778 = vsyncpa [#allocation12], 1 }
 0x998   :  { %779 = vsyncpa [#allocation15], 1 }
 0x999   :  { %780 = vsyncpa [#allocation18], 1 }
 0x99a   :  { %781 = vsyncpa [#allocation4], 1 }

</bundles_post_ra>
